<compile_context>
chip_gen: v7x
topology: tpu7x:2x2x1
jax: 0.10.0
libtpu: 0.0.40
codegen_flags: <defaults>
</compile_context>

<pallas_src>
import functools
import math

import jax
import jax.numpy as jnp
from jax.experimental import pallas as pl
from jax.experimental.pallas import tpu as pltpu


# ------------------------- chip-dependent tile targets -------------------------

_TARGETS = None


def _detect_targets():
    try:
        kind = jax.devices()[0].device_kind.lower()
    except Exception:
        kind = ""
    if "v7" in kind:
        # v7x: 64 MiB VMEM / 2 TCs -> tighter tiles, lean on 'parallel' axes.
        return {"tm": 256, "tn": 512, "tk": 512, "tkv": 512,
                "vmem": 48 * 1024 * 1024}
    if "v5e" in kind or "v5 lite" in kind or "v5lite" in kind:
        # v5e: 1 TC, 4x128x128 MXU -> keep N tiles at native MXU width.
        return {"tm": 256, "tn": 256, "tk": 512, "tkv": 512,
                "vmem": 64 * 1024 * 1024}
    # v6e / default: 128 MiB physical VMEM -> larger tiles + deeper pipeline.
    return {"tm": 512, "tn": 512, "tk": 512, "tkv": 512,
            "vmem": 100 * 1024 * 1024}


def _targets():
    global _TARGETS
    if _TARGETS is None:
        _TARGETS = _detect_targets()
    return _TARGETS


def _pick_tile(dim, target, step):
    """Largest tile <= target that divides `dim` and is a multiple of `step`;
    falls back to the full dimension (block == full dim is always legal)."""
    if dim <= target:
        return dim
    t = (target // step) * step
    while t >= step:
        if dim % t == 0:
            return t
        t -= step
    return dim


def _pick_tile_pad(dim, target, step):
    """Like _pick_tile but never falls back to one giant block: returns
    (tile, padded_dim) where padded_dim % tile == 0."""
    if dim <= target:
        return dim, dim
    t = (target // step) * step
    while t >= step:
        if dim % t == 0:
            return t, dim
        t -= step
    tile = (target // step) * step
    padded = ((dim + tile - 1) // tile) * tile
    return tile, padded


def _pad_rows(x, mp):
    m = x.shape[0]
    if mp == m:
        return x
    return jnp.pad(x, ((0, mp - m), (0, 0)))


# ------------------------------ fused linear ------------------------------

def _linear_kernel(*refs, has_ln, has_bias, has_res, activation,
                   use_acc, use_ln_cache):
    it = iter(refs)
    x_ref = next(it)
    w_ref = next(it)
    g_ref = next(it) if has_ln else None
    beta_ref = next(it) if has_ln else None
    b_ref = next(it) if has_bias else None
    r_ref = next(it) if has_res else None
    o_ref = next(it)
    acc_ref = next(it) if use_acc else None
    xln_ref = next(it) if use_ln_cache else None

    def ln_x():
        x = x_ref[...].astype(jnp.float32)
        mean = jnp.mean(x, axis=-1, keepdims=True)
        var = jnp.mean((x - mean) ** 2, axis=-1, keepdims=True)
        x = (x - mean) * jax.lax.rsqrt(var + 1e-5)
        x = x * g_ref[...] + beta_ref[...]
        return x.astype(jnp.bfloat16)

    if has_ln:
        if use_ln_cache:
            # LN'd (bf16) x tile is computed once per M tile (j == 0) and
            # reused for every N tile.  The j axis is marked "arbitrary" so a
            # core shard always starts at j == 0.
            @pl.when(pl.program_id(1) == 0)
            def _():
                xln_ref[...] = ln_x()
            xb = xln_ref[...]
        else:
            xb = ln_x()
    else:
        xb = x_ref[...].astype(jnp.bfloat16)   # no-op if already bf16

    partial = jnp.dot(xb, w_ref[...], preferred_element_type=jnp.float32)

    def epilogue(y):
        if has_bias:
            y = y + b_ref[...]
        if activation == "quick_gelu":
            # x * sigmoid(1.702 x); reciprocal on the EUP slot.
            y = y * pl.reciprocal(1.0 + jnp.exp(-1.702 * y), approx=True)
        if has_res:
            y = y + r_ref[...].astype(jnp.float32)
        o_ref[...] = y.astype(o_ref.dtype)

    if not use_acc:
        epilogue(partial)
    else:
        k = pl.program_id(2)

        @pl.when(k == 0)
        def _():
            acc_ref[...] = partial           # direct write, no zero-fill

        @pl.when(k > 0)
        def _():
            acc_ref[...] += partial

        @pl.when(k == pl.num_programs(2) - 1)
        def _():
            epilogue(acc_ref[...])


def linear(x, w, b=None, *, ln=None, residual=None, activation=None,
           out_dtype=jnp.float32):
    """y = act(LN?(x) @ w + b) + residual?

    x: [M, K] (f32 or bf16), w: [K, N] bf16, b: [N] f32 or None,
    ln: (gamma[K], beta[K]) f32 or None, residual: [M, N] f32 or None.
    Returns [M, N] of out_dtype.
    """
    M, K = x.shape
    N = w.shape[1]
    t = _targets()
    tm, Mp = _pick_tile_pad(M, t["tm"], 8)
    tn = _pick_tile(N, t["tn"], 128)
    tk = K if ln is not None else _pick_tile(K, t["tk"], 128)
    n_j = N // tn
    n_k = K // tk
    use_acc = n_k > 1
    use_ln_cache = (ln is not None) and (n_j > 1)

    xp = _pad_rows(x, Mp)
    rp = _pad_rows(residual, Mp) if residual is not None else None
    grid = (Mp // tm, n_j, n_k)

    in_specs = [
        pl.BlockSpec((tm, tk), lambda i, j, k: (i, k)),
        pl.BlockSpec((tk, tn), lambda i, j, k: (k, j)),
    ]
    args = [xp, w]
    if ln is not None:
        g, beta = ln
        in_specs += [pl.BlockSpec((1, K), lambda i, j, k: (0, 0)),
                     pl.BlockSpec((1, K), lambda i, j, k: (0, 0))]
        args += [g.reshape(1, K), beta.reshape(1, K)]
    if b is not None:
        in_specs.append(pl.BlockSpec((1, tn), lambda i, j, k: (0, j)))
        args.append(b.reshape(1, N))
    if residual is not None:
        in_specs.append(pl.BlockSpec((tm, tn), lambda i, j, k: (i, j)))
        args.append(rp)

    scratch_shapes = []
    if use_acc:
        scratch_shapes.append(pltpu.VMEM((tm, tn), jnp.float32))
    if use_ln_cache:
        scratch_shapes.append(pltpu.VMEM((tm, K), jnp.bfloat16))

    kernel = functools.partial(
        _linear_kernel, has_ln=ln is not None, has_bias=b is not None,
        has_res=residual is not None, activation=activation,
        use_acc=use_acc, use_ln_cache=use_ln_cache)

    out = pl.pallas_call(
        kernel,
        grid=grid,
        in_specs=in_specs,
        out_specs=pl.BlockSpec((tm, tn), lambda i, j, k: (i, j)),
        out_shape=jax.ShapeDtypeStruct((Mp, N), out_dtype),
        scratch_shapes=scratch_shapes,
        compiler_params=pltpu.CompilerParams(
            dimension_semantics=("parallel",
                                 "arbitrary" if use_ln_cache else "parallel",
                                 "arbitrary"),
            vmem_limit_bytes=t["vmem"]),
    )(*args)
    return out[:M] if Mp != M else out


# ------------------------------ LayerNorm (ln_pre only) ------------------------------

def _layernorm_kernel(x_ref, g_ref, b_ref, o_ref):
    x = x_ref[...].astype(jnp.float32)
    mean = jnp.mean(x, axis=-1, keepdims=True)
    var = jnp.mean((x - mean) ** 2, axis=-1, keepdims=True)
    y = (x - mean) * jax.lax.rsqrt(var + 1e-5)
    o_ref[...] = (y * g_ref[...] + b_ref[...]).astype(o_ref.dtype)


def layernorm(x, g, b):
    """x: [M, D], g/b: [D] -> [M, D] f32."""
    M, D = x.shape
    t = _targets()
    tm, Mp = _pick_tile_pad(M, t["tm"], 8)
    xp = _pad_rows(x, Mp)
    out = pl.pallas_call(
        _layernorm_kernel,
        grid=(Mp // tm,),
        in_specs=[
            pl.BlockSpec((tm, D), lambda i: (i, 0)),
            pl.BlockSpec((1, D), lambda i: (0, 0)),
            pl.BlockSpec((1, D), lambda i: (0, 0)),
        ],
        out_specs=pl.BlockSpec((tm, D), lambda i: (i, 0)),
        out_shape=jax.ShapeDtypeStruct((Mp, D), jnp.float32),
        compiler_params=pltpu.CompilerParams(
            dimension_semantics=("parallel",), vmem_limit_bytes=t["vmem"]),
    )(xp, g.reshape(1, D), b.reshape(1, D))
    return out[:M] if Mp != M else out


# ------------------------------ flash attention (head-major) ------------------------------

def _attn_kernel(q_ref, k_ref, v_ref, o_ref, m_sc, l_sc, acc_sc,
                 *, causal, tq, tkv, kv_len):
    qi = pl.program_id(1)
    ki = pl.program_id(2)

    @pl.when(ki == 0)
    def _():
        m_sc[...] = jnp.full_like(m_sc, -jnp.inf)
        l_sc[...] = jnp.zeros_like(l_sc)
        acc_sc[...] = jnp.zeros_like(acc_sc)

    def body():
        q = q_ref[...]            # (tq, Dh) bf16, scale already folded into Wq
        k = k_ref[...]            # (tkv, Dh) bf16
        v = v_ref[...]            # (tkv, Dh) bf16
        s = jax.lax.dot_general(q, k, (((1,), (1,)), ((), ())),
                                preferred_element_type=jnp.float32)  # [tq, tkv]
        if causal or kv_len is not None:
            kv_pos = ki * tkv + jax.lax.broadcasted_iota(jnp.int32, (tq, tkv), 1)
            ok = None
            if causal:
                q_pos = qi * tq + jax.lax.broadcasted_iota(jnp.int32, (tq, tkv), 0)
                ok = kv_pos <= q_pos
            if kv_len is not None:
                lim = kv_pos < kv_len
                ok = lim if ok is None else (ok & lim)
            s = jnp.where(ok, s, -jnp.inf)

        m_prev = m_sc[...]
        m_new = jnp.maximum(m_prev, jnp.max(s, axis=-1, keepdims=True))
        alpha = jnp.exp(m_prev - m_new)
        p = jnp.exp(s - m_new)
        l_sc[...] = alpha * l_sc[...] + jnp.sum(p, axis=-1, keepdims=True)
        acc_sc[...] = alpha * acc_sc[...] + jnp.dot(
            p.astype(jnp.bfloat16), v, preferred_element_type=jnp.float32)
        m_sc[...] = m_new

    if causal:
        # Skip kv tiles that lie entirely above the causal diagonal.
        @pl.when(ki * tkv <= qi * tq + (tq - 1))
        def _():
            body()
    else:
        body()

    @pl.when(ki == pl.num_programs(2) - 1)
    def _():
        o_ref[...] = (acc_sc[...] / l_sc[...]).astype(o_ref.dtype)


def attention(q, k, v, *, causal=False):
    """Head-major flash attention.

    q/k/v: [B*H, S, Dh] bf16 (1/sqrt(Dh) already folded into q at init).
    Returns [B*H, S, Dh] bf16.
    """
    BH, S, Dh = q.shape
    t = _targets()
    tq, Sp = _pick_tile_pad(S, t["tm"], 8)
    tkv = _pick_tile(Sp, t["tkv"], 8)
    if Sp != S:
        pad = ((0, 0), (0, Sp - S), (0, 0))
        q = jnp.pad(q, pad)
        k = jnp.pad(k, pad)
        v = jnp.pad(v, pad)
    kernel = functools.partial(_attn_kernel, causal=causal, tq=tq, tkv=tkv,
                               kv_len=S if Sp != S else None)
    out = pl.pallas_call(
        kernel,
        grid=(BH, Sp // tq, Sp // tkv),
        in_specs=[
            pl.BlockSpec((None, tq, Dh), lambda b, qi, ki: (b, qi, 0)),
            pl.BlockSpec((None, tkv, Dh), lambda b, qi, ki: (b, ki, 0)),
            pl.BlockSpec((None, tkv, Dh), lambda b, qi, ki: (b, ki, 0)),
        ],
        out_specs=pl.BlockSpec((None, tq, Dh), lambda b, qi, ki: (b, qi, 0)),
        out_shape=jax.ShapeDtypeStruct((BH, Sp, Dh), jnp.bfloat16),
        scratch_shapes=[
            pltpu.VMEM((tq, 1), jnp.float32),     # running max m
            pltpu.VMEM((tq, 1), jnp.float32),     # running sum l
            pltpu.VMEM((tq, Dh), jnp.float32),    # output accumulator
        ],
        compiler_params=pltpu.CompilerParams(
            dimension_semantics=("parallel", "parallel", "arbitrary"),
            vmem_limit_bytes=t["vmem"]),
    )(q, k, v)
    if Sp != S:
        out = out[:, :S, :]
    return out


# ------------------------------ logits ------------------------------

def _logits_kernel(img_ref, txt_ref, s_ref, o_ref):
    img = img_ref[...].astype(jnp.float32)
    txt = txt_ref[...].astype(jnp.float32)
    img = img * jax.lax.rsqrt(jnp.sum(img * img, axis=-1, keepdims=True))
    txt = txt * jax.lax.rsqrt(jnp.sum(txt * txt, axis=-1, keepdims=True))
    scale = jnp.exp(s_ref[...])  # (1,1), broadcasts
    sim = jax.lax.dot_general(img.astype(jnp.bfloat16), txt.astype(jnp.bfloat16),
                              (((1,), (1,)), ((), ())),
                              preferred_element_type=jnp.float32)
    o_ref[...] = (scale * sim).astype(o_ref.dtype)


def clip_logits(img_feat, txt_feat, logit_scale):
    """img_feat: [Bi, E], txt_feat: [Bt, E], logit_scale: [1,1] -> [Bi, Bt]."""
    Bi, E = img_feat.shape
    Bt = txt_feat.shape[0]
    t = _targets()
    tbi = _pick_tile(Bi, t["tm"], 8)
    tbt = _pick_tile(Bt, t["tm"], 8)
    return pl.pallas_call(
        _logits_kernel,
        grid=(Bi // tbi, Bt // tbt),
        in_specs=[
            pl.BlockSpec((tbi, E), lambda i, j: (i, 0)),
            pl.BlockSpec((tbt, E), lambda i, j: (j, 0)),
            pl.BlockSpec((1, 1), lambda i, j: (0, 0)),
        ],
        out_specs=pl.BlockSpec((tbi, tbt), lambda i, j: (i, j)),
        out_shape=jax.ShapeDtypeStruct((Bi, Bt), jnp.float32),
        compiler_params=pltpu.CompilerParams(
            dimension_semantics=("parallel", "parallel"),
            vmem_limit_bytes=t["vmem"]),
    )(img_feat, txt_feat, logit_scale)


# ------------------------------ model (glue) ------------------------------

class Config:
    embed_dim = 32
    image_resolution = 16
    vision_layers = 2          # int -> VisionTransformer path
    vision_width = 64
    vision_patch_size = 8
    context_length = 8
    vocab_size = 64
    transformer_width = 32
    transformer_heads = 4
    transformer_layers = 2


def residual_attention_block(x, p, n_head, causal):
    B, S, D = x.shape
    Dh = D // n_head
    x2 = x.reshape(B * S, D)                      # f32 residual stream
    # LN1 fused into the QKV projection; QKV emitted as bf16.
    qkv = linear(x2, p["in_proj_w"], p["in_proj_b"],
                 ln=(p["ln_1_g"], p["ln_1_b"]), out_dtype=jnp.bfloat16)
    # Head-major split (pure layout plumbing, kept in plain JAX on bf16).
    qkv = qkv.reshape(B, S, 3, n_head, Dh).transpose(2, 0, 3, 1, 4)
    qkv = qkv.reshape(3, B * n_head, S, Dh)
    attn = attention(qkv[0], qkv[1], qkv[2], causal=causal)     # [B*H, S, Dh] bf16
    attn = attn.reshape(B, n_head, S, Dh).transpose(0, 2, 1, 3).reshape(B * S, D)
    # Output projection with the residual add fused into the store (f32 out).
    x2 = linear(attn, p["out_proj_w"], p["out_proj_b"], residual=x2)
    # LN2 fused into c_fc (+ QuickGELU on the output tile), bf16 out.
    h = linear(x2, p["c_fc_w"], p["c_fc_b"], ln=(p["ln_2_g"], p["ln_2_b"]),
               activation="quick_gelu", out_dtype=jnp.bfloat16)
    # c_proj with the residual add fused in (f32 out, keeps the residual stream f32).
    x2 = linear(h, p["c_proj_w"], p["c_proj_b"], residual=x2)
    return x2.reshape(B, S, D)


def encode_image(params, image, cfg):
    vp = params["visual"]
    B, C, H, W = image.shape
    p = cfg.vision_patch_size
    g = H // p
    vw = cfg.vision_width
    n_head = vw // 64  # VisionTransformer heads

    # stride-p, kernel-p conv == non-overlapping patch extraction + matmul
    # (patch reshape/transpose kept in plain JAX — pure addressing glue).
    patches = (image.reshape(B, C, g, p, g, p)
                    .transpose(0, 2, 4, 1, 3, 5)
                    .reshape(B * g * g, C * p * p))
    x = linear(patches, vp["conv1_w_t"], None).reshape(B, g * g, vw)   # no bias

    cls = jnp.broadcast_to(vp["class_embedding"][None, None, :], (B, 1, vw))
    x = jnp.concatenate([cls, x], axis=1)            # [B, g*g+1, width]
    x = x + vp["pos_embedding"][None]
    S = g * g + 1
    x = layernorm(x.reshape(B * S, vw), vp["ln_pre_g"], vp["ln_pre_b"]).reshape(B, S, vw)
    for blk in vp["blocks"]:
        x = residual_attention_block(x, blk, n_head, causal=False)   # no mask at all
    x0 = x[:, 0, :]                                  # CLS token
    # ln_post fused into the output projection (no bias).
    x0 = linear(x0, vp["proj"], None, ln=(vp["ln_post_g"], vp["ln_post_b"]))
    return x0


def encode_text(params, text, cfg):
    tp = params["text"]
    B, T = text.shape
    # TODO(synk): embedding gather + EOT-token gather kept in plain JAX (no clean
    # dense-Pallas equivalent; would need scalar-prefetch Element gather).
    x = jnp.take(tp["token_embedding"], text, axis=0)   # [B, T, D]
    x = x + tp["pos_embedding"][None]
    for blk in tp["blocks"]:
        x = residual_attention_block(x, blk, cfg.transformer_heads, causal=True)
    eot = jnp.argmax(text, axis=-1)                      # OpenAI CLIP EOT convention
    x_eot = x[jnp.arange(B), eot]                        # [B, D]
    # ln_final fused into the text projection (LN is per-token, so
    # gather-then-LN == LN-then-gather).
    x = linear(x_eot, tp["text_projection"], None,
               ln=(tp["ln_final_g"], tp["ln_final_b"]))
    return x


def clip_forward(params, image, text, cfg):
    image_features = encode_image(params, image, cfg)
    text_features = encode_text(params, text, cfg)
    logits_per_image = clip_logits(image_features, text_features, params["logit_scale"])
    logits_per_text = logits_per_image.T
    return logits_per_image, logits_per_text


# --------------------------- parameter init ---------------------------

def init_clip_params(key, cfg):
    keys = iter(jax.random.split(key, 64))

    def nrm(shape, std):
        return jax.random.normal(next(keys), shape, jnp.float32) * std

    def block_params(width, n_head, attn_std, proj_std, fc_std):
        # Weights stored as [in, out] (transposed from PyTorch's [out, in]) and
        # cast to bf16 for HBM.  The 1/sqrt(Dh) attention scale is folded into
        # the Q columns of in_proj (numerically equivalent to scaling q).
        dh = width // n_head
        q_scale = dh ** -0.5
        in_w = nrm((width, 3 * width), attn_std)
        in_w = in_w.at[:, :width].multiply(q_scale)
        in_b = jnp.zeros((3 * width,), jnp.float32)
        in_b = in_b.at[:width].multiply(q_scale)
        return dict(
            ln_1_g=jnp.ones((width,), jnp.float32), ln_1_b=jnp.zeros((width,), jnp.float32),
            in_proj_w=in_w.astype(jnp.bfloat16),
            in_proj_b=in_b,
            out_proj_w=nrm((width, width), proj_std).astype(jnp.bfloat16),
            out_proj_b=jnp.zeros((width,), jnp.float32),
            ln_2_g=jnp.ones((width,), jnp.float32), ln_2_b=jnp.zeros((width,), jnp.float32),
            c_fc_w=nrm((width, 4 * width), fc_std).astype(jnp.bfloat16),
            c_fc_b=jnp.zeros((4 * width,), jnp.float32),
            c_proj_w=nrm((4 * width, width), proj_std).astype(jnp.bfloat16),
            c_proj_b=jnp.zeros((width,), jnp.float32),
        )

    vw = cfg.vision_width
    v_heads = vw // 64
    g = cfg.image_resolution // cfg.vision_patch_size
    v_seq = g * g + 1
    v_scale = vw ** -0.5
    v_proj_std = vw ** -0.5 * (2 * cfg.vision_layers) ** -0.5
    v_fc_std = (2 * vw) ** -0.5
    ps = cfg.vision_patch_size
    conv1_w = nrm((vw, 3, ps, ps), 0.02)              # PyTorch conv layout [out, C, p, p]
    visual = dict(
        # pre-flattened + transposed once at load: [C*p*p, width], bf16
        conv1_w_t=conv1_w.reshape(vw, 3 * ps * ps).T.astype(jnp.bfloat16),
        class_embedding=nrm((vw,), v_scale),
        pos_embedding=nrm((v_seq, vw), v_scale),
        ln_pre_g=jnp.ones((vw,), jnp.float32), ln_pre_b=jnp.zeros((vw,), jnp.float32),
        blocks=[block_params(vw, v_heads, vw ** -0.5, v_proj_std, v_fc_std)
                for _ in range(cfg.vision_layers)],
        ln_post_g=jnp.ones((vw,), jnp.float32), ln_post_b=jnp.zeros((vw,), jnp.float32),
        proj=nrm((vw, cfg.embed_dim), v_scale).astype(jnp.bfloat16),
    )

    tw = cfg.transformer_width
    attn_std = tw ** -0.5
    proj_std = tw ** -0.5 * (2 * cfg.transformer_layers) ** -0.5
    fc_std = (2 * tw) ** -0.5
    text = dict(
        token_embedding=nrm((cfg.vocab_size, tw), 0.02),
        pos_embedding=nrm((cfg.context_length, tw), 0.01),
        blocks=[block_params(tw, cfg.transformer_heads, attn_std, proj_std, fc_std)
                for _ in range(cfg.transformer_layers)],
        ln_final_g=jnp.ones((tw,), jnp.float32), ln_final_b=jnp.zeros((tw,), jnp.float32),
        text_projection=nrm((tw, cfg.embed_dim), attn_std).astype(jnp.bfloat16),
    )
    logit_scale = jnp.full((1, 1), math.log(1.0 / 0.07), jnp.float32)
    return dict(visual=visual, text=text, logit_scale=logit_scale)


# --------------------------------- main ---------------------------------

if __name__ == "__main__":
    cfg = Config()
    key = jax.random.PRNGKey(0)
    kp, ki, kt = jax.random.split(key, 3)
    params = init_clip_params(kp, cfg)

    image = jax.random.normal(
        ki, (2, 3, cfg.image_resolution, cfg.image_resolution), jnp.float32)
    text = jax.random.randint(
        kt, (2, cfg.context_length), 1, cfg.vocab_size, jnp.int32)

    fwd = jax.jit(lambda p, img, txt: clip_forward(p, img, txt, cfg))
    logits_per_image, logits_per_text = fwd(params, image, text)
    jax.block_until_ready((logits_per_image, logits_per_text))

    assert logits_per_image.shape == (2, 2)
    assert logits_per_text.shape == (2, 2)
    assert bool(jnp.all(jnp.isfinite(logits_per_image)))
    print("KERNEL_OK")
</pallas_src>

<mosaic_0001>
module attributes {stable_mosaic.version = 11 : i64} {
  func.func @_linear_kernel(%arg0: i32, %arg1: i32, %arg2: i32, %arg3: memref<8x192xf32, #tpu.memory_space<vmem>>, %arg4: memref<192x64xbf16, #tpu.memory_space<vmem>>, %arg5: memref<8x64xf32, #tpu.memory_space<vmem>>) attributes {dimension_semantics = [#tpu.dimension_semantics<parallel>, #tpu.dimension_semantics<parallel>, #tpu.dimension_semantics<arbitrary>], iteration_bounds = array<i64: 1, 1, 1>, scalar_prefetch = 0 : i64, scratch_operands = 0 : i64, tpu.core_type = #tpu.core_type<tc>, window_params = [{transform_indices = @transform_0, window_bounds = array<i64: 8, 192>}, {transform_indices = @transform_1, window_bounds = array<i64: 192, 64>}, {transform_indices = @transform_2, window_bounds = array<i64: 8, 64>}]} {
    %c0 = arith.constant 0 : index
    %c0_0 = arith.constant 0 : index
    %0 = vector.load %arg3[%c0, %c0_0] : memref<8x192xf32, #tpu.memory_space<vmem>>, vector<8x192xf32>
    %1 = arith.truncf %0 : vector<8x192xf32> to vector<8x192xbf16>
    %c0_1 = arith.constant 0 : index
    %c0_2 = arith.constant 0 : index
    %2 = vector.load %arg4[%c0_1, %c0_2] : memref<192x64xbf16, #tpu.memory_space<vmem>>, vector<192x64xbf16>
    %cst = arith.constant dense<0.000000e+00> : vector<8x64xf32>
    %3 = tpu.matmul %1, %2, %cst {dimension_numbers = #tpu.dot_dimension_numbers<[1], [0], [0], [1], [0, 0, 1, 1], [], []>} : vector<8x192xbf16>, vector<192x64xbf16>, vector<8x64xf32> -> vector<8x64xf32>
    %c0_3 = arith.constant 0 : index
    %c0_4 = arith.constant 0 : index
    %4 = vector.load %arg5[%c0_3, %c0_4] : memref<8x64xf32, #tpu.memory_space<vmem>>, vector<8x64xf32>
    tpu.vector_store %arg5[%c0_3, %c0_4], %3 {strides = array<i32>} : memref<8x64xf32, #tpu.memory_space<vmem>>, vector<8x64xf32>,
    return
  }
  func.func @transform_0(%arg0: i32, %arg1: i32, %arg2: i32) -> (i32, i32) {
    %c0_i32 = arith.constant 0 : i32
    return %arg0, %arg2 : i32, i32
  }
  func.func @transform_1(%arg0: i32, %arg1: i32, %arg2: i32) -> (i32, i32) {
    %c0_i32 = arith.constant 0 : i32
    return %arg2, %arg1 : i32, i32
  }
  func.func @transform_2(%arg0: i32, %arg1: i32, %arg2: i32) -> (i32, i32) {
    %c0_i32 = arith.constant 0 : i32
    return %arg0, %arg1 : i32, i32
  }
}

module attributes {stable_mosaic.version = 11 : i64} {
  func.func @_layernorm_kernel(%arg0: i32, %arg1: memref<10x64xf32, #tpu.memory_space<vmem>>, %arg2: memref<1x64xf32, #tpu.memory_space<vmem>>, %arg3: memref<1x64xf32, #tpu.memory_space<vmem>>, %arg4: memref<10x64xf32, #tpu.memory_space<vmem>>) attributes {dimension_semantics = [#tpu.dimension_semantics<parallel>], iteration_bounds = array<i64: 1>, scalar_prefetch = 0 : i64, scratch_operands = 0 : i64, tpu.core_type = #tpu.core_type<tc>, window_params = [{transform_indices = @transform_0, window_bounds = array<i64: 10, 64>}, {pipeline_mode = #tpu.pipeline_mode<synchronous>, transform_indices = @transform_1, window_bounds = array<i64: 1, 64>}, {pipeline_mode = #tpu.pipeline_mode<synchronous>, transform_indices = @transform_2, window_bounds = array<i64: 1, 64>}, {transform_indices = @transform_3, window_bounds = array<i64: 10, 64>}]} {
    %c0 = arith.constant 0 : index
    %c0_0 = arith.constant 0 : index
    %0 = vector.load %arg1[%c0, %c0_0] : memref<10x64xf32, #tpu.memory_space<vmem>>, vector<10x64xf32>
    %cst = arith.constant dense<0.000000e+00> : vector<10xf32>
    %1 = vector.multi_reduction <add>, %0, %cst [1] : vector<10x64xf32> to vector<10xf32>
    %2 = vector.shape_cast %1 : vector<10xf32> to vector<10x1xf32>
    %cst_1 = arith.constant 6.400000e+01 : f32
    %3 = vector.broadcast %cst_1 : f32 to vector<10x1xf32>
    %4 = arith.divf %2, %3 : vector<10x1xf32>
    %5 = vector.broadcast %4 : vector<10x1xf32> to vector<10x64xf32>
    %6 = arith.subf %0, %5 : vector<10x64xf32>
    %7 = arith.mulf %6, %6 : vector<10x64xf32>
    %cst_2 = arith.constant dense<0.000000e+00> : vector<10xf32>
    %8 = vector.multi_reduction <add>, %7, %cst_2 [1] : vector<10x64xf32> to vector<10xf32>
    %9 = vector.shape_cast %8 : vector<10xf32> to vector<10x1xf32>
    %cst_3 = arith.constant 6.400000e+01 : f32
    %10 = vector.broadcast %cst_3 : f32 to vector<10x1xf32>
    %11 = arith.divf %9, %10 : vector<10x1xf32>
    %12 = vector.broadcast %4 : vector<10x1xf32> to vector<10x64xf32>
    %13 = arith.subf %0, %12 : vector<10x64xf32>
    %cst_4 = arith.constant 9.99999974E-6 : f32
    %14 = vector.broadcast %cst_4 : f32 to vector<10x1xf32>
    %15 = arith.addf %11, %14 : vector<10x1xf32>
    %16 = math.rsqrt %15 : vector<10x1xf32>
    %17 = vector.broadcast %16 : vector<10x1xf32> to vector<10x64xf32>
    %18 = arith.mulf %13, %17 : vector<10x64xf32>
    %c0_5 = arith.constant 0 : index
    %c0_6 = arith.constant 0 : index
    %19 = vector.load %arg2[%c0_5, %c0_6] : memref<1x64xf32, #tpu.memory_space<vmem>>, vector<1x64xf32>
    %20 = vector.broadcast %19 : vector<1x64xf32> to vector<10x64xf32>
    %21 = arith.mulf %18, %20 : vector<10x64xf32>
    %c0_7 = arith.constant 0 : index
    %c0_8 = arith.constant 0 : index
    %22 = vector.load %arg3[%c0_7, %c0_8] : memref<1x64xf32, #tpu.memory_space<vmem>>, vector<1x64xf32>
    %23 = vector.broadcast %22 : vector<1x64xf32> to vector<10x64xf32>
    %24 = arith.addf %21, %23 : vector<10x64xf32>
    %c0_9 = arith.constant 0 : index
    %c0_10 = arith.constant 0 : index
    %25 = vector.load %arg4[%c0_9, %c0_10] : memref<10x64xf32, #tpu.memory_space<vmem>>, vector<10x64xf32>
    tpu.vector_store %arg4[%c0_9, %c0_10], %24 {strides = array<i32>} : memref<10x64xf32, #tpu.memory_space<vmem>>, vector<10x64xf32>,
    return
  }
  func.func @transform_0(%arg0: i32) -> (i32, i32) {
    %c0_i32 = arith.constant 0 : i32
    %c0_i32_0 = arith.constant 0 : i32
    return %arg0, %c0_i32 : i32, i32
  }
  func.func @transform_1(%arg0: i32) -> (i32, i32) {
    %c0_i32 = arith.constant 0 : i32
    %c0_i32_0 = arith.constant 0 : i32
    %c0_i32_1 = arith.constant 0 : i32
    return %c0_i32, %c0_i32_0 : i32, i32
  }
  func.func @transform_2(%arg0: i32) -> (i32, i32) {
    %c0_i32 = arith.constant 0 : i32
    %c0_i32_0 = arith.constant 0 : i32
    %c0_i32_1 = arith.constant 0 : i32
    return %c0_i32, %c0_i32_0 : i32, i32
  }
  func.func @transform_3(%arg0: i32) -> (i32, i32) {
    %c0_i32 = arith.constant 0 : i32
    %c0_i32_0 = arith.constant 0 : i32
    return %arg0, %c0_i32 : i32, i32
  }
}

module attributes {stable_mosaic.version = 11 : i64} {
  func.func @_linear_kernel(%arg0: i32, %arg1: i32, %arg2: i32, %arg3: memref<10x64xf32, #tpu.memory_space<vmem>>, %arg4: memref<64x192xbf16, #tpu.memory_space<vmem>>, %arg5: memref<1x64xf32, #tpu.memory_space<vmem>>, %arg6: memref<1x64xf32, #tpu.memory_space<vmem>>, %arg7: memref<1x192xf32, #tpu.memory_space<vmem>>, %arg8: memref<10x192xbf16, #tpu.memory_space<vmem>>) attributes {dimension_semantics = [#tpu.dimension_semantics<parallel>, #tpu.dimension_semantics<parallel>, #tpu.dimension_semantics<arbitrary>], iteration_bounds = array<i64: 1, 1, 1>, scalar_prefetch = 0 : i64, scratch_operands = 0 : i64, tpu.core_type = #tpu.core_type<tc>, window_params = [{transform_indices = @transform_0, window_bounds = array<i64: 10, 64>}, {transform_indices = @transform_1, window_bounds = array<i64: 64, 192>}, {pipeline_mode = #tpu.pipeline_mode<synchronous>, transform_indices = @transform_2, window_bounds = array<i64: 1, 64>}, {pipeline_mode = #tpu.pipeline_mode<synchronous>, transform_indices = @transform_3, window_bounds = array<i64: 1, 64>}, {transform_indices = @transform_4, window_bounds = array<i64: 1, 192>}, {transform_indices = @transform_5, window_bounds = array<i64: 10, 192>}]} {
    %c0 = arith.constant 0 : index
    %c0_0 = arith.constant 0 : index
    %0 = vector.load %arg3[%c0, %c0_0] : memref<10x64xf32, #tpu.memory_space<vmem>>, vector<10x64xf32>
    %cst = arith.constant dense<0.000000e+00> : vector<10xf32>
    %1 = vector.multi_reduction <add>, %0, %cst [1] : vector<10x64xf32> to vector<10xf32>
    %2 = vector.shape_cast %1 : vector<10xf32> to vector<10x1xf32>
    %cst_1 = arith.constant 6.400000e+01 : f32
    %3 = vector.broadcast %cst_1 : f32 to vector<10x1xf32>
    %4 = arith.divf %2, %3 : vector<10x1xf32>
    %5 = vector.broadcast %4 : vector<10x1xf32> to vector<10x64xf32>
    %6 = arith.subf %0, %5 : vector<10x64xf32>
    %7 = arith.mulf %6, %6 : vector<10x64xf32>
    %cst_2 = arith.constant dense<0.000000e+00> : vector<10xf32>
    %8 = vector.multi_reduction <add>, %7, %cst_2 [1] : vector<10x64xf32> to vector<10xf32>
    %9 = vector.shape_cast %8 : vector<10xf32> to vector<10x1xf32>
    %cst_3 = arith.constant 6.400000e+01 : f32
    %10 = vector.broadcast %cst_3 : f32 to vector<10x1xf32>
    %11 = arith.divf %9, %10 : vector<10x1xf32>
    %12 = vector.broadcast %4 : vector<10x1xf32> to vector<10x64xf32>
    %13 = arith.subf %0, %12 : vector<10x64xf32>
    %cst_4 = arith.constant 9.99999974E-6 : f32
    %14 = vector.broadcast %cst_4 : f32 to vector<10x1xf32>
    %15 = arith.addf %11, %14 : vector<10x1xf32>
    %16 = math.rsqrt %15 : vector<10x1xf32>
    %17 = vector.broadcast %16 : vector<10x1xf32> to vector<10x64xf32>
    %18 = arith.mulf %13, %17 : vector<10x64xf32>
    %c0_5 = arith.constant 0 : index
    %c0_6 = arith.constant 0 : index
    %19 = vector.load %arg5[%c0_5, %c0_6] : memref<1x64xf32, #tpu.memory_space<vmem>>, vector<1x64xf32>
    %20 = vector.broadcast %19 : vector<1x64xf32> to vector<10x64xf32>
    %21 = arith.mulf %18, %20 : vector<10x64xf32>
    %c0_7 = arith.constant 0 : index
    %c0_8 = arith.constant 0 : index
    %22 = vector.load %arg6[%c0_7, %c0_8] : memref<1x64xf32, #tpu.memory_space<vmem>>, vector<1x64xf32>
    %23 = vector.broadcast %22 : vector<1x64xf32> to vector<10x64xf32>
    %24 = arith.addf %21, %23 : vector<10x64xf32>
    %25 = arith.truncf %24 : vector<10x64xf32> to vector<10x64xbf16>
    %c0_9 = arith.constant 0 : index
    %c0_10 = arith.constant 0 : index
    %26 = vector.load %arg4[%c0_9, %c0_10] : memref<64x192xbf16, #tpu.memory_space<vmem>>, vector<64x192xbf16>
    %cst_11 = arith.constant dense<0.000000e+00> : vector<10x192xf32>
    %27 = tpu.matmul %25, %26, %cst_11 {dimension_numbers = #tpu.dot_dimension_numbers<[1], [0], [0], [1], [0, 0, 1, 1], [], []>} : vector<10x64xbf16>, vector<64x192xbf16>, vector<10x192xf32> -> vector<10x192xf32>
    %c0_12 = arith.constant 0 : index
    %c0_13 = arith.constant 0 : index
    %28 = vector.load %arg7[%c0_12, %c0_13] : memref<1x192xf32, #tpu.memory_space<vmem>>, vector<1x192xf32>
    %29 = vector.broadcast %28 : vector<1x192xf32> to vector<10x192xf32>
    %30 = arith.addf %27, %29 : vector<10x192xf32>
    %31 = arith.truncf %30 : vector<10x192xf32> to vector<10x192xbf16>
    %c0_14 = arith.constant 0 : index
    %c0_15 = arith.constant 0 : index
    %32 = vector.load %arg8[%c0_14, %c0_15] : memref<10x192xbf16, #tpu.memory_space<vmem>>, vector<10x192xbf16>
    tpu.vector_store %arg8[%c0_14, %c0_15], %31 {strides = array<i32>} : memref<10x192xbf16, #tpu.memory_space<vmem>>, vector<10x192xbf16>,
    return
  }
  func.func @transform_0(%arg0: i32, %arg1: i32, %arg2: i32) -> (i32, i32) {
    %c0_i32 = arith.constant 0 : i32
    return %arg0, %arg2 : i32, i32
  }
  func.func @transform_1(%arg0: i32, %arg1: i32, %arg2: i32) -> (i32, i32) {
    %c0_i32 = arith.constant 0 : i32
    return %arg2, %arg1 : i32, i32
  }
  func.func @transform_2(%arg0: i32, %arg1: i32, %arg2: i32) -> (i32, i32) {
    %c0_i32 = arith.constant 0 : i32
    %c0_i32_0 = arith.constant 0 : i32
    %c0_i32_1 = arith.constant 0 : i32
    return %c0_i32, %c0_i32_0 : i32, i32
  }
  func.func @transform_3(%arg0: i32, %arg1: i32, %arg2: i32) -> (i32, i32) {
    %c0_i32 = arith.constant 0 : i32
    %c0_i32_0 = arith.constant 0 : i32
    %c0_i32_1 = arith.constant 0 : i32
    return %c0_i32, %c0_i32_0 : i32, i32
  }
  func.func @transform_4(%arg0: i32, %arg1: i32, %arg2: i32) -> (i32, i32) {
    %c0_i32 = arith.constant 0 : i32
    %c0_i32_0 = arith.constant 0 : i32
    return %c0_i32, %arg1 : i32, i32
  }
  func.func @transform_5(%arg0: i32, %arg1: i32, %arg2: i32) -> (i32, i32) {
    %c0_i32 = arith.constant 0 : i32
    return %arg0, %arg1 : i32, i32
  }
}

module attributes {stable_mosaic.version = 11 : i64} {
  func.func @_attn_kernel(%arg0: i32, %arg1: i32, %arg2: i32, %arg3: memref<1x5x64xbf16, #tpu.memory_space<vmem>>, %arg4: memref<1x5x64xbf16, #tpu.memory_space<vmem>>, %arg5: memref<1x5x64xbf16, #tpu.memory_space<vmem>>, %arg6: memref<1x5x64xbf16, #tpu.memory_space<vmem>>, %arg7: memref<5x1xf32, #tpu.memory_space<vmem>>, %arg8: memref<5x1xf32, #tpu.memory_space<vmem>>, %arg9: memref<5x64xf32, #tpu.memory_space<vmem>>) attributes {dimension_semantics = [#tpu.dimension_semantics<parallel>, #tpu.dimension_semantics<parallel>, #tpu.dimension_semantics<arbitrary>], iteration_bounds = array<i64: 2, 1, 1>, scalar_prefetch = 0 : i64, scratch_operands = 3 : i64, tpu.core_type = #tpu.core_type<tc>, window_params = [{transform_indices = @transform_0, window_bounds = array<i64: 1, 5, 64>}, {transform_indices = @transform_1, window_bounds = array<i64: 1, 5, 64>}, {transform_indices = @transform_2, window_bounds = array<i64: 1, 5, 64>}, {transform_indices = @transform_3, window_bounds = array<i64: 1, 5, 64>}]} {
    %c0_i32 = arith.constant 0 : i32
    %0 = arith.cmpi eq, %arg2, %c0_i32 : i32
    %1 = arith.extui %0 : i1 to i32
    %c0_i32_0 = arith.constant 0 : i32
    %2 = arith.cmpi ne, %1, %c0_i32_0 : i32
    scf.if %2 {
      %cst_26 = arith.constant 0xFF800000 : f32
      %36 = vector.broadcast %cst_26 : f32 to vector<5x1xf32>
      %c0_27 = arith.constant 0 : index
      %c0_28 = arith.constant 0 : index
      %37 = vector.load %arg7[%c0_27, %c0_28] : memref<5x1xf32, #tpu.memory_space<vmem>>, vector<5x1xf32>
      tpu.vector_store %arg7[%c0_27, %c0_28], %36 {strides = array<i32>} : memref<5x1xf32, #tpu.memory_space<vmem>>, vector<5x1xf32>,
      %cst_29 = arith.constant 0.000000e+00 : f32
      %38 = vector.broadcast %cst_29 : f32 to vector<5x1xf32>
      %c0_30 = arith.constant 0 : index
      %c0_31 = arith.constant 0 : index
      %39 = vector.load %arg8[%c0_30, %c0_31] : memref<5x1xf32, #tpu.memory_space<vmem>>, vector<5x1xf32>
      tpu.vector_store %arg8[%c0_30, %c0_31], %38 {strides = array<i32>} : memref<5x1xf32, #tpu.memory_space<vmem>>, vector<5x1xf32>,
      %cst_32 = arith.constant 0.000000e+00 : f32
      %40 = vector.broadcast %cst_32 : f32 to vector<5x64xf32>
      %c0_33 = arith.constant 0 : index
      %c0_34 = arith.constant 0 : index
      %41 = vector.load %arg9[%c0_33, %c0_34] : memref<5x64xf32, #tpu.memory_space<vmem>>, vector<5x64xf32>
      tpu.vector_store %arg9[%c0_33, %c0_34], %40 {strides = array<i32>} : memref<5x64xf32, #tpu.memory_space<vmem>>, vector<5x64xf32>,
    } else {
    }
    %c0 = arith.constant 0 : index
    %c0_1 = arith.constant 0 : index
    %c0_2 = arith.constant 0 : index
    %3 = vector.load %arg3[%c0, %c0_1, %c0_2] : memref<1x5x64xbf16, #tpu.memory_space<vmem>>, vector<1x5x64xbf16>
    %4 = vector.shape_cast %3 : vector<1x5x64xbf16> to vector<5x64xbf16>
    %c0_3 = arith.constant 0 : index
    %c0_4 = arith.constant 0 : index
    %c0_5 = arith.constant 0 : index
    %5 = vector.load %arg4[%c0_3, %c0_4, %c0_5] : memref<1x5x64xbf16, #tpu.memory_space<vmem>>, vector<1x5x64xbf16>
    %6 = vector.shape_cast %5 : vector<1x5x64xbf16> to vector<5x64xbf16>
    %c0_6 = arith.constant 0 : index
    %c0_7 = arith.constant 0 : index
    %c0_8 = arith.constant 0 : index
    %7 = vector.load %arg5[%c0_6, %c0_7, %c0_8] : memref<1x5x64xbf16, #tpu.memory_space<vmem>>, vector<1x5x64xbf16>
    %8 = vector.shape_cast %7 : vector<1x5x64xbf16> to vector<5x64xbf16>
    %cst = arith.constant dense<0.000000e+00> : vector<5x5xf32>
    %9 = tpu.matmul %4, %6, %cst {dimension_numbers = #tpu.dot_dimension_numbers<[1], [1], [0], [0], [0, 0, 1, 0], [], []>} : vector<5x64xbf16>, vector<5x64xbf16>, vector<5x5xf32> -> vector<5x5xf32>
    %c0_9 = arith.constant 0 : index
    %c0_10 = arith.constant 0 : index
    %10 = vector.load %arg7[%c0_9, %c0_10] : memref<5x1xf32, #tpu.memory_space<vmem>>, vector<5x1xf32>
    %cst_11 = arith.constant dense<0xFF800000> : vector<5xf32>
    %11 = vector.multi_reduction <maximumf>, %9, %cst_11 [1] : vector<5x5xf32> to vector<5xf32>
    %12 = vector.shape_cast %11 : vector<5xf32> to vector<5x1xf32>
    %13 = arith.maximumf %10, %12 : vector<5x1xf32>
    %14 = arith.subf %10, %13 : vector<5x1xf32>
    %15 = math.exp %14 : vector<5x1xf32>
    %16 = vector.broadcast %13 : vector<5x1xf32> to vector<5x5xf32>
    %17 = arith.subf %9, %16 : vector<5x5xf32>
    %18 = math.exp %17 : vector<5x5xf32>
    %c0_12 = arith.constant 0 : index
    %c0_13 = arith.constant 0 : index
    %19 = vector.load %arg8[%c0_12, %c0_13] : memref<5x1xf32, #tpu.memory_space<vmem>>, vector<5x1xf32>
    %20 = arith.mulf %15, %19 : vector<5x1xf32>
    %cst_14 = arith.constant dense<0.000000e+00> : vector<5xf32>
    %21 = vector.multi_reduction <add>, %18, %cst_14 [1] : vector<5x5xf32> to vector<5xf32>
    %22 = vector.shape_cast %21 : vector<5xf32> to vector<5x1xf32>
    %23 = arith.addf %20, %22 : vector<5x1xf32>
    %c0_15 = arith.constant 0 : index
    %c0_16 = arith.constant 0 : index
    %24 = vector.load %arg8[%c0_15, %c0_16] : memref<5x1xf32, #tpu.memory_space<vmem>>, vector<5x1xf32>
    tpu.vector_store %arg8[%c0_15, %c0_16], %23 {strides = array<i32>} : memref<5x1xf32, #tpu.memory_space<vmem>>, vector<5x1xf32>,
    %c0_17 = arith.constant 0 : index
    %c0_18 = arith.constant 0 : index
    %25 = vector.load %arg9[%c0_17, %c0_18] : memref<5x64xf32, #tpu.memory_space<vmem>>, vector<5x64xf32>
    %26 = vector.broadcast %15 : vector<5x1xf32> to vector<5x64xf32>
    %27 = arith.mulf %26, %25 : vector<5x64xf32>
    %28 = arith.truncf %18 : vector<5x5xf32> to vector<5x5xbf16>
    %cst_19 = arith.constant dense<0.000000e+00> : vector<5x64xf32>
    %29 = tpu.matmul %28, %8, %cst_19 {dimension_numbers = #tpu.dot_dimension_numbers<[1], [0], [0], [1], [0, 0, 1, 1], [], []>} : vector<5x5xbf16>, vector<5x64xbf16>, vector<5x64xf32> -> vector<5x64xf32>
    %30 = arith.addf %27, %29 : vector<5x64xf32>
    %c0_20 = arith.constant 0 : index
    %c0_21 = arith.constant 0 : index
    %31 = vector.load %arg9[%c0_20, %c0_21] : memref<5x64xf32, #tpu.memory_space<vmem>>, vector<5x64xf32>
    tpu.vector_store %arg9[%c0_20, %c0_21], %30 {strides = array<i32>} : memref<5x64xf32, #tpu.memory_space<vmem>>, vector<5x64xf32>,
    %c0_22 = arith.constant 0 : index
    %c0_23 = arith.constant 0 : index
    %32 = vector.load %arg7[%c0_22, %c0_23] : memref<5x1xf32, #tpu.memory_space<vmem>>, vector<5x1xf32>
    tpu.vector_store %arg7[%c0_22, %c0_23], %13 {strides = array<i32>} : memref<5x1xf32, #tpu.memory_space<vmem>>, vector<5x1xf32>,
    %c0_i32_24 = arith.constant 0 : i32
    %33 = arith.cmpi eq, %arg2, %c0_i32_24 : i32
    %34 = arith.extui %33 : i1 to i32
    %c0_i32_25 = arith.constant 0 : i32
    %35 = arith.cmpi ne, %34, %c0_i32_25 : i32
    scf.if %35 {
      %c0_26 = arith.constant 0 : index
      %c0_27 = arith.constant 0 : index
      %36 = vector.load %arg9[%c0_26, %c0_27] : memref<5x64xf32, #tpu.memory_space<vmem>>, vector<5x64xf32>
      %c0_28 = arith.constant 0 : index
      %c0_29 = arith.constant 0 : index
      %37 = vector.load %arg8[%c0_28, %c0_29] : memref<5x1xf32, #tpu.memory_space<vmem>>, vector<5x1xf32>
      %38 = vector.broadcast %37 : vector<5x1xf32> to vector<5x64xf32>
      %39 = arith.divf %36, %38 : vector<5x64xf32>
      %40 = arith.truncf %39 : vector<5x64xf32> to vector<5x64xbf16>
      %c0_30 = arith.constant 0 : index
      %c0_31 = arith.constant 0 : index
      %c0_32 = arith.constant 0 : index
      %41 = vector.load %arg6[%c0_30, %c0_31, %c0_32] : memref<1x5x64xbf16, #tpu.memory_space<vmem>>, vector<1x5x64xbf16>
      %42 = vector.shape_cast %41 : vector<1x5x64xbf16> to vector<5x64xbf16>
      %43 = vector.shape_cast %40 : vector<5x64xbf16> to vector<1x5x64xbf16>
      tpu.vector_store %arg6[%c0_30, %c0_31, %c0_32], %43 {strides = array<i32>} : memref<1x5x64xbf16, #tpu.memory_space<vmem>>, vector<1x5x64xbf16>,
    } else {
    }
    return
  }
  func.func @transform_0(%arg0: i32, %arg1: i32, %arg2: i32) -> (i32, i32, i32) {
    %c0_i32 = arith.constant 0 : i32
    %c0_i32_0 = arith.constant 0 : i32
    return %arg0, %arg1, %c0_i32 : i32, i32, i32
  }
  func.func @transform_1(%arg0: i32, %arg1: i32, %arg2: i32) -> (i32, i32, i32) {
    %c0_i32 = arith.constant 0 : i32
    %c0_i32_0 = arith.constant 0 : i32
    return %arg0, %arg2, %c0_i32 : i32, i32, i32
  }
  func.func @transform_2(%arg0: i32, %arg1: i32, %arg2: i32) -> (i32, i32, i32) {
    %c0_i32 = arith.constant 0 : i32
    %c0_i32_0 = arith.constant 0 : i32
    return %arg0, %arg2, %c0_i32 : i32, i32, i32
  }
  func.func @transform_3(%arg0: i32, %arg1: i32, %arg2: i32) -> (i32, i32, i32) {
    %c0_i32 = arith.constant 0 : i32
    %c0_i32_0 = arith.constant 0 : i32
    return %arg0, %arg1, %c0_i32 : i32, i32, i32
  }
}

module attributes {stable_mosaic.version = 11 : i64} {
  func.func @_linear_kernel(%arg0: i32, %arg1: i32, %arg2: i32, %arg3: memref<10x64xf32, #tpu.memory_space<vmem>>, %arg4: memref<64x256xbf16, #tpu.memory_space<vmem>>, %arg5: memref<1x64xf32, #tpu.memory_space<vmem>>, %arg6: memref<1x64xf32, #tpu.memory_space<vmem>>, %arg7: memref<1x256xf32, #tpu.memory_space<vmem>>, %arg8: memref<10x256xbf16, #tpu.memory_space<vmem>>) attributes {dimension_semantics = [#tpu.dimension_semantics<parallel>, #tpu.dimension_semantics<parallel>, #tpu.dimension_semantics<arbitrary>], iteration_bounds = array<i64: 1, 1, 1>, scalar_prefetch = 0 : i64, scratch_operands = 0 : i64, tpu.core_type = #tpu.core_type<tc>, window_params = [{transform_indices = @transform_0, window_bounds = array<i64: 10, 64>}, {transform_indices = @transform_1, window_bounds = array<i64: 64, 256>}, {pipeline_mode = #tpu.pipeline_mode<synchronous>, transform_indices = @transform_2, window_bounds = array<i64: 1, 64>}, {pipeline_mode = #tpu.pipeline_mode<synchronous>, transform_indices = @transform_3, window_bounds = array<i64: 1, 64>}, {transform_indices = @transform_4, window_bounds = array<i64: 1, 256>}, {transform_indices = @transform_5, window_bounds = array<i64: 10, 256>}]} {
    %c0 = arith.constant 0 : index
    %c0_0 = arith.constant 0 : index
    %0 = vector.load %arg3[%c0, %c0_0] : memref<10x64xf32, #tpu.memory_space<vmem>>, vector<10x64xf32>
    %cst = arith.constant dense<0.000000e+00> : vector<10xf32>
    %1 = vector.multi_reduction <add>, %0, %cst [1] : vector<10x64xf32> to vector<10xf32>
    %2 = vector.shape_cast %1 : vector<10xf32> to vector<10x1xf32>
    %cst_1 = arith.constant 6.400000e+01 : f32
    %3 = vector.broadcast %cst_1 : f32 to vector<10x1xf32>
    %4 = arith.divf %2, %3 : vector<10x1xf32>
    %5 = vector.broadcast %4 : vector<10x1xf32> to vector<10x64xf32>
    %6 = arith.subf %0, %5 : vector<10x64xf32>
    %7 = arith.mulf %6, %6 : vector<10x64xf32>
    %cst_2 = arith.constant dense<0.000000e+00> : vector<10xf32>
    %8 = vector.multi_reduction <add>, %7, %cst_2 [1] : vector<10x64xf32> to vector<10xf32>
    %9 = vector.shape_cast %8 : vector<10xf32> to vector<10x1xf32>
    %cst_3 = arith.constant 6.400000e+01 : f32
    %10 = vector.broadcast %cst_3 : f32 to vector<10x1xf32>
    %11 = arith.divf %9, %10 : vector<10x1xf32>
    %12 = vector.broadcast %4 : vector<10x1xf32> to vector<10x64xf32>
    %13 = arith.subf %0, %12 : vector<10x64xf32>
    %cst_4 = arith.constant 9.99999974E-6 : f32
    %14 = vector.broadcast %cst_4 : f32 to vector<10x1xf32>
    %15 = arith.addf %11, %14 : vector<10x1xf32>
    %16 = math.rsqrt %15 : vector<10x1xf32>
    %17 = vector.broadcast %16 : vector<10x1xf32> to vector<10x64xf32>
    %18 = arith.mulf %13, %17 : vector<10x64xf32>
    %c0_5 = arith.constant 0 : index
    %c0_6 = arith.constant 0 : index
    %19 = vector.load %arg5[%c0_5, %c0_6] : memref<1x64xf32, #tpu.memory_space<vmem>>, vector<1x64xf32>
    %20 = vector.broadcast %19 : vector<1x64xf32> to vector<10x64xf32>
    %21 = arith.mulf %18, %20 : vector<10x64xf32>
    %c0_7 = arith.constant 0 : index
    %c0_8 = arith.constant 0 : index
    %22 = vector.load %arg6[%c0_7, %c0_8] : memref<1x64xf32, #tpu.memory_space<vmem>>, vector<1x64xf32>
    %23 = vector.broadcast %22 : vector<1x64xf32> to vector<10x64xf32>
    %24 = arith.addf %21, %23 : vector<10x64xf32>
    %25 = arith.truncf %24 : vector<10x64xf32> to vector<10x64xbf16>
    %c0_9 = arith.constant 0 : index
    %c0_10 = arith.constant 0 : index
    %26 = vector.load %arg4[%c0_9, %c0_10] : memref<64x256xbf16, #tpu.memory_space<vmem>>, vector<64x256xbf16>
    %cst_11 = arith.constant dense<0.000000e+00> : vector<10x256xf32>
    %27 = tpu.matmul %25, %26, %cst_11 {dimension_numbers = #tpu.dot_dimension_numbers<[1], [0], [0], [1], [0, 0, 1, 1], [], []>} : vector<10x64xbf16>, vector<64x256xbf16>, vector<10x256xf32> -> vector<10x256xf32>
    %c0_12 = arith.constant 0 : index
    %c0_13 = arith.constant 0 : index
    %28 = vector.load %arg7[%c0_12, %c0_13] : memref<1x256xf32, #tpu.memory_space<vmem>>, vector<1x256xf32>
    %29 = vector.broadcast %28 : vector<1x256xf32> to vector<10x256xf32>
    %30 = arith.addf %27, %29 : vector<10x256xf32>
    %cst_14 = arith.constant -1.702000e+00 : f32
    %31 = vector.broadcast %cst_14 : f32 to vector<10x256xf32>
    %32 = arith.mulf %31, %30 : vector<10x256xf32>
    %33 = math.exp %32 : vector<10x256xf32>
    %cst_15 = arith.constant 1.000000e+00 : f32
    %34 = vector.broadcast %cst_15 : f32 to vector<10x256xf32>
    %35 = arith.addf %34, %33 : vector<10x256xf32>
    %36 = tpu.reciprocal %35 {approx = true} : vector<10x256xf32> -> vector<10x256xf32>
    %37 = arith.mulf %30, %36 : vector<10x256xf32>
    %38 = arith.truncf %37 : vector<10x256xf32> to vector<10x256xbf16>
    %c0_16 = arith.constant 0 : index
    %c0_17 = arith.constant 0 : index
    %39 = vector.load %arg8[%c0_16, %c0_17] : memref<10x256xbf16, #tpu.memory_space<vmem>>, vector<10x256xbf16>
    tpu.vector_store %arg8[%c0_16, %c0_17], %38 {strides = array<i32>} : memref<10x256xbf16, #tpu.memory_space<vmem>>, vector<10x256xbf16>,
    return
  }
  func.func @transform_0(%arg0: i32, %arg1: i32, %arg2: i32) -> (i32, i32) {
    %c0_i32 = arith.constant 0 : i32
    return %arg0, %arg2 : i32, i32
  }
  func.func @transform_1(%arg0: i32, %arg1: i32, %arg2: i32) -> (i32, i32) {
    %c0_i32 = arith.constant 0 : i32
    return %arg2, %arg1 : i32, i32
  }
  func.func @transform_2(%arg0: i32, %arg1: i32, %arg2: i32) -> (i32, i32) {
    %c0_i32 = arith.constant 0 : i32
    %c0_i32_0 = arith.constant 0 : i32
    %c0_i32_1 = arith.constant 0 : i32
    return %c0_i32, %c0_i32_0 : i32, i32
  }
  func.func @transform_3(%arg0: i32, %arg1: i32, %arg2: i32) -> (i32, i32) {
    %c0_i32 = arith.constant 0 : i32
    %c0_i32_0 = arith.constant 0 : i32
    %c0_i32_1 = arith.constant 0 : i32
    return %c0_i32, %c0_i32_0 : i32, i32
  }
  func.func @transform_4(%arg0: i32, %arg1: i32, %arg2: i32) -> (i32, i32) {
    %c0_i32 = arith.constant 0 : i32
    %c0_i32_0 = arith.constant 0 : i32
    return %c0_i32, %arg1 : i32, i32
  }
  func.func @transform_5(%arg0: i32, %arg1: i32, %arg2: i32) -> (i32, i32) {
    %c0_i32 = arith.constant 0 : i32
    return %arg0, %arg1 : i32, i32
  }
}

module attributes {stable_mosaic.version = 11 : i64} {
  func.func @_linear_kernel(%arg0: i32, %arg1: i32, %arg2: i32, %arg3: memref<10x64xbf16, #tpu.memory_space<vmem>>, %arg4: memref<64x64xbf16, #tpu.memory_space<vmem>>, %arg5: memref<1x64xf32, #tpu.memory_space<vmem>>, %arg6: memref<10x64xf32, #tpu.memory_space<vmem>>, %arg7: memref<10x64xf32, #tpu.memory_space<vmem>>) attributes {dimension_semantics = [#tpu.dimension_semantics<parallel>, #tpu.dimension_semantics<parallel>, #tpu.dimension_semantics<arbitrary>], iteration_bounds = array<i64: 1, 1, 1>, scalar_prefetch = 0 : i64, scratch_operands = 0 : i64, tpu.core_type = #tpu.core_type<tc>, window_params = [{transform_indices = @transform_0, window_bounds = array<i64: 10, 64>}, {transform_indices = @transform_1, window_bounds = array<i64: 64, 64>}, {transform_indices = @transform_2, window_bounds = array<i64: 1, 64>}, {transform_indices = @transform_3, window_bounds = array<i64: 10, 64>}, {transform_indices = @transform_4, window_bounds = array<i64: 10, 64>}]} {
    %c0 = arith.constant 0 : index
    %c0_0 = arith.constant 0 : index
    %0 = vector.load %arg3[%c0, %c0_0] : memref<10x64xbf16, #tpu.memory_space<vmem>>, vector<10x64xbf16>
    %c0_1 = arith.constant 0 : index
    %c0_2 = arith.constant 0 : index
    %1 = vector.load %arg4[%c0_1, %c0_2] : memref<64x64xbf16, #tpu.memory_space<vmem>>, vector<64x64xbf16>
    %cst = arith.constant dense<0.000000e+00> : vector<10x64xf32>
    %2 = tpu.matmul %0, %1, %cst {dimension_numbers = #tpu.dot_dimension_numbers<[1], [0], [0], [1], [0, 0, 1, 1], [], []>} : vector<10x64xbf16>, vector<64x64xbf16>, vector<10x64xf32> -> vector<10x64xf32>
    %c0_3 = arith.constant 0 : index
    %c0_4 = arith.constant 0 : index
    %3 = vector.load %arg5[%c0_3, %c0_4] : memref<1x64xf32, #tpu.memory_space<vmem>>, vector<1x64xf32>
    %4 = vector.broadcast %3 : vector<1x64xf32> to vector<10x64xf32>
    %5 = arith.addf %2, %4 : vector<10x64xf32>
    %c0_5 = arith.constant 0 : index
    %c0_6 = arith.constant 0 : index
    %6 = vector.load %arg6[%c0_5, %c0_6] : memref<10x64xf32, #tpu.memory_space<vmem>>, vector<10x64xf32>
    %7 = arith.addf %5, %6 : vector<10x64xf32>
    %c0_7 = arith.constant 0 : index
    %c0_8 = arith.constant 0 : index
    %8 = vector.load %arg7[%c0_7, %c0_8] : memref<10x64xf32, #tpu.memory_space<vmem>>, vector<10x64xf32>
    tpu.vector_store %arg7[%c0_7, %c0_8], %7 {strides = array<i32>} : memref<10x64xf32, #tpu.memory_space<vmem>>, vector<10x64xf32>,
    return
  }
  func.func @transform_0(%arg0: i32, %arg1: i32, %arg2: i32) -> (i32, i32) {
    %c0_i32 = arith.constant 0 : i32
    return %arg0, %arg2 : i32, i32
  }
  func.func @transform_1(%arg0: i32, %arg1: i32, %arg2: i32) -> (i32, i32) {
    %c0_i32 = arith.constant 0 : i32
    return %arg2, %arg1 : i32, i32
  }
  func.func @transform_2(%arg0: i32, %arg1: i32, %arg2: i32) -> (i32, i32) {
    %c0_i32 = arith.constant 0 : i32
    %c0_i32_0 = arith.constant 0 : i32
    return %c0_i32, %arg1 : i32, i32
  }
  func.func @transform_3(%arg0: i32, %arg1: i32, %arg2: i32) -> (i32, i32) {
    %c0_i32 = arith.constant 0 : i32
    return %arg0, %arg1 : i32, i32
  }
  func.func @transform_4(%arg0: i32, %arg1: i32, %arg2: i32) -> (i32, i32) {
    %c0_i32 = arith.constant 0 : i32
    return %arg0, %arg1 : i32, i32
  }
}

module attributes {stable_mosaic.version = 11 : i64} {
  func.func @_linear_kernel(%arg0: i32, %arg1: i32, %arg2: i32, %arg3: memref<10x256xbf16, #tpu.memory_space<vmem>>, %arg4: memref<256x64xbf16, #tpu.memory_space<vmem>>, %arg5: memref<1x64xf32, #tpu.memory_space<vmem>>, %arg6: memref<10x64xf32, #tpu.memory_space<vmem>>, %arg7: memref<10x64xf32, #tpu.memory_space<vmem>>) attributes {dimension_semantics = [#tpu.dimension_semantics<parallel>, #tpu.dimension_semantics<parallel>, #tpu.dimension_semantics<arbitrary>], iteration_bounds = array<i64: 1, 1, 1>, scalar_prefetch = 0 : i64, scratch_operands = 0 : i64, tpu.core_type = #tpu.core_type<tc>, window_params = [{transform_indices = @transform_0, window_bounds = array<i64: 10, 256>}, {transform_indices = @transform_1, window_bounds = array<i64: 256, 64>}, {transform_indices = @transform_2, window_bounds = array<i64: 1, 64>}, {transform_indices = @transform_3, window_bounds = array<i64: 10, 64>}, {transform_indices = @transform_4, window_bounds = array<i64: 10, 64>}]} {
    %c0 = arith.constant 0 : index
    %c0_0 = arith.constant 0 : index
    %0 = vector.load %arg3[%c0, %c0_0] : memref<10x256xbf16, #tpu.memory_space<vmem>>, vector<10x256xbf16>
    %c0_1 = arith.constant 0 : index
    %c0_2 = arith.constant 0 : index
    %1 = vector.load %arg4[%c0_1, %c0_2] : memref<256x64xbf16, #tpu.memory_space<vmem>>, vector<256x64xbf16>
    %cst = arith.constant dense<0.000000e+00> : vector<10x64xf32>
    %2 = tpu.matmul %0, %1, %cst {dimension_numbers = #tpu.dot_dimension_numbers<[1], [0], [0], [1], [0, 0, 1, 1], [], []>} : vector<10x256xbf16>, vector<256x64xbf16>, vector<10x64xf32> -> vector<10x64xf32>
    %c0_3 = arith.constant 0 : index
    %c0_4 = arith.constant 0 : index
    %3 = vector.load %arg5[%c0_3, %c0_4] : memref<1x64xf32, #tpu.memory_space<vmem>>, vector<1x64xf32>
    %4 = vector.broadcast %3 : vector<1x64xf32> to vector<10x64xf32>
    %5 = arith.addf %2, %4 : vector<10x64xf32>
    %c0_5 = arith.constant 0 : index
    %c0_6 = arith.constant 0 : index
    %6 = vector.load %arg6[%c0_5, %c0_6] : memref<10x64xf32, #tpu.memory_space<vmem>>, vector<10x64xf32>
    %7 = arith.addf %5, %6 : vector<10x64xf32>
    %c0_7 = arith.constant 0 : index
    %c0_8 = arith.constant 0 : index
    %8 = vector.load %arg7[%c0_7, %c0_8] : memref<10x64xf32, #tpu.memory_space<vmem>>, vector<10x64xf32>
    tpu.vector_store %arg7[%c0_7, %c0_8], %7 {strides = array<i32>} : memref<10x64xf32, #tpu.memory_space<vmem>>, vector<10x64xf32>,
    return
  }
  func.func @transform_0(%arg0: i32, %arg1: i32, %arg2: i32) -> (i32, i32) {
    %c0_i32 = arith.constant 0 : i32
    return %arg0, %arg2 : i32, i32
  }
  func.func @transform_1(%arg0: i32, %arg1: i32, %arg2: i32) -> (i32, i32) {
    %c0_i32 = arith.constant 0 : i32
    return %arg2, %arg1 : i32, i32
  }
  func.func @transform_2(%arg0: i32, %arg1: i32, %arg2: i32) -> (i32, i32) {
    %c0_i32 = arith.constant 0 : i32
    %c0_i32_0 = arith.constant 0 : i32
    return %c0_i32, %arg1 : i32, i32
  }
  func.func @transform_3(%arg0: i32, %arg1: i32, %arg2: i32) -> (i32, i32) {
    %c0_i32 = arith.constant 0 : i32
    return %arg0, %arg1 : i32, i32
  }
  func.func @transform_4(%arg0: i32, %arg1: i32, %arg2: i32) -> (i32, i32) {
    %c0_i32 = arith.constant 0 : i32
    return %arg0, %arg1 : i32, i32
  }
}

module attributes {stable_mosaic.version = 11 : i64} {
  func.func @_linear_kernel(%arg0: i32, %arg1: i32, %arg2: i32, %arg3: memref<2x64xf32, #tpu.memory_space<vmem>>, %arg4: memref<64x32xbf16, #tpu.memory_space<vmem>>, %arg5: memref<1x64xf32, #tpu.memory_space<vmem>>, %arg6: memref<1x64xf32, #tpu.memory_space<vmem>>, %arg7: memref<2x32xf32, #tpu.memory_space<vmem>>) attributes {dimension_semantics = [#tpu.dimension_semantics<parallel>, #tpu.dimension_semantics<parallel>, #tpu.dimension_semantics<arbitrary>], iteration_bounds = array<i64: 1, 1, 1>, scalar_prefetch = 0 : i64, scratch_operands = 0 : i64, tpu.core_type = #tpu.core_type<tc>, window_params = [{transform_indices = @transform_0, window_bounds = array<i64: 2, 64>}, {transform_indices = @transform_1, window_bounds = array<i64: 64, 32>}, {pipeline_mode = #tpu.pipeline_mode<synchronous>, transform_indices = @transform_2, window_bounds = array<i64: 1, 64>}, {pipeline_mode = #tpu.pipeline_mode<synchronous>, transform_indices = @transform_3, window_bounds = array<i64: 1, 64>}, {transform_indices = @transform_4, window_bounds = array<i64: 2, 32>}]} {
    %c0 = arith.constant 0 : index
    %c0_0 = arith.constant 0 : index
    %0 = vector.load %arg3[%c0, %c0_0] : memref<2x64xf32, #tpu.memory_space<vmem>>, vector<2x64xf32>
    %cst = arith.constant dense<0.000000e+00> : vector<2xf32>
    %1 = vector.multi_reduction <add>, %0, %cst [1] : vector<2x64xf32> to vector<2xf32>
    %2 = vector.shape_cast %1 : vector<2xf32> to vector<2x1xf32>
    %cst_1 = arith.constant 6.400000e+01 : f32
    %3 = vector.broadcast %cst_1 : f32 to vector<2x1xf32>
    %4 = arith.divf %2, %3 : vector<2x1xf32>
    %5 = vector.broadcast %4 : vector<2x1xf32> to vector<2x64xf32>
    %6 = arith.subf %0, %5 : vector<2x64xf32>
    %7 = arith.mulf %6, %6 : vector<2x64xf32>
    %cst_2 = arith.constant dense<0.000000e+00> : vector<2xf32>
    %8 = vector.multi_reduction <add>, %7, %cst_2 [1] : vector<2x64xf32> to vector<2xf32>
    %9 = vector.shape_cast %8 : vector<2xf32> to vector<2x1xf32>
    %cst_3 = arith.constant 6.400000e+01 : f32
    %10 = vector.broadcast %cst_3 : f32 to vector<2x1xf32>
    %11 = arith.divf %9, %10 : vector<2x1xf32>
    %12 = vector.broadcast %4 : vector<2x1xf32> to vector<2x64xf32>
    %13 = arith.subf %0, %12 : vector<2x64xf32>
    %cst_4 = arith.constant 9.99999974E-6 : f32
    %14 = vector.broadcast %cst_4 : f32 to vector<2x1xf32>
    %15 = arith.addf %11, %14 : vector<2x1xf32>
    %16 = math.rsqrt %15 : vector<2x1xf32>
    %17 = vector.broadcast %16 : vector<2x1xf32> to vector<2x64xf32>
    %18 = arith.mulf %13, %17 : vector<2x64xf32>
    %c0_5 = arith.constant 0 : index
    %c0_6 = arith.constant 0 : index
    %19 = vector.load %arg5[%c0_5, %c0_6] : memref<1x64xf32, #tpu.memory_space<vmem>>, vector<1x64xf32>
    %20 = vector.broadcast %19 : vector<1x64xf32> to vector<2x64xf32>
    %21 = arith.mulf %18, %20 : vector<2x64xf32>
    %c0_7 = arith.constant 0 : index
    %c0_8 = arith.constant 0 : index
    %22 = vector.load %arg6[%c0_7, %c0_8] : memref<1x64xf32, #tpu.memory_space<vmem>>, vector<1x64xf32>
    %23 = vector.broadcast %22 : vector<1x64xf32> to vector<2x64xf32>
    %24 = arith.addf %21, %23 : vector<2x64xf32>
    %25 = arith.truncf %24 : vector<2x64xf32> to vector<2x64xbf16>
    %c0_9 = arith.constant 0 : index
    %c0_10 = arith.constant 0 : index
    %26 = vector.load %arg4[%c0_9, %c0_10] : memref<64x32xbf16, #tpu.memory_space<vmem>>, vector<64x32xbf16>
    %cst_11 = arith.constant dense<0.000000e+00> : vector<2x32xf32>
    %27 = tpu.matmul %25, %26, %cst_11 {dimension_numbers = #tpu.dot_dimension_numbers<[1], [0], [0], [1], [0, 0, 1, 1], [], []>} : vector<2x64xbf16>, vector<64x32xbf16>, vector<2x32xf32> -> vector<2x32xf32>
    %c0_12 = arith.constant 0 : index
    %c0_13 = arith.constant 0 : index
    %28 = vector.load %arg7[%c0_12, %c0_13] : memref<2x32xf32, #tpu.memory_space<vmem>>, vector<2x32xf32>
    tpu.vector_store %arg7[%c0_12, %c0_13], %27 {strides = array<i32>} : memref<2x32xf32, #tpu.memory_space<vmem>>, vector<2x32xf32>,
    return
  }
  func.func @transform_0(%arg0: i32, %arg1: i32, %arg2: i32) -> (i32, i32) {
    %c0_i32 = arith.constant 0 : i32
    return %arg0, %arg2 : i32, i32
  }
  func.func @transform_1(%arg0: i32, %arg1: i32, %arg2: i32) -> (i32, i32) {
    %c0_i32 = arith.constant 0 : i32
    return %arg2, %arg1 : i32, i32
  }
  func.func @transform_2(%arg0: i32, %arg1: i32, %arg2: i32) -> (i32, i32) {
    %c0_i32 = arith.constant 0 : i32
    %c0_i32_0 = arith.constant 0 : i32
    %c0_i32_1 = arith.constant 0 : i32
    return %c0_i32, %c0_i32_0 : i32, i32
  }
  func.func @transform_3(%arg0: i32, %arg1: i32, %arg2: i32) -> (i32, i32) {
    %c0_i32 = arith.constant 0 : i32
    %c0_i32_0 = arith.constant 0 : i32
    %c0_i32_1 = arith.constant 0 : i32
    return %c0_i32, %c0_i32_0 : i32, i32
  }
  func.func @transform_4(%arg0: i32, %arg1: i32, %arg2: i32) -> (i32, i32) {
    %c0_i32 = arith.constant 0 : i32
    return %arg0, %arg1 : i32, i32
  }
}

module attributes {stable_mosaic.version = 11 : i64} {
  func.func @_linear_kernel(%arg0: i32, %arg1: i32, %arg2: i32, %arg3: memref<16x32xf32, #tpu.memory_space<vmem>>, %arg4: memref<32x96xbf16, #tpu.memory_space<vmem>>, %arg5: memref<1x32xf32, #tpu.memory_space<vmem>>, %arg6: memref<1x32xf32, #tpu.memory_space<vmem>>, %arg7: memref<1x96xf32, #tpu.memory_space<vmem>>, %arg8: memref<16x96xbf16, #tpu.memory_space<vmem>>) attributes {dimension_semantics = [#tpu.dimension_semantics<parallel>, #tpu.dimension_semantics<parallel>, #tpu.dimension_semantics<arbitrary>], iteration_bounds = array<i64: 1, 1, 1>, scalar_prefetch = 0 : i64, scratch_operands = 0 : i64, tpu.core_type = #tpu.core_type<tc>, window_params = [{transform_indices = @transform_0, window_bounds = array<i64: 16, 32>}, {transform_indices = @transform_1, window_bounds = array<i64: 32, 96>}, {pipeline_mode = #tpu.pipeline_mode<synchronous>, transform_indices = @transform_2, window_bounds = array<i64: 1, 32>}, {pipeline_mode = #tpu.pipeline_mode<synchronous>, transform_indices = @transform_3, window_bounds = array<i64: 1, 32>}, {transform_indices = @transform_4, window_bounds = array<i64: 1, 96>}, {transform_indices = @transform_5, window_bounds = array<i64: 16, 96>}]} {
    %c0 = arith.constant 0 : index
    %c0_0 = arith.constant 0 : index
    %0 = vector.load %arg3[%c0, %c0_0] : memref<16x32xf32, #tpu.memory_space<vmem>>, vector<16x32xf32>
    %cst = arith.constant dense<0.000000e+00> : vector<16xf32>
    %1 = vector.multi_reduction <add>, %0, %cst [1] : vector<16x32xf32> to vector<16xf32>
    %2 = vector.shape_cast %1 : vector<16xf32> to vector<16x1xf32>
    %cst_1 = arith.constant 3.200000e+01 : f32
    %3 = vector.broadcast %cst_1 : f32 to vector<16x1xf32>
    %4 = arith.divf %2, %3 : vector<16x1xf32>
    %5 = vector.broadcast %4 : vector<16x1xf32> to vector<16x32xf32>
    %6 = arith.subf %0, %5 : vector<16x32xf32>
    %7 = arith.mulf %6, %6 : vector<16x32xf32>
    %cst_2 = arith.constant dense<0.000000e+00> : vector<16xf32>
    %8 = vector.multi_reduction <add>, %7, %cst_2 [1] : vector<16x32xf32> to vector<16xf32>
    %9 = vector.shape_cast %8 : vector<16xf32> to vector<16x1xf32>
    %cst_3 = arith.constant 3.200000e+01 : f32
    %10 = vector.broadcast %cst_3 : f32 to vector<16x1xf32>
    %11 = arith.divf %9, %10 : vector<16x1xf32>
    %12 = vector.broadcast %4 : vector<16x1xf32> to vector<16x32xf32>
    %13 = arith.subf %0, %12 : vector<16x32xf32>
    %cst_4 = arith.constant 9.99999974E-6 : f32
    %14 = vector.broadcast %cst_4 : f32 to vector<16x1xf32>
    %15 = arith.addf %11, %14 : vector<16x1xf32>
    %16 = math.rsqrt %15 : vector<16x1xf32>
    %17 = vector.broadcast %16 : vector<16x1xf32> to vector<16x32xf32>
    %18 = arith.mulf %13, %17 : vector<16x32xf32>
    %c0_5 = arith.constant 0 : index
    %c0_6 = arith.constant 0 : index
    %19 = vector.load %arg5[%c0_5, %c0_6] : memref<1x32xf32, #tpu.memory_space<vmem>>, vector<1x32xf32>
    %20 = vector.broadcast %19 : vector<1x32xf32> to vector<16x32xf32>
    %21 = arith.mulf %18, %20 : vector<16x32xf32>
    %c0_7 = arith.constant 0 : index
    %c0_8 = arith.constant 0 : index
    %22 = vector.load %arg6[%c0_7, %c0_8] : memref<1x32xf32, #tpu.memory_space<vmem>>, vector<1x32xf32>
    %23 = vector.broadcast %22 : vector<1x32xf32> to vector<16x32xf32>
    %24 = arith.addf %21, %23 : vector<16x32xf32>
    %25 = arith.truncf %24 : vector<16x32xf32> to vector<16x32xbf16>
    %c0_9 = arith.constant 0 : index
    %c0_10 = arith.constant 0 : index
    %26 = vector.load %arg4[%c0_9, %c0_10] : memref<32x96xbf16, #tpu.memory_space<vmem>>, vector<32x96xbf16>
    %cst_11 = arith.constant dense<0.000000e+00> : vector<16x96xf32>
    %27 = tpu.matmul %25, %26, %cst_11 {dimension_numbers = #tpu.dot_dimension_numbers<[1], [0], [0], [1], [0, 0, 1, 1], [], []>} : vector<16x32xbf16>, vector<32x96xbf16>, vector<16x96xf32> -> vector<16x96xf32>
    %c0_12 = arith.constant 0 : index
    %c0_13 = arith.constant 0 : index
    %28 = vector.load %arg7[%c0_12, %c0_13] : memref<1x96xf32, #tpu.memory_space<vmem>>, vector<1x96xf32>
    %29 = vector.broadcast %28 : vector<1x96xf32> to vector<16x96xf32>
    %30 = arith.addf %27, %29 : vector<16x96xf32>
    %31 = arith.truncf %30 : vector<16x96xf32> to vector<16x96xbf16>
    %c0_14 = arith.constant 0 : index
    %c0_15 = arith.constant 0 : index
    %32 = vector.load %arg8[%c0_14, %c0_15] : memref<16x96xbf16, #tpu.memory_space<vmem>>, vector<16x96xbf16>
    tpu.vector_store %arg8[%c0_14, %c0_15], %31 {strides = array<i32>} : memref<16x96xbf16, #tpu.memory_space<vmem>>, vector<16x96xbf16>,
    return
  }
  func.func @transform_0(%arg0: i32, %arg1: i32, %arg2: i32) -> (i32, i32) {
    %c0_i32 = arith.constant 0 : i32
    return %arg0, %arg2 : i32, i32
  }
  func.func @transform_1(%arg0: i32, %arg1: i32, %arg2: i32) -> (i32, i32) {
    %c0_i32 = arith.constant 0 : i32
    return %arg2, %arg1 : i32, i32
  }
  func.func @transform_2(%arg0: i32, %arg1: i32, %arg2: i32) -> (i32, i32) {
    %c0_i32 = arith.constant 0 : i32
    %c0_i32_0 = arith.constant 0 : i32
    %c0_i32_1 = arith.constant 0 : i32
    return %c0_i32, %c0_i32_0 : i32, i32
  }
  func.func @transform_3(%arg0: i32, %arg1: i32, %arg2: i32) -> (i32, i32) {
    %c0_i32 = arith.constant 0 : i32
    %c0_i32_0 = arith.constant 0 : i32
    %c0_i32_1 = arith.constant 0 : i32
    return %c0_i32, %c0_i32_0 : i32, i32
  }
  func.func @transform_4(%arg0: i32, %arg1: i32, %arg2: i32) -> (i32, i32) {
    %c0_i32 = arith.constant 0 : i32
    %c0_i32_0 = arith.constant 0 : i32
    return %c0_i32, %arg1 : i32, i32
  }
  func.func @transform_5(%arg0: i32, %arg1: i32, %arg2: i32) -> (i32, i32) {
    %c0_i32 = arith.constant 0 : i32
    return %arg0, %arg1 : i32, i32
  }
}

module attributes {stable_mosaic.version = 11 : i64} {
  func.func @_attn_kernel(%arg0: i32, %arg1: i32, %arg2: i32, %arg3: memref<1x8x8xbf16, #tpu.memory_space<vmem>>, %arg4: memref<1x8x8xbf16, #tpu.memory_space<vmem>>, %arg5: memref<1x8x8xbf16, #tpu.memory_space<vmem>>, %arg6: memref<1x8x8xbf16, #tpu.memory_space<vmem>>, %arg7: memref<8x1xf32, #tpu.memory_space<vmem>>, %arg8: memref<8x1xf32, #tpu.memory_space<vmem>>, %arg9: memref<8x8xf32, #tpu.memory_space<vmem>>) attributes {dimension_semantics = [#tpu.dimension_semantics<parallel>, #tpu.dimension_semantics<parallel>, #tpu.dimension_semantics<arbitrary>], iteration_bounds = array<i64: 8, 1, 1>, scalar_prefetch = 0 : i64, scratch_operands = 3 : i64, tpu.core_type = #tpu.core_type<tc>, window_params = [{transform_indices = @transform_0, window_bounds = array<i64: 1, 8, 8>}, {transform_indices = @transform_1, window_bounds = array<i64: 1, 8, 8>}, {transform_indices = @transform_2, window_bounds = array<i64: 1, 8, 8>}, {transform_indices = @transform_3, window_bounds = array<i64: 1, 8, 8>}]} {
    %c0_i32 = arith.constant 0 : i32
    %0 = arith.cmpi eq, %arg2, %c0_i32 : i32
    %1 = arith.extui %0 : i1 to i32
    %c0_i32_0 = arith.constant 0 : i32
    %2 = arith.cmpi ne, %1, %c0_i32_0 : i32
    scf.if %2 {
      %cst = arith.constant 0xFF800000 : f32
      %12 = vector.broadcast %cst : f32 to vector<8x1xf32>
      %c0 = arith.constant 0 : index
      %c0_5 = arith.constant 0 : index
      %13 = vector.load %arg7[%c0, %c0_5] : memref<8x1xf32, #tpu.memory_space<vmem>>, vector<8x1xf32>
      tpu.vector_store %arg7[%c0, %c0_5], %12 {strides = array<i32>} : memref<8x1xf32, #tpu.memory_space<vmem>>, vector<8x1xf32>,
      %cst_6 = arith.constant 0.000000e+00 : f32
      %14 = vector.broadcast %cst_6 : f32 to vector<8x1xf32>
      %c0_7 = arith.constant 0 : index
      %c0_8 = arith.constant 0 : index
      %15 = vector.load %arg8[%c0_7, %c0_8] : memref<8x1xf32, #tpu.memory_space<vmem>>, vector<8x1xf32>
      tpu.vector_store %arg8[%c0_7, %c0_8], %14 {strides = array<i32>} : memref<8x1xf32, #tpu.memory_space<vmem>>, vector<8x1xf32>,
      %cst_9 = arith.constant 0.000000e+00 : f32
      %16 = vector.broadcast %cst_9 : f32 to vector<8x8xf32>
      %c0_10 = arith.constant 0 : index
      %c0_11 = arith.constant 0 : index
      %17 = vector.load %arg9[%c0_10, %c0_11] : memref<8x8xf32, #tpu.memory_space<vmem>>, vector<8x8xf32>
      tpu.vector_store %arg9[%c0_10, %c0_11], %16 {strides = array<i32>} : memref<8x8xf32, #tpu.memory_space<vmem>>, vector<8x8xf32>,
    } else {
    }
    %c8_i32 = arith.constant 8 : i32
    %3 = arith.muli %arg2, %c8_i32 : i32
    %c8_i32_1 = arith.constant 8 : i32
    %4 = arith.muli %arg1, %c8_i32_1 : i32
    %c7_i32 = arith.constant 7 : i32
    %5 = arith.addi %4, %c7_i32 : i32
    %6 = arith.cmpi sle, %3, %5 : i32
    %7 = arith.extui %6 : i1 to i32
    %c0_i32_2 = arith.constant 0 : i32
    %8 = arith.cmpi ne, %7, %c0_i32_2 : i32
    scf.if %8 {
      %c0 = arith.constant 0 : index
      %c0_5 = arith.constant 0 : index
      %c0_6 = arith.constant 0 : index
      %12 = vector.load %arg3[%c0, %c0_5, %c0_6] : memref<1x8x8xbf16, #tpu.memory_space<vmem>>, vector<1x8x8xbf16>
      %13 = vector.shape_cast %12 : vector<1x8x8xbf16> to vector<8x8xbf16>
      %c0_7 = arith.constant 0 : index
      %c0_8 = arith.constant 0 : index
      %c0_9 = arith.constant 0 : index
      %14 = vector.load %arg4[%c0_7, %c0_8, %c0_9] : memref<1x8x8xbf16, #tpu.memory_space<vmem>>, vector<1x8x8xbf16>
      %15 = vector.shape_cast %14 : vector<1x8x8xbf16> to vector<8x8xbf16>
      %c0_10 = arith.constant 0 : index
      %c0_11 = arith.constant 0 : index
      %c0_12 = arith.constant 0 : index
      %16 = vector.load %arg5[%c0_10, %c0_11, %c0_12] : memref<1x8x8xbf16, #tpu.memory_space<vmem>>, vector<1x8x8xbf16>
      %17 = vector.shape_cast %16 : vector<1x8x8xbf16> to vector<8x8xbf16>
      %cst = arith.constant dense<0.000000e+00> : vector<8x8xf32>
      %18 = tpu.matmul %13, %15, %cst {dimension_numbers = #tpu.dot_dimension_numbers<[1], [1], [0], [0], [0, 0, 1, 0], [], []>} : vector<8x8xbf16>, vector<8x8xbf16>, vector<8x8xf32> -> vector<8x8xf32>
      %c8_i32_13 = arith.constant 8 : i32
      %19 = arith.muli %arg2, %c8_i32_13 : i32
      %20 = tpu.iota {dimensions = array<i32: 1>} : vector<8x8xi32>
      %21 = vector.broadcast %19 : i32 to vector<8x8xi32>
      %22 = arith.addi %21, %20 : vector<8x8xi32>
      %c8_i32_14 = arith.constant 8 : i32
      %23 = arith.muli %arg1, %c8_i32_14 : i32
      %24 = tpu.iota {dimensions = array<i32: 0>} : vector<8x8xi32>
      %25 = vector.broadcast %23 : i32 to vector<8x8xi32>
      %26 = arith.addi %25, %24 : vector<8x8xi32>
      %27 = arith.cmpi sle, %22, %26 : vector<8x8xi32>
      %cst_15 = arith.constant 0xFF800000 : f32
      %28 = vector.broadcast %cst_15 : f32 to vector<8x8xf32>
      %29 = arith.select %27, %18, %28 : vector<8x8xi1>, vector<8x8xf32>
      %c0_16 = arith.constant 0 : index
      %c0_17 = arith.constant 0 : index
      %30 = vector.load %arg7[%c0_16, %c0_17] : memref<8x1xf32, #tpu.memory_space<vmem>>, vector<8x1xf32>
      %cst_18 = arith.constant dense<0xFF800000> : vector<8xf32>
      %31 = vector.multi_reduction <maximumf>, %29, %cst_18 [1] : vector<8x8xf32> to vector<8xf32>
      %32 = vector.shape_cast %31 : vector<8xf32> to vector<8x1xf32>
      %33 = arith.maximumf %30, %32 : vector<8x1xf32>
      %34 = arith.subf %30, %33 : vector<8x1xf32>
      %35 = math.exp %34 : vector<8x1xf32>
      %36 = vector.broadcast %33 : vector<8x1xf32> to vector<8x8xf32>
      %37 = arith.subf %29, %36 : vector<8x8xf32>
      %38 = math.exp %37 : vector<8x8xf32>
      %c0_19 = arith.constant 0 : index
      %c0_20 = arith.constant 0 : index
      %39 = vector.load %arg8[%c0_19, %c0_20] : memref<8x1xf32, #tpu.memory_space<vmem>>, vector<8x1xf32>
      %40 = arith.mulf %35, %39 : vector<8x1xf32>
      %cst_21 = arith.constant dense<0.000000e+00> : vector<8xf32>
      %41 = vector.multi_reduction <add>, %38, %cst_21 [1] : vector<8x8xf32> to vector<8xf32>
      %42 = vector.shape_cast %41 : vector<8xf32> to vector<8x1xf32>
      %43 = arith.addf %40, %42 : vector<8x1xf32>
      %c0_22 = arith.constant 0 : index
      %c0_23 = arith.constant 0 : index
      %44 = vector.load %arg8[%c0_22, %c0_23] : memref<8x1xf32, #tpu.memory_space<vmem>>, vector<8x1xf32>
      tpu.vector_store %arg8[%c0_22, %c0_23], %43 {strides = array<i32>} : memref<8x1xf32, #tpu.memory_space<vmem>>, vector<8x1xf32>,
      %c0_24 = arith.constant 0 : index
      %c0_25 = arith.constant 0 : index
      %45 = vector.load %arg9[%c0_24, %c0_25] : memref<8x8xf32, #tpu.memory_space<vmem>>, vector<8x8xf32>
      %46 = vector.broadcast %35 : vector<8x1xf32> to vector<8x8xf32>
      %47 = arith.mulf %46, %45 : vector<8x8xf32>
      %48 = arith.truncf %38 : vector<8x8xf32> to vector<8x8xbf16>
      %cst_26 = arith.constant dense<0.000000e+00> : vector<8x8xf32>
      %49 = tpu.matmul %48, %17, %cst_26 {dimension_numbers = #tpu.dot_dimension_numbers<[1], [0], [0], [1], [0, 0, 1, 1], [], []>} : vector<8x8xbf16>, vector<8x8xbf16>, vector<8x8xf32> -> vector<8x8xf32>
      %50 = arith.addf %47, %49 : vector<8x8xf32>
      %c0_27 = arith.constant 0 : index
      %c0_28 = arith.constant 0 : index
      %51 = vector.load %arg9[%c0_27, %c0_28] : memref<8x8xf32, #tpu.memory_space<vmem>>, vector<8x8xf32>
      tpu.vector_store %arg9[%c0_27, %c0_28], %50 {strides = array<i32>} : memref<8x8xf32, #tpu.memory_space<vmem>>, vector<8x8xf32>,
      %c0_29 = arith.constant 0 : index
      %c0_30 = arith.constant 0 : index
      %52 = vector.load %arg7[%c0_29, %c0_30] : memref<8x1xf32, #tpu.memory_space<vmem>>, vector<8x1xf32>
      tpu.vector_store %arg7[%c0_29, %c0_30], %33 {strides = array<i32>} : memref<8x1xf32, #tpu.memory_space<vmem>>, vector<8x1xf32>,
    } else {
    }
    %c0_i32_3 = arith.constant 0 : i32
    %9 = arith.cmpi eq, %arg2, %c0_i32_3 : i32
    %10 = arith.extui %9 : i1 to i32
    %c0_i32_4 = arith.constant 0 : i32
    %11 = arith.cmpi ne, %10, %c0_i32_4 : i32
    scf.if %11 {
      %c0 = arith.constant 0 : index
      %c0_5 = arith.constant 0 : index
      %12 = vector.load %arg9[%c0, %c0_5] : memref<8x8xf32, #tpu.memory_space<vmem>>, vector<8x8xf32>
      %c0_6 = arith.constant 0 : index
      %c0_7 = arith.constant 0 : index
      %13 = vector.load %arg8[%c0_6, %c0_7] : memref<8x1xf32, #tpu.memory_space<vmem>>, vector<8x1xf32>
      %14 = vector.broadcast %13 : vector<8x1xf32> to vector<8x8xf32>
      %15 = arith.divf %12, %14 : vector<8x8xf32>
      %16 = arith.truncf %15 : vector<8x8xf32> to vector<8x8xbf16>
      %c0_8 = arith.constant 0 : index
      %c0_9 = arith.constant 0 : index
      %c0_10 = arith.constant 0 : index
      %17 = vector.load %arg6[%c0_8, %c0_9, %c0_10] : memref<1x8x8xbf16, #tpu.memory_space<vmem>>, vector<1x8x8xbf16>
      %18 = vector.shape_cast %17 : vector<1x8x8xbf16> to vector<8x8xbf16>
      %19 = vector.shape_cast %16 : vector<8x8xbf16> to vector<1x8x8xbf16>
      tpu.vector_store %arg6[%c0_8, %c0_9, %c0_10], %19 {strides = array<i32>} : memref<1x8x8xbf16, #tpu.memory_space<vmem>>, vector<1x8x8xbf16>,
    } else {
    }
    return
  }
  func.func @transform_0(%arg0: i32, %arg1: i32, %arg2: i32) -> (i32, i32, i32) {
    %c0_i32 = arith.constant 0 : i32
    %c0_i32_0 = arith.constant 0 : i32
    return %arg0, %arg1, %c0_i32 : i32, i32, i32
  }
  func.func @transform_1(%arg0: i32, %arg1: i32, %arg2: i32) -> (i32, i32, i32) {
    %c0_i32 = arith.constant 0 : i32
    %c0_i32_0 = arith.constant 0 : i32
    return %arg0, %arg2, %c0_i32 : i32, i32, i32
  }
  func.func @transform_2(%arg0: i32, %arg1: i32, %arg2: i32) -> (i32, i32, i32) {
    %c0_i32 = arith.constant 0 : i32
    %c0_i32_0 = arith.constant 0 : i32
    return %arg0, %arg2, %c0_i32 : i32, i32, i32
  }
  func.func @transform_3(%arg0: i32, %arg1: i32, %arg2: i32) -> (i32, i32, i32) {
    %c0_i32 = arith.constant 0 : i32
    %c0_i32_0 = arith.constant 0 : i32
    return %arg0, %arg1, %c0_i32 : i32, i32, i32
  }
}

module attributes {stable_mosaic.version = 11 : i64} {
  func.func @_linear_kernel(%arg0: i32, %arg1: i32, %arg2: i32, %arg3: memref<16x32xbf16, #tpu.memory_space<vmem>>, %arg4: memref<32x32xbf16, #tpu.memory_space<vmem>>, %arg5: memref<1x32xf32, #tpu.memory_space<vmem>>, %arg6: memref<16x32xf32, #tpu.memory_space<vmem>>, %arg7: memref<16x32xf32, #tpu.memory_space<vmem>>) attributes {dimension_semantics = [#tpu.dimension_semantics<parallel>, #tpu.dimension_semantics<parallel>, #tpu.dimension_semantics<arbitrary>], iteration_bounds = array<i64: 1, 1, 1>, scalar_prefetch = 0 : i64, scratch_operands = 0 : i64, tpu.core_type = #tpu.core_type<tc>, window_params = [{transform_indices = @transform_0, window_bounds = array<i64: 16, 32>}, {transform_indices = @transform_1, window_bounds = array<i64: 32, 32>}, {transform_indices = @transform_2, window_bounds = array<i64: 1, 32>}, {transform_indices = @transform_3, window_bounds = array<i64: 16, 32>}, {transform_indices = @transform_4, window_bounds = array<i64: 16, 32>}]} {
    %c0 = arith.constant 0 : index
    %c0_0 = arith.constant 0 : index
    %0 = vector.load %arg3[%c0, %c0_0] : memref<16x32xbf16, #tpu.memory_space<vmem>>, vector<16x32xbf16>
    %c0_1 = arith.constant 0 : index
    %c0_2 = arith.constant 0 : index
    %1 = vector.load %arg4[%c0_1, %c0_2] : memref<32x32xbf16, #tpu.memory_space<vmem>>, vector<32x32xbf16>
    %cst = arith.constant dense<0.000000e+00> : vector<16x32xf32>
    %2 = tpu.matmul %0, %1, %cst {dimension_numbers = #tpu.dot_dimension_numbers<[1], [0], [0], [1], [0, 0, 1, 1], [], []>} : vector<16x32xbf16>, vector<32x32xbf16>, vector<16x32xf32> -> vector<16x32xf32>
    %c0_3 = arith.constant 0 : index
    %c0_4 = arith.constant 0 : index
    %3 = vector.load %arg5[%c0_3, %c0_4] : memref<1x32xf32, #tpu.memory_space<vmem>>, vector<1x32xf32>
    %4 = vector.broadcast %3 : vector<1x32xf32> to vector<16x32xf32>
    %5 = arith.addf %2, %4 : vector<16x32xf32>
    %c0_5 = arith.constant 0 : index
    %c0_6 = arith.constant 0 : index
    %6 = vector.load %arg6[%c0_5, %c0_6] : memref<16x32xf32, #tpu.memory_space<vmem>>, vector<16x32xf32>
    %7 = arith.addf %5, %6 : vector<16x32xf32>
    %c0_7 = arith.constant 0 : index
    %c0_8 = arith.constant 0 : index
    %8 = vector.load %arg7[%c0_7, %c0_8] : memref<16x32xf32, #tpu.memory_space<vmem>>, vector<16x32xf32>
    tpu.vector_store %arg7[%c0_7, %c0_8], %7 {strides = array<i32>} : memref<16x32xf32, #tpu.memory_space<vmem>>, vector<16x32xf32>,
    return
  }
  func.func @transform_0(%arg0: i32, %arg1: i32, %arg2: i32) -> (i32, i32) {
    %c0_i32 = arith.constant 0 : i32
    return %arg0, %arg2 : i32, i32
  }
  func.func @transform_1(%arg0: i32, %arg1: i32, %arg2: i32) -> (i32, i32) {
    %c0_i32 = arith.constant 0 : i32
    return %arg2, %arg1 : i32, i32
  }
  func.func @transform_2(%arg0: i32, %arg1: i32, %arg2: i32) -> (i32, i32) {
    %c0_i32 = arith.constant 0 : i32
    %c0_i32_0 = arith.constant 0 : i32
    return %c0_i32, %arg1 : i32, i32
  }
  func.func @transform_3(%arg0: i32, %arg1: i32, %arg2: i32) -> (i32, i32) {
    %c0_i32 = arith.constant 0 : i32
    return %arg0, %arg1 : i32, i32
  }
  func.func @transform_4(%arg0: i32, %arg1: i32, %arg2: i32) -> (i32, i32) {
    %c0_i32 = arith.constant 0 : i32
    return %arg0, %arg1 : i32, i32
  }
}

module attributes {stable_mosaic.version = 11 : i64} {
  func.func @_linear_kernel(%arg0: i32, %arg1: i32, %arg2: i32, %arg3: memref<16x32xf32, #tpu.memory_space<vmem>>, %arg4: memref<32x128xbf16, #tpu.memory_space<vmem>>, %arg5: memref<1x32xf32, #tpu.memory_space<vmem>>, %arg6: memref<1x32xf32, #tpu.memory_space<vmem>>, %arg7: memref<1x128xf32, #tpu.memory_space<vmem>>, %arg8: memref<16x128xbf16, #tpu.memory_space<vmem>>) attributes {dimension_semantics = [#tpu.dimension_semantics<parallel>, #tpu.dimension_semantics<parallel>, #tpu.dimension_semantics<arbitrary>], iteration_bounds = array<i64: 1, 1, 1>, scalar_prefetch = 0 : i64, scratch_operands = 0 : i64, tpu.core_type = #tpu.core_type<tc>, window_params = [{transform_indices = @transform_0, window_bounds = array<i64: 16, 32>}, {transform_indices = @transform_1, window_bounds = array<i64: 32, 128>}, {pipeline_mode = #tpu.pipeline_mode<synchronous>, transform_indices = @transform_2, window_bounds = array<i64: 1, 32>}, {pipeline_mode = #tpu.pipeline_mode<synchronous>, transform_indices = @transform_3, window_bounds = array<i64: 1, 32>}, {transform_indices = @transform_4, window_bounds = array<i64: 1, 128>}, {transform_indices = @transform_5, window_bounds = array<i64: 16, 128>}]} {
    %c0 = arith.constant 0 : index
    %c0_0 = arith.constant 0 : index
    %0 = vector.load %arg3[%c0, %c0_0] : memref<16x32xf32, #tpu.memory_space<vmem>>, vector<16x32xf32>
    %cst = arith.constant dense<0.000000e+00> : vector<16xf32>
    %1 = vector.multi_reduction <add>, %0, %cst [1] : vector<16x32xf32> to vector<16xf32>
    %2 = vector.shape_cast %1 : vector<16xf32> to vector<16x1xf32>
    %cst_1 = arith.constant 3.200000e+01 : f32
    %3 = vector.broadcast %cst_1 : f32 to vector<16x1xf32>
    %4 = arith.divf %2, %3 : vector<16x1xf32>
    %5 = vector.broadcast %4 : vector<16x1xf32> to vector<16x32xf32>
    %6 = arith.subf %0, %5 : vector<16x32xf32>
    %7 = arith.mulf %6, %6 : vector<16x32xf32>
    %cst_2 = arith.constant dense<0.000000e+00> : vector<16xf32>
    %8 = vector.multi_reduction <add>, %7, %cst_2 [1] : vector<16x32xf32> to vector<16xf32>
    %9 = vector.shape_cast %8 : vector<16xf32> to vector<16x1xf32>
    %cst_3 = arith.constant 3.200000e+01 : f32
    %10 = vector.broadcast %cst_3 : f32 to vector<16x1xf32>
    %11 = arith.divf %9, %10 : vector<16x1xf32>
    %12 = vector.broadcast %4 : vector<16x1xf32> to vector<16x32xf32>
    %13 = arith.subf %0, %12 : vector<16x32xf32>
    %cst_4 = arith.constant 9.99999974E-6 : f32
    %14 = vector.broadcast %cst_4 : f32 to vector<16x1xf32>
    %15 = arith.addf %11, %14 : vector<16x1xf32>
    %16 = math.rsqrt %15 : vector<16x1xf32>
    %17 = vector.broadcast %16 : vector<16x1xf32> to vector<16x32xf32>
    %18 = arith.mulf %13, %17 : vector<16x32xf32>
    %c0_5 = arith.constant 0 : index
    %c0_6 = arith.constant 0 : index
    %19 = vector.load %arg5[%c0_5, %c0_6] : memref<1x32xf32, #tpu.memory_space<vmem>>, vector<1x32xf32>
    %20 = vector.broadcast %19 : vector<1x32xf32> to vector<16x32xf32>
    %21 = arith.mulf %18, %20 : vector<16x32xf32>
    %c0_7 = arith.constant 0 : index
    %c0_8 = arith.constant 0 : index
    %22 = vector.load %arg6[%c0_7, %c0_8] : memref<1x32xf32, #tpu.memory_space<vmem>>, vector<1x32xf32>
    %23 = vector.broadcast %22 : vector<1x32xf32> to vector<16x32xf32>
    %24 = arith.addf %21, %23 : vector<16x32xf32>
    %25 = arith.truncf %24 : vector<16x32xf32> to vector<16x32xbf16>
    %c0_9 = arith.constant 0 : index
    %c0_10 = arith.constant 0 : index
    %26 = vector.load %arg4[%c0_9, %c0_10] : memref<32x128xbf16, #tpu.memory_space<vmem>>, vector<32x128xbf16>
    %cst_11 = arith.constant dense<0.000000e+00> : vector<16x128xf32>
    %27 = tpu.matmul %25, %26, %cst_11 {dimension_numbers = #tpu.dot_dimension_numbers<[1], [0], [0], [1], [0, 0, 1, 1], [], []>} : vector<16x32xbf16>, vector<32x128xbf16>, vector<16x128xf32> -> vector<16x128xf32>
    %c0_12 = arith.constant 0 : index
    %c0_13 = arith.constant 0 : index
    %28 = vector.load %arg7[%c0_12, %c0_13] : memref<1x128xf32, #tpu.memory_space<vmem>>, vector<1x128xf32>
    %29 = vector.broadcast %28 : vector<1x128xf32> to vector<16x128xf32>
    %30 = arith.addf %27, %29 : vector<16x128xf32>
    %cst_14 = arith.constant -1.702000e+00 : f32
    %31 = vector.broadcast %cst_14 : f32 to vector<16x128xf32>
    %32 = arith.mulf %31, %30 : vector<16x128xf32>
    %33 = math.exp %32 : vector<16x128xf32>
    %cst_15 = arith.constant 1.000000e+00 : f32
    %34 = vector.broadcast %cst_15 : f32 to vector<16x128xf32>
    %35 = arith.addf %34, %33 : vector<16x128xf32>
    %36 = tpu.reciprocal %35 {approx = true} : vector<16x128xf32> -> vector<16x128xf32>
    %37 = arith.mulf %30, %36 : vector<16x128xf32>
    %38 = arith.truncf %37 : vector<16x128xf32> to vector<16x128xbf16>
    %c0_16 = arith.constant 0 : index
    %c0_17 = arith.constant 0 : index
    %39 = vector.load %arg8[%c0_16, %c0_17] : memref<16x128xbf16, #tpu.memory_space<vmem>>, vector<16x128xbf16>
    tpu.vector_store %arg8[%c0_16, %c0_17], %38 {strides = array<i32>} : memref<16x128xbf16, #tpu.memory_space<vmem>>, vector<16x128xbf16>,
    return
  }
  func.func @transform_0(%arg0: i32, %arg1: i32, %arg2: i32) -> (i32, i32) {
    %c0_i32 = arith.constant 0 : i32
    return %arg0, %arg2 : i32, i32
  }
  func.func @transform_1(%arg0: i32, %arg1: i32, %arg2: i32) -> (i32, i32) {
    %c0_i32 = arith.constant 0 : i32
    return %arg2, %arg1 : i32, i32
  }
  func.func @transform_2(%arg0: i32, %arg1: i32, %arg2: i32) -> (i32, i32) {
    %c0_i32 = arith.constant 0 : i32
    %c0_i32_0 = arith.constant 0 : i32
    %c0_i32_1 = arith.constant 0 : i32
    return %c0_i32, %c0_i32_0 : i32, i32
  }
  func.func @transform_3(%arg0: i32, %arg1: i32, %arg2: i32) -> (i32, i32) {
    %c0_i32 = arith.constant 0 : i32
    %c0_i32_0 = arith.constant 0 : i32
    %c0_i32_1 = arith.constant 0 : i32
    return %c0_i32, %c0_i32_0 : i32, i32
  }
  func.func @transform_4(%arg0: i32, %arg1: i32, %arg2: i32) -> (i32, i32) {
    %c0_i32 = arith.constant 0 : i32
    %c0_i32_0 = arith.constant 0 : i32
    return %c0_i32, %arg1 : i32, i32
  }
  func.func @transform_5(%arg0: i32, %arg1: i32, %arg2: i32) -> (i32, i32) {
    %c0_i32 = arith.constant 0 : i32
    return %arg0, %arg1 : i32, i32
  }
}

module attributes {stable_mosaic.version = 11 : i64} {
  func.func @_linear_kernel(%arg0: i32, %arg1: i32, %arg2: i32, %arg3: memref<16x128xbf16, #tpu.memory_space<vmem>>, %arg4: memref<128x32xbf16, #tpu.memory_space<vmem>>, %arg5: memref<1x32xf32, #tpu.memory_space<vmem>>, %arg6: memref<16x32xf32, #tpu.memory_space<vmem>>, %arg7: memref<16x32xf32, #tpu.memory_space<vmem>>) attributes {dimension_semantics = [#tpu.dimension_semantics<parallel>, #tpu.dimension_semantics<parallel>, #tpu.dimension_semantics<arbitrary>], iteration_bounds = array<i64: 1, 1, 1>, scalar_prefetch = 0 : i64, scratch_operands = 0 : i64, tpu.core_type = #tpu.core_type<tc>, window_params = [{transform_indices = @transform_0, window_bounds = array<i64: 16, 128>}, {transform_indices = @transform_1, window_bounds = array<i64: 128, 32>}, {transform_indices = @transform_2, window_bounds = array<i64: 1, 32>}, {transform_indices = @transform_3, window_bounds = array<i64: 16, 32>}, {transform_indices = @transform_4, window_bounds = array<i64: 16, 32>}]} {
    %c0 = arith.constant 0 : index
    %c0_0 = arith.constant 0 : index
    %0 = vector.load %arg3[%c0, %c0_0] : memref<16x128xbf16, #tpu.memory_space<vmem>>, vector<16x128xbf16>
    %c0_1 = arith.constant 0 : index
    %c0_2 = arith.constant 0 : index
    %1 = vector.load %arg4[%c0_1, %c0_2] : memref<128x32xbf16, #tpu.memory_space<vmem>>, vector<128x32xbf16>
    %cst = arith.constant dense<0.000000e+00> : vector<16x32xf32>
    %2 = tpu.matmul %0, %1, %cst {dimension_numbers = #tpu.dot_dimension_numbers<[1], [0], [0], [1], [0, 0, 1, 1], [], []>} : vector<16x128xbf16>, vector<128x32xbf16>, vector<16x32xf32> -> vector<16x32xf32>
    %c0_3 = arith.constant 0 : index
    %c0_4 = arith.constant 0 : index
    %3 = vector.load %arg5[%c0_3, %c0_4] : memref<1x32xf32, #tpu.memory_space<vmem>>, vector<1x32xf32>
    %4 = vector.broadcast %3 : vector<1x32xf32> to vector<16x32xf32>
    %5 = arith.addf %2, %4 : vector<16x32xf32>
    %c0_5 = arith.constant 0 : index
    %c0_6 = arith.constant 0 : index
    %6 = vector.load %arg6[%c0_5, %c0_6] : memref<16x32xf32, #tpu.memory_space<vmem>>, vector<16x32xf32>
    %7 = arith.addf %5, %6 : vector<16x32xf32>
    %c0_7 = arith.constant 0 : index
    %c0_8 = arith.constant 0 : index
    %8 = vector.load %arg7[%c0_7, %c0_8] : memref<16x32xf32, #tpu.memory_space<vmem>>, vector<16x32xf32>
    tpu.vector_store %arg7[%c0_7, %c0_8], %7 {strides = array<i32>} : memref<16x32xf32, #tpu.memory_space<vmem>>, vector<16x32xf32>,
    return
  }
  func.func @transform_0(%arg0: i32, %arg1: i32, %arg2: i32) -> (i32, i32) {
    %c0_i32 = arith.constant 0 : i32
    return %arg0, %arg2 : i32, i32
  }
  func.func @transform_1(%arg0: i32, %arg1: i32, %arg2: i32) -> (i32, i32) {
    %c0_i32 = arith.constant 0 : i32
    return %arg2, %arg1 : i32, i32
  }
  func.func @transform_2(%arg0: i32, %arg1: i32, %arg2: i32) -> (i32, i32) {
    %c0_i32 = arith.constant 0 : i32
    %c0_i32_0 = arith.constant 0 : i32
    return %c0_i32, %arg1 : i32, i32
  }
  func.func @transform_3(%arg0: i32, %arg1: i32, %arg2: i32) -> (i32, i32) {
    %c0_i32 = arith.constant 0 : i32
    return %arg0, %arg1 : i32, i32
  }
  func.func @transform_4(%arg0: i32, %arg1: i32, %arg2: i32) -> (i32, i32) {
    %c0_i32 = arith.constant 0 : i32
    return %arg0, %arg1 : i32, i32
  }
}

module attributes {stable_mosaic.version = 11 : i64} {
  func.func @_logits_kernel(%arg0: i32, %arg1: i32, %arg2: memref<2x32xf32, #tpu.memory_space<vmem>>, %arg3: memref<2x32xf32, #tpu.memory_space<vmem>>, %arg4: memref<1x1xf32, #tpu.memory_space<vmem>>, %arg5: memref<2x2xf32, #tpu.memory_space<vmem>>) attributes {dimension_semantics = [#tpu.dimension_semantics<parallel>, #tpu.dimension_semantics<parallel>], iteration_bounds = array<i64: 1, 1>, scalar_prefetch = 0 : i64, scratch_operands = 0 : i64, tpu.core_type = #tpu.core_type<tc>, window_params = [{transform_indices = @transform_0, window_bounds = array<i64: 2, 32>}, {transform_indices = @transform_1, window_bounds = array<i64: 2, 32>}, {pipeline_mode = #tpu.pipeline_mode<synchronous>, transform_indices = @transform_2, window_bounds = array<i64: 1, 1>}, {transform_indices = @transform_3, window_bounds = array<i64: 2, 2>}]} {
    %c0 = arith.constant 0 : index
    %c0_0 = arith.constant 0 : index
    %0 = vector.load %arg2[%c0, %c0_0] : memref<2x32xf32, #tpu.memory_space<vmem>>, vector<2x32xf32>
    %c0_1 = arith.constant 0 : index
    %c0_2 = arith.constant 0 : index
    %1 = vector.load %arg3[%c0_1, %c0_2] : memref<2x32xf32, #tpu.memory_space<vmem>>, vector<2x32xf32>
    %2 = arith.mulf %0, %0 : vector<2x32xf32>
    %cst = arith.constant dense<0.000000e+00> : vector<2xf32>
    %3 = vector.multi_reduction <add>, %2, %cst [1] : vector<2x32xf32> to vector<2xf32>
    %4 = vector.shape_cast %3 : vector<2xf32> to vector<2x1xf32>
    %5 = math.rsqrt %4 : vector<2x1xf32>
    %6 = vector.broadcast %5 : vector<2x1xf32> to vector<2x32xf32>
    %7 = arith.mulf %0, %6 : vector<2x32xf32>
    %8 = arith.mulf %1, %1 : vector<2x32xf32>
    %cst_3 = arith.constant dense<0.000000e+00> : vector<2xf32>
    %9 = vector.multi_reduction <add>, %8, %cst_3 [1] : vector<2x32xf32> to vector<2xf32>
    %10 = vector.shape_cast %9 : vector<2xf32> to vector<2x1xf32>
    %11 = math.rsqrt %10 : vector<2x1xf32>
    %12 = vector.broadcast %11 : vector<2x1xf32> to vector<2x32xf32>
    %13 = arith.mulf %1, %12 : vector<2x32xf32>
    %c0_4 = arith.constant 0 : index
    %c0_5 = arith.constant 0 : index
    %14 = vector.load %arg4[%c0_4, %c0_5] : memref<1x1xf32, #tpu.memory_space<vmem>>, vector<1x1xf32>
    %15 = math.exp %14 : vector<1x1xf32>
    %16 = arith.truncf %7 : vector<2x32xf32> to vector<2x32xbf16>
    %17 = arith.truncf %13 : vector<2x32xf32> to vector<2x32xbf16>
    %cst_6 = arith.constant dense<0.000000e+00> : vector<2x2xf32>
    %18 = tpu.matmul %16, %17, %cst_6 {dimension_numbers = #tpu.dot_dimension_numbers<[1], [1], [0], [0], [0, 0, 1, 0], [], []>} : vector<2x32xbf16>, vector<2x32xbf16>, vector<2x2xf32> -> vector<2x2xf32>
    %19 = vector.broadcast %15 : vector<1x1xf32> to vector<2x2xf32>
    %20 = arith.mulf %19, %18 : vector<2x2xf32>
    %c0_7 = arith.constant 0 : index
    %c0_8 = arith.constant 0 : index
    %21 = vector.load %arg5[%c0_7, %c0_8] : memref<2x2xf32, #tpu.memory_space<vmem>>, vector<2x2xf32>
    tpu.vector_store %arg5[%c0_7, %c0_8], %20 {strides = array<i32>} : memref<2x2xf32, #tpu.memory_space<vmem>>, vector<2x2xf32>,
    return
  }
  func.func @transform_0(%arg0: i32, %arg1: i32) -> (i32, i32) {
    %c0_i32 = arith.constant 0 : i32
    %c0_i32_0 = arith.constant 0 : i32
    return %arg0, %c0_i32 : i32, i32
  }
  func.func @transform_1(%arg0: i32, %arg1: i32) -> (i32, i32) {
    %c0_i32 = arith.constant 0 : i32
    %c0_i32_0 = arith.constant 0 : i32
    return %arg1, %c0_i32 : i32, i32
  }
  func.func @transform_2(%arg0: i32, %arg1: i32) -> (i32, i32) {
    %c0_i32 = arith.constant 0 : i32
    %c0_i32_0 = arith.constant 0 : i32
    %c0_i32_1 = arith.constant 0 : i32
    return %c0_i32, %c0_i32_0 : i32, i32
  }
  func.func @transform_3(%arg0: i32, %arg1: i32) -> (i32, i32) {
    %c0_i32 = arith.constant 0 : i32
    return %arg0, %arg1 : i32, i32
  }
}

module attributes {stable_mosaic.version = 11 : i64} {
  func.func @_linear_kernel(%arg0: i32, %arg1: i32, %arg2: i32, %arg3: memref<2x32xf32, #tpu.memory_space<vmem>>, %arg4: memref<32x32xbf16, #tpu.memory_space<vmem>>, %arg5: memref<1x32xf32, #tpu.memory_space<vmem>>, %arg6: memref<1x32xf32, #tpu.memory_space<vmem>>, %arg7: memref<2x32xf32, #tpu.memory_space<vmem>>) attributes {dimension_semantics = [#tpu.dimension_semantics<parallel>, #tpu.dimension_semantics<parallel>, #tpu.dimension_semantics<arbitrary>], iteration_bounds = array<i64: 1, 1, 1>, scalar_prefetch = 0 : i64, scratch_operands = 0 : i64, tpu.core_type = #tpu.core_type<tc>, window_params = [{transform_indices = @transform_0, window_bounds = array<i64: 2, 32>}, {transform_indices = @transform_1, window_bounds = array<i64: 32, 32>}, {pipeline_mode = #tpu.pipeline_mode<synchronous>, transform_indices = @transform_2, window_bounds = array<i64: 1, 32>}, {pipeline_mode = #tpu.pipeline_mode<synchronous>, transform_indices = @transform_3, window_bounds = array<i64: 1, 32>}, {transform_indices = @transform_4, window_bounds = array<i64: 2, 32>}]} {
    %c0 = arith.constant 0 : index
    %c0_0 = arith.constant 0 : index
    %0 = vector.load %arg3[%c0, %c0_0] : memref<2x32xf32, #tpu.memory_space<vmem>>, vector<2x32xf32>
    %cst = arith.constant dense<0.000000e+00> : vector<2xf32>
    %1 = vector.multi_reduction <add>, %0, %cst [1] : vector<2x32xf32> to vector<2xf32>
    %2 = vector.shape_cast %1 : vector<2xf32> to vector<2x1xf32>
    %cst_1 = arith.constant 3.200000e+01 : f32
    %3 = vector.broadcast %cst_1 : f32 to vector<2x1xf32>
    %4 = arith.divf %2, %3 : vector<2x1xf32>
    %5 = vector.broadcast %4 : vector<2x1xf32> to vector<2x32xf32>
    %6 = arith.subf %0, %5 : vector<2x32xf32>
    %7 = arith.mulf %6, %6 : vector<2x32xf32>
    %cst_2 = arith.constant dense<0.000000e+00> : vector<2xf32>
    %8 = vector.multi_reduction <add>, %7, %cst_2 [1] : vector<2x32xf32> to vector<2xf32>
    %9 = vector.shape_cast %8 : vector<2xf32> to vector<2x1xf32>
    %cst_3 = arith.constant 3.200000e+01 : f32
    %10 = vector.broadcast %cst_3 : f32 to vector<2x1xf32>
    %11 = arith.divf %9, %10 : vector<2x1xf32>
    %12 = vector.broadcast %4 : vector<2x1xf32> to vector<2x32xf32>
    %13 = arith.subf %0, %12 : vector<2x32xf32>
    %cst_4 = arith.constant 9.99999974E-6 : f32
    %14 = vector.broadcast %cst_4 : f32 to vector<2x1xf32>
    %15 = arith.addf %11, %14 : vector<2x1xf32>
    %16 = math.rsqrt %15 : vector<2x1xf32>
    %17 = vector.broadcast %16 : vector<2x1xf32> to vector<2x32xf32>
    %18 = arith.mulf %13, %17 : vector<2x32xf32>
    %c0_5 = arith.constant 0 : index
    %c0_6 = arith.constant 0 : index
    %19 = vector.load %arg5[%c0_5, %c0_6] : memref<1x32xf32, #tpu.memory_space<vmem>>, vector<1x32xf32>
    %20 = vector.broadcast %19 : vector<1x32xf32> to vector<2x32xf32>
    %21 = arith.mulf %18, %20 : vector<2x32xf32>
    %c0_7 = arith.constant 0 : index
    %c0_8 = arith.constant 0 : index
    %22 = vector.load %arg6[%c0_7, %c0_8] : memref<1x32xf32, #tpu.memory_space<vmem>>, vector<1x32xf32>
    %23 = vector.broadcast %22 : vector<1x32xf32> to vector<2x32xf32>
    %24 = arith.addf %21, %23 : vector<2x32xf32>
    %25 = arith.truncf %24 : vector<2x32xf32> to vector<2x32xbf16>
    %c0_9 = arith.constant 0 : index
    %c0_10 = arith.constant 0 : index
    %26 = vector.load %arg4[%c0_9, %c0_10] : memref<32x32xbf16, #tpu.memory_space<vmem>>, vector<32x32xbf16>
    %cst_11 = arith.constant dense<0.000000e+00> : vector<2x32xf32>
    %27 = tpu.matmul %25, %26, %cst_11 {dimension_numbers = #tpu.dot_dimension_numbers<[1], [0], [0], [1], [0, 0, 1, 1], [], []>} : vector<2x32xbf16>, vector<32x32xbf16>, vector<2x32xf32> -> vector<2x32xf32>
    %c0_12 = arith.constant 0 : index
    %c0_13 = arith.constant 0 : index
    %28 = vector.load %arg7[%c0_12, %c0_13] : memref<2x32xf32, #tpu.memory_space<vmem>>, vector<2x32xf32>
    tpu.vector_store %arg7[%c0_12, %c0_13], %27 {strides = array<i32>} : memref<2x32xf32, #tpu.memory_space<vmem>>, vector<2x32xf32>,
    return
  }
  func.func @transform_0(%arg0: i32, %arg1: i32, %arg2: i32) -> (i32, i32) {
    %c0_i32 = arith.constant 0 : i32
    return %arg0, %arg2 : i32, i32
  }
  func.func @transform_1(%arg0: i32, %arg1: i32, %arg2: i32) -> (i32, i32) {
    %c0_i32 = arith.constant 0 : i32
    return %arg2, %arg1 : i32, i32
  }
  func.func @transform_2(%arg0: i32, %arg1: i32, %arg2: i32) -> (i32, i32) {
    %c0_i32 = arith.constant 0 : i32
    %c0_i32_0 = arith.constant 0 : i32
    %c0_i32_1 = arith.constant 0 : i32
    return %c0_i32, %c0_i32_0 : i32, i32
  }
  func.func @transform_3(%arg0: i32, %arg1: i32, %arg2: i32) -> (i32, i32) {
    %c0_i32 = arith.constant 0 : i32
    %c0_i32_0 = arith.constant 0 : i32
    %c0_i32_1 = arith.constant 0 : i32
    return %c0_i32, %c0_i32_0 : i32, i32
  }
  func.func @transform_4(%arg0: i32, %arg1: i32, %arg2: i32) -> (i32, i32) {
    %c0_i32 = arith.constant 0 : i32
    return %arg0, %arg1 : i32, i32
  }
}

</mosaic_0001>

<bundles_post_ra>
// kernel: _lambda_.26
= control target key start
LH: loop header
LB: loop body
LE: loop exit
PB: predicated region body
PF: predicated region fallthrough
CT: control target
= control target key end

     0   :  { %8 = vsyncpa [#allocation3], 0  ;;  %s320_s0 = inlined_call_operand.hbm [shape: f32[10,64], index: 0, kind: input, shape index: {}]   ;;  %s321_s1 = inlined_call_operand.hbm [shape: f32[1,64], index: 1, kind: input, shape index: {}]   ;;  %s322_s2 = inlined_call_operand.hbm [shape: f32[1,64], index: 2, kind: input, shape index: {}]   ;;  %s323_s3 = inlined_call_operand.hbm [shape: f32[10,64], index: 3, kind: output, shape index: {}]  }
   0x1   :  { %9 = vsyncpa [#allocation6], 0 }
   0x2   :  { %10 = vsyncpa [#allocation4], 0  ;;  %s227_s12 = smov [#allocation5]   ;;  %s228_s14 = smov [#allocation2]  }
   0x3   :  { %s29_s13 = sshll.u32 %s227_s12, 4  ;;  %s16_s15 = sshll.u32 %s228_s14, 4  ;;  %s30_s13 = int_to_ptr.vmem [resolvable:$true] %s29_s13  ;;  %s253_s15 = int_to_ptr.vmem [resolvable:$true] %s16_s15 }
   0x4   :  { %s133_s18 = scalar_lea.hbm %s321_s1, 16 }
   0x5   :  { %p134_p0 = scmp.ne.s32.totalorder %s321_s1, %s133_s18  ;;  %p137_p1 = scmp.lt.u32.totalorder %s133_s18, %s321_s1 }
   0x7   :  { %p139_p2 = pnand %p137_p1, %p134_p0 }
   0x9   :  { %142 = shalt.err (!%p139_p2)
}
   0xa   :  { %s143_s23 = scalar_lea.vmem %s30_s13, 16  ;;  %s147_s24 = scalar_lea.vmem %s30_s13, 32 }
   0xb   :  { %p144_p3 = scmp.ne.s32.totalorder %s30_s13, %s143_s23  ;;  %p148_p4 = scmp.lt.s32.totalorder %s30_s13, %s30_s13 }
   0xc   :  { %p149_p5 = scmp.lt.s32.totalorder %s147_s24, %s143_s23 }
   0xe   :  { %p150_p6 = por %p149_p5, %p148_p4 }
  0x10   :  { %p151_p7 = pnand %p150_p6, %p144_p3 }
  0x12   :  { %154 = shalt.err (!%p151_p7)
}
  0x13   :  { %32 = dma.hbm_to_vmem [thread:$0]  %s321_s1, 16, %s30_s13, [#allocation6]  }
  0x14   :  { %s155_s29 = scalar_lea.hbm %s320_s0, 256 }
  0x15   :  { %p156_p8 = scmp.ne.s32.totalorder %s320_s0, %s155_s29  ;;  %p159_p9 = scmp.lt.u32.totalorder %s155_s29, %s320_s0 }
  0x17   :  { %p161_p10 = pnand %p159_p9, %p156_p8 }
  0x19   :  { %164 = shalt.err (!%p161_p10)
}
  0x1a   :  { %s165_s7 = scalar_lea.vmem %s253_s15, 256  ;;  %p170_p12 = scmp.lt.s32.totalorder %s253_s15, %s253_s15 }
  0x1b   :  { %p166_p11 = scmp.ne.s32.totalorder %s253_s15, %s165_s7  ;;  %p171_p13 = scmp.lt.s32.totalorder %s165_s7, %s165_s7 }
  0x1d   :  { %p172_p0 = por %p171_p13, %p170_p12 }
  0x1f   :  { %p173_p1 = pnand %p172_p0, %p166_p11 }
  0x21   :  { %176 = shalt.err (!%p173_p1)
}
  0x22   :  { %s229_s1 = smov 128   ;;  %s230_s8 = smov 8  }
  0x23   :  { %22 = dma.hbm_to_vmem [thread:$0]  %s320_s0, 256, %s253_s15, [#allocation3], %s229_s1, %s229_s1, %s230_s8  }
  0x24   :  { %s231_s11 = smov [#allocation7]   ;;  %s177_s16 = scalar_lea.hbm %s322_s2, 16 }
  0x25   :  { %s39_s12 = sshll.u32 %s231_s11, 4  ;;  %p178_p2 = scmp.ne.s32.totalorder %s322_s2, %s177_s16  ;;  %s40_s12 = int_to_ptr.vmem [resolvable:$true] %s39_s12 }
  0x26   :  { %p181_p3 = scmp.lt.u32.totalorder %s177_s16, %s322_s2 }
  0x28   :  { %p183_p4 = pnand %p181_p3, %p178_p2 }
  0x2a   :  { %186 = shalt.err (!%p183_p4)
}
  0x2b   :  { %s187_s21 = scalar_lea.vmem %s40_s12, 16  ;;  %s191_s0 = scalar_lea.vmem %s40_s12, 32 }
  0x2c   :  { %p188_p5 = scmp.ne.s32.totalorder %s40_s12, %s187_s21  ;;  %p192_p6 = scmp.lt.s32.totalorder %s40_s12, %s40_s12 }
  0x2d   :  { %p193_p7 = scmp.lt.s32.totalorder %s191_s0, %s187_s21 }
  0x2f   :  { %p194_p8 = por %p193_p7, %p192_p6 }
  0x31   :  { %p195_p9 = pnand %p194_p8, %p188_p5 }
  0x33   :  { %198 = shalt.err (!%p195_p9)
}
  0x34   :  { %42 = dma.hbm_to_vmem [thread:$0]  %s322_s2, 16, %s40_s12, [#allocation6]  }
  0x35   :  { %221 = dma.done.wait [#allocation3], 256  }
  0x36   :  { %222 = vsyncadd [#allocation3], 4294967040 }
  0x37   :  { %223 = dma.done.wait [#allocation6], 32  }
  0x38   :  { %224 = vsyncadd [#allocation6], 4294967264  ;;  %vm54_vm0 = vcmask 523264   ;;  %v52_v0 = vld [vmem:[#allocation2] sm:$0xff]  ;;  %v53_v1 = vld [vmem:[#allocation2 + $0x8] sm:$0x3] }
  0x39   :  { %vm58_vm1 = vcmask 517120   ;;  %v55_v2 = vsel %vm54_vm0, %v52_v0, 0.0  ;;  %v121_v21 = vld [vmem:[#allocation5] ss:$0 sm:$0xff]  ;;  %v122_v23 = vld [vmem:[#allocation7] ss:$0 sm:$0xff] }
  0x3a   :  { %56 = vadd.xlane.f32.xlu0 %v55_v2  ;;  %v59_v3 = vsel %vm58_vm1, %v53_v1, 0.0  ;;  %s232_s2 = smov [#allocation8]  }
  0x3b   :  { %s108_s23 = sshll.u32 %s232_s2, 4  ;;  %s109_s23 = int_to_ptr.vmem [resolvable:$true] %s108_s23 }
  0x3c   :  { %s199_s24 = scalar_lea.vmem %s109_s23, 256  ;;  %p204_p11 = scmp.lt.s32.totalorder %s109_s23, %s109_s23 }
  0x3d   :  { %p200_p10 = scmp.ne.s32.totalorder %s109_s23, %s199_s24  ;;  %p205_p12 = scmp.lt.s32.totalorder %s199_s24, %s199_s24 }
  0x3e   :  { %60 = vadd.xlane.f32.xlu0 %v59_v3 }
  0x3f   :  { %p206_p13 = por %p205_p12, %p204_p11 }
  0x41   :  { %p207_p0 = pnand %p206_p13, %p200_p10 }
  0xc7   :  { %v57_v4 = vpop.xlane.xlu0 %56 }
  0xc8   :  { %v63_v5 = vmul.f32 0.015625, %v57_v4 }
  0xca   :  { %v65_v6 = vsub.f32 %v52_v0, %v63_v5 }
  0xcb   :  { %v61_v7 = vpop.xlane.xlu0 %60 }
  0xcc   :  { %v64_v8 = vmul.f32 0.015625, %v61_v7  ;;  %v67_v9 = vmul.f32 %v65_v6, %v65_v6 }
  0xce   :  { %v66_v10 = vsub.f32 %v53_v1, %v64_v8  ;;  %v69_v11 = vsel %vm54_vm0, %v67_v9, 0.0 }
  0xcf   :  { %70 = vadd.xlane.f32.xlu1 %v69_v11 }
  0xd0   :  { %v68_v12 = vmul.f32 %v66_v10, %v66_v10 }
  0xd2   :  { %v72_v13 = vsel %vm58_vm1, %v68_v12, 0.0 }
  0xd3   :  { %73 = vadd.xlane.f32.xlu1 %v72_v13 }
 0x15c   :  { %v71_v14 = vpop.xlane.xlu1 %70 }
 0x15d   :  { %v75_v15 = vmul.f32 0.015625, %v71_v14 }
 0x15f   :  { %v77_v16 = vadd.f32 1e-05, %v75_v15 }
 0x160   :  { %v74_v17 = vpop.xlane.xlu1 %73 }
 0x161   :  { %129 = vrsqrt.f32 %v77_v16  ;;  %v76_v18 = vmul.f32 0.015625, %v74_v17 }
 0x163   :  { %v78_v19 = vadd.f32 1e-05, %v76_v18 }
 0x165   :  { %131 = vrsqrt.f32 %v78_v19 }
 0x16b   :  { %v130_v20 = vpop.eup %129 }
 0x16c   :  { %v81_v22 = vmul.f32 %v130_v20, %v65_v6 }
 0x16e   :  { %v90_v24 = vmul.f32 %v121_v21, %v81_v22 }
 0x16f   :  { %v132_v25 = vpop.eup %131 }
 0x170   :  { %v82_v26 = vmul.f32 %v132_v25, %v66_v10  ;;  %v99_v27 = vadd.f32 %v122_v23, %v90_v24 }
 0x172   :  { %v91_v28 = vmul.f32 %v121_v21, %v82_v26  ;;  %101 = vst.msk [vmem:[#allocation8] sm:$0xff] %vm54_vm0, %v99_v27 }
 0x174   :  { %v100_v29 = vadd.f32 %v122_v23, %v91_v28 }
 0x176   :  { %102 = vst.msk [vmem:[#allocation8 + $0x8] sm:$0x3] %vm58_vm1, %v100_v29 }
 0x177   :  { %210 = shalt.err (!%p207_p0)
}
 0x178   :  { %s211_s27 = scalar_lea.hbm %s323_s3, 256 }
 0x179   :  { %p212_p1 = scmp.ne.s32.totalorder %s323_s3, %s211_s27  ;;  %p215_p2 = scmp.lt.u32.totalorder %s211_s27, %s323_s3 }
 0x17b   :  { %p217_p3 = pnand %p215_p2, %p212_p1 }
 0x17d   :  { %220 = shalt.err (!%p217_p3)
}
 0x17e   :  { %114 = dma.vmem_to_hbm [thread:$0]  %s109_s23, 256, %s323_s3, [#allocation4], %s229_s1, %s229_s1, %s230_s8  }
 0x17f   :  { %225 = dma.done.wait [#allocation4], 256  }
 0x180   :  { %226 = vsyncadd [#allocation4], 4294967040 }
 0x181   :  { %118 = vsyncpa [#allocation3], 1 }
 0x182   :  { %119 = vsyncpa [#allocation6], 1 }
 0x183   :  { %120 = vsyncpa [#allocation4], 1 }

// kernel: _lambda_.25
= control target key start
LH: loop header
LB: loop body
LE: loop exit
PB: predicated region body
PF: predicated region fallthrough
CT: control target
= control target key end

     0   :  { %7 = vsyncpa [#allocation3], 0  ;;  %s369_s0 = inlined_call_operand.hbm [shape: f32[8,192], index: 0, kind: input, shape index: {}]   ;;  %s370_s1 = inlined_call_operand.hbm [shape: bf16[192,64], index: 1, kind: input, shape index: {}]   ;;  %s371_s2 = inlined_call_operand.hbm [shape: f32[8,64], index: 2, kind: output, shape index: {}]  }
   0x1   :  { %8 = vsyncpa [#allocation6], 0 }
   0x2   :  { %9 = vsyncpa [#allocation4], 0  ;;  %s303_s9 = smov [#allocation2]   ;;  %s304_s11 = smov [#allocation5]  }
   0x3   :  { %s16_s10 = sshll.u32 %s303_s9, 4  ;;  %s25_s12 = sshll.u32 %s304_s11, 4  ;;  %s17_s10 = int_to_ptr.vmem [resolvable:$true] %s16_s10  ;;  %s324_s12 = int_to_ptr.vmem [resolvable:$true] %s25_s12 }
   0x4   :  { %s231_s15 = scalar_lea.hbm %s369_s0, 256 }
   0x5   :  { %p232_p0 = scmp.ne.s32.totalorder %s369_s0, %s231_s15  ;;  %p235_p1 = scmp.lt.u32.totalorder %s231_s15, %s369_s0 }
   0x7   :  { %p237_p2 = pnand %p235_p1, %p232_p0 }
   0x9   :  { %240 = shalt.err (!%p237_p2)
}
   0xa   :  { %s241_s20 = scalar_lea.vmem %s17_s10, 256  ;;  %p246_p4 = scmp.lt.s32.totalorder %s17_s10, %s17_s10 }
   0xb   :  { %p242_p3 = scmp.ne.s32.totalorder %s17_s10, %s241_s20  ;;  %p247_p5 = scmp.lt.s32.totalorder %s241_s20, %s241_s20 }
   0xd   :  { %p248_p6 = por %p247_p5, %p246_p4 }
   0xf   :  { %p249_p7 = pnand %p248_p6, %p242_p3 }
  0x11   :  { %252 = shalt.err (!%p249_p7)
}
  0x12   :  { %19 = dma.hbm_to_vmem [thread:$0]  %s369_s0, 256, %s17_s10, [#allocation3]  }
  0x13   :  { %s253_s25 = scalar_lea.hbm %s370_s1, 1536 }
  0x14   :  { %p254_p8 = scmp.ne.s32.totalorder %s370_s1, %s253_s25  ;;  %p257_p9 = scmp.lt.u32.totalorder %s253_s25, %s370_s1 }
  0x16   :  { %p259_p10 = pnand %p257_p9, %p254_p8 }
  0x18   :  { %262 = shalt.err (!%p259_p10)
}
  0x19   :  { %s263_s30 = scalar_lea.vmem %s324_s12, 1536  ;;  %p268_p12 = scmp.lt.s32.totalorder %s324_s12, %s324_s12 }
  0x1a   :  { %p264_p11 = scmp.ne.s32.totalorder %s324_s12, %s263_s30  ;;  %p269_p13 = scmp.lt.s32.totalorder %s263_s30, %s263_s30 }
  0x1c   :  { %p270_p0 = por %p269_p13, %p268_p12 }
  0x1e   :  { %p271_p1 = pnand %p270_p0, %p264_p11 }
  0x20   :  { %274 = shalt.err (!%p271_p1)
}
  0x21   :  { %s305_s0 = smov 64   ;;  %s306_s3 = smov 4  }
  0x22   :  { %31 = dma.hbm_to_vmem [thread:$0]  %s370_s1, 1536, %s324_s12, [#allocation6], %s305_s0, %s305_s0, %s306_s3  }
  0x23   :  { %297 = dma.done.wait [#allocation3], 256  }
  0x24   :  { %298 = vsyncadd [#allocation3], 4294967040 }
  0x25   :  { %299 = dma.done.wait [#allocation6], 1536  }
  0x26   :  { %300 = vsyncadd [#allocation6], 4294965760  ;;  %v307_v0 = vmov 0   ;;  %v219_v1 = vld [vmem:[#allocation5] sm:$0xff]   ;;  %v220_v2 = vld [vmem:[#allocation5 + $0x8] sm:$0xff]   ;;  %vm139_vm0 = vcmask 523264  }
  0x27   :  { %143 = vmatprep.subr.bf16.mxu0 %v307_v0  ;;  %v221_v3 = vld [vmem:[#allocation5 + $0x10] sm:$0xff]   ;;  %v222_v4 = vld [vmem:[#allocation5 + $0x18] sm:$0xff]   ;;  %v223_v7 = vld [vmem:[#allocation5 + $0x20] sm:$0xff]   ;;  %s308_s1 = smov [#allocation7]  }
  0x28   :  { %144 = vmatpush1.bf16.msra.mxu0 %v219_v1  ;;  %v40_v5 = vld [vmem:[#allocation2 + $0x8] sm:$0xff]  ;;  %v224_v8 = vld [vmem:[#allocation5 + $0x28] sm:$0xff]   ;;  %v225_v9 = vld [vmem:[#allocation5 + $0x30] sm:$0xff]   ;;  %s190_s6 = sshll.u32 %s308_s1, 4  ;;  %s191_s6 = int_to_ptr.vmem [resolvable:$true] %s190_s6 }
  0x29   :  { %145 = vmatprep.subr.bf16.mxu0 %v307_v0  ;;  %v42_v6 = vpack.c.bf16 %v40_v5, %v40_v5  ;;  %v226_v10 = vld [vmem:[#allocation5 + $0x38] sm:$0xff]   ;;  %v227_v11 = vld [vmem:[#allocation5 + $0x40] sm:$0xff]   ;;  %v228_v12 = vld [vmem:[#allocation5 + $0x48] sm:$0xff]   ;;  %s275_s7 = scalar_lea.vmem %s191_s6, 128  ;;  %p280_p3 = scmp.lt.s32.totalorder %s191_s6, %s191_s6 }
  0x2a   :  { %v229_v13 = vld [vmem:[#allocation5 + $0x50] sm:$0xff]   ;;  %v230_v14 = vld [vmem:[#allocation5 + $0x58] sm:$0xff]   ;;  %p276_p2 = scmp.ne.s32.totalorder %s191_s6, %s275_s7  ;;  %p281_p4 = scmp.lt.s32.totalorder %s275_s7, %s275_s7 }
  0x2b   :  { %212 = vmatprep.mubr.msk.bf16.mxu0 %vm139_vm0, %v42_v6  ;;  %v39_v15 = vld [vmem:[#allocation2] sm:$0xff] }
  0x2c   :  { %146 = vmatpush1.bf16.msra.mxu0 %v220_v2  ;;  %v41_v16 = vpack.c.bf16 %v39_v15, %v39_v15  ;;  %p282_p5 = por %p281_p4, %p280_p3 }
  0x2d   :  { %147 = vmatprep.subr.bf16.mxu0 %v307_v0 }
  0x2e   :  { %p283_p6 = pnand %p282_p5, %p276_p2 }
  0x30   :  { %148 = vmatpush1.bf16.msra.mxu0 %v221_v3 }
  0x31   :  { %149 = vmatprep.subr.bf16.mxu0 %v307_v0 }
  0x34   :  { %150 = vmatpush1.bf16.msra.mxu0 %v222_v4 }
  0x35   :  { %151 = vmatprep.subr.bf16.mxu0 %v307_v0 }
  0x38   :  { %152 = vmatpush1.bf16.msra.mxu0 %v223_v7 }
  0x39   :  { %153 = vmatprep.subr.bf16.mxu0 %v307_v0 }
  0x3c   :  { %154 = vmatpush1.bf16.msra.mxu0 %v224_v8 }
  0x3d   :  { %155 = vmatprep.subr.bf16.mxu0 %v307_v0 }
  0x40   :  { %156 = vmatpush1.bf16.msra.mxu0 %v225_v9 }
  0x41   :  { %157 = vmatprep.subr.bf16.mxu0 %v307_v0 }
  0x44   :  { %158 = vmatpush1.bf16.msra.mxu0 %v226_v10 }
  0x45   :  { %159 = vmatprep.subr.bf16.mxu0 %v307_v0 }
  0x48   :  { %160 = vmatpush1.bf16.msra.mxu0 %v227_v11 }
  0x49   :  { %161 = vmatprep.subr.bf16.mxu0 %v307_v0 }
  0x4c   :  { %162 = vmatpush1.bf16.msra.mxu0 %v228_v12 }
  0x4d   :  { %163 = vmatprep.subr.bf16.mxu0 %v307_v0 }
  0x50   :  { %164 = vmatpush1.bf16.msra.mxu0 %v229_v13 }
  0x51   :  { %165 = vmatprep.subr.bf16.mxu0 %v307_v0 }
  0x54   :  { %166 = vmatpush1.bf16.msra.mxu0 %v230_v14 }
  0x57   :  { %176 = vmatmul.mubr.bf16.vlgmr.msra.gmra.mrb[0].mxu0 %v41_v16 }
 0x12a   :  { %v177_v17 = vpop.f32.mrb[0].mxu0 }
 0x12b   :  { %183 = vst.msk [vmem:[#allocation7] sm:$0xff] %vm139_vm0, %v177_v17  ;;  %v179_v18 = vpop.f32.mrb[1].mxu0 }
 0x12c   :  { %v180_v19 = vpop.f32.mrb[2].mxu0 }
 0x12d   :  { %286 = shalt.err (!%p283_p6)
}
 0x12e   :  { %s287_s10 = scalar_lea.hbm %s371_s2, 128 }
 0x12f   :  { %p288_p7 = scmp.ne.s32.totalorder %s371_s2, %s287_s10  ;;  %p291_p8 = scmp.lt.u32.totalorder %s287_s10, %s371_s2 }
 0x131   :  { %p293_p9 = pnand %p291_p8, %p288_p7 }
 0x133   :  { %296 = shalt.err (!%p293_p9)
}
 0x134   :  { %193 = dma.vmem_to_hbm [thread:$0]  %s191_s6, 128, %s371_s2, [#allocation4]   ;;  %v181_v20 = vpop.f32.mrb[3].mxu0 }
 0x135   :  { %301 = dma.done.wait [#allocation4], 128  }
 0x136   :  { %302 = vsyncadd [#allocation4], 4294967168 }
 0x137   :  { %197 = vsyncpa [#allocation3], 1 }
 0x138   :  { %198 = vsyncpa [#allocation6], 1 }
 0x139   :  { %199 = vsyncpa [#allocation4], 1 }

// kernel: _lambda_.27
= control target key start
LH: loop header
LB: loop body
LE: loop exit
PB: predicated region body
PF: predicated region fallthrough
CT: control target
= control target key end

     0   :  { %10 = vsyncpa [#allocation3], 0  ;;  %s590_s0 = inlined_call_operand.hbm [shape: f32[10,64], index: 0, kind: input, shape index: {}]   ;;  %s591_s1 = inlined_call_operand.hbm [shape: bf16[64,192], index: 1, kind: input, shape index: {}]   ;;  %s592_s2 = inlined_call_operand.hbm [shape: f32[1,64], index: 2, kind: input, shape index: {}]   ;;  %s593_s3 = inlined_call_operand.hbm [shape: f32[1,64], index: 3, kind: input, shape index: {}]   ;;  %s594_s4 = inlined_call_operand.hbm [shape: f32[1,192], index: 4, kind: input, shape index: {}]   ;;  %s595_s5 = inlined_call_operand.hbm [shape: bf16[10,192], index: 5, kind: output, shape index: {}]  }
   0x1   :  { %11 = vsyncpa [#allocation6], 0 }
   0x2   :  { %12 = vsyncpa [#allocation9], 0 }
   0x3   :  { %13 = vsyncpa [#allocation4], 0  ;;  %s459_s18 = smov [#allocation5]   ;;  %s460_s20 = smov [#allocation8]  }
   0x4   :  { %s31_s19 = sshll.u32 %s459_s18, 4  ;;  %s54_s21 = sshll.u32 %s460_s20, 4  ;;  %s32_s19 = int_to_ptr.vmem [resolvable:$true] %s31_s19  ;;  %s498_s21 = int_to_ptr.vmem [resolvable:$true] %s54_s21 }
   0x5   :  { %s319_s24 = scalar_lea.hbm %s591_s1, 1024 }
   0x6   :  { %p320_p0 = scmp.ne.s32.totalorder %s591_s1, %s319_s24  ;;  %p323_p1 = scmp.lt.u32.totalorder %s319_s24, %s591_s1 }
   0x8   :  { %p325_p2 = pnand %p323_p1, %p320_p0 }
   0xa   :  { %328 = shalt.err (!%p325_p2)
}
   0xb   :  { %s329_s29 = scalar_lea.vmem %s32_s19, 1024  ;;  %p334_p4 = scmp.lt.s32.totalorder %s32_s19, %s32_s19 }
   0xc   :  { %p330_p3 = scmp.ne.s32.totalorder %s32_s19, %s329_s29  ;;  %p335_p5 = scmp.lt.s32.totalorder %s329_s29, %s329_s29 }
   0xe   :  { %p336_p6 = por %p335_p5, %p334_p4 }
  0x10   :  { %p337_p7 = pnand %p336_p6, %p330_p3 }
  0x12   :  { %340 = shalt.err (!%p337_p7)
}
  0x13   :  { %s461_s30 = smov 128   ;;  %s462_s6 = smov 8  }
  0x14   :  { %37 = dma.hbm_to_vmem [thread:$0]  %s591_s1, 1024, %s32_s19, [#allocation6], %s461_s30, %s461_s30, %s462_s6  }
  0x15   :  { %s341_s11 = scalar_lea.hbm %s593_s3, 16 }
  0x16   :  { %p342_p8 = scmp.ne.s32.totalorder %s593_s3, %s341_s11  ;;  %p345_p9 = scmp.lt.u32.totalorder %s341_s11, %s593_s3 }
  0x18   :  { %p347_p10 = pnand %p345_p9, %p342_p8 }
  0x1a   :  { %350 = shalt.err (!%p347_p10)
}
  0x1b   :  { %s351_s16 = scalar_lea.vmem %s498_s21, 16  ;;  %s355_s1 = scalar_lea.vmem %s498_s21, 32 }
  0x1c   :  { %p352_p11 = scmp.ne.s32.totalorder %s498_s21, %s351_s16  ;;  %p356_p12 = scmp.lt.s32.totalorder %s498_s21, %s498_s21 }
  0x1d   :  { %p357_p13 = scmp.lt.s32.totalorder %s355_s1, %s351_s16 }
  0x1f   :  { %p358_p0 = por %p357_p13, %p356_p12 }
  0x21   :  { %p359_p1 = pnand %p358_p0, %p352_p11 }
  0x23   :  { %362 = shalt.err (!%p359_p1)
}
  0x24   :  { %57 = dma.hbm_to_vmem [thread:$0]  %s593_s3, 16, %s498_s21, [#allocation9]  }
  0x25   :  { %s463_s19 = smov [#allocation2]   ;;  %s464_s22 = smov [#allocation7]  }
  0x26   :  { %s19_s20 = sshll.u32 %s463_s19, 4  ;;  %s44_s23 = sshll.u32 %s464_s22, 4  ;;  %s20_s20 = int_to_ptr.vmem [resolvable:$true] %s19_s20  ;;  %s45_s23 = int_to_ptr.vmem [resolvable:$true] %s44_s23 }
  0x27   :  { %s363_s26 = scalar_lea.hbm %s590_s0, 256 }
  0x28   :  { %p364_p2 = scmp.ne.s32.totalorder %s590_s0, %s363_s26  ;;  %p367_p3 = scmp.lt.u32.totalorder %s363_s26, %s590_s0 }
  0x2a   :  { %p369_p4 = pnand %p367_p3, %p364_p2 }
  0x2c   :  { %372 = shalt.err (!%p369_p4)
}
  0x2d   :  { %s373_s3 = scalar_lea.vmem %s20_s20, 256  ;;  %p378_p6 = scmp.lt.s32.totalorder %s20_s20, %s20_s20 }
  0x2e   :  { %p374_p5 = scmp.ne.s32.totalorder %s20_s20, %s373_s3  ;;  %p379_p7 = scmp.lt.s32.totalorder %s373_s3, %s373_s3 }
  0x30   :  { %p380_p8 = por %p379_p7, %p378_p6 }
  0x32   :  { %p381_p9 = pnand %p380_p8, %p374_p5 }
  0x34   :  { %384 = shalt.err (!%p381_p9)
}
  0x35   :  { %25 = dma.hbm_to_vmem [thread:$0]  %s590_s0, 256, %s20_s20, [#allocation3], %s461_s30, %s461_s30, %s462_s6  }
  0x36   :  { %s385_s11 = scalar_lea.hbm %s592_s2, 16 }
  0x37   :  { %p386_p10 = scmp.ne.s32.totalorder %s592_s2, %s385_s11  ;;  %p389_p11 = scmp.lt.u32.totalorder %s385_s11, %s592_s2 }
  0x39   :  { %p391_p12 = pnand %p389_p11, %p386_p10 }
  0x3b   :  { %394 = shalt.err (!%p391_p12)
}
  0x3c   :  { %s395_s16 = scalar_lea.vmem %s45_s23, 16  ;;  %s399_s1 = scalar_lea.vmem %s45_s23, 32 }
  0x3d   :  { %p396_p13 = scmp.ne.s32.totalorder %s45_s23, %s395_s16  ;;  %p400_p0 = scmp.lt.s32.totalorder %s45_s23, %s45_s23 }
  0x3e   :  { %p401_p1 = scmp.lt.s32.totalorder %s399_s1, %s395_s16 }
  0x40   :  { %p402_p2 = por %p401_p1, %p400_p0 }
  0x42   :  { %p403_p3 = pnand %p402_p2, %p396_p13 }
  0x44   :  { %406 = shalt.err (!%p403_p3)
}
  0x45   :  { %47 = dma.hbm_to_vmem [thread:$0]  %s592_s2, 16, %s45_s23, [#allocation6]  }
  0x46   :  { %s465_s18 = smov [#allocation10]   ;;  %s407_s24 = scalar_lea.hbm %s594_s4, 32 }
  0x47   :  { %s64_s19 = sshll.u32 %s465_s18, 4  ;;  %p408_p4 = scmp.ne.s32.totalorder %s594_s4, %s407_s24  ;;  %s65_s19 = int_to_ptr.vmem [resolvable:$true] %s64_s19 }
  0x48   :  { %p411_p5 = scmp.lt.u32.totalorder %s407_s24, %s594_s4 }
  0x4a   :  { %p413_p6 = pnand %p411_p5, %p408_p4 }
  0x4c   :  { %416 = shalt.err (!%p413_p6)
}
  0x4d   :  { %s417_s29 = scalar_lea.vmem %s65_s19, 32  ;;  %p422_p8 = scmp.lt.s32.totalorder %s65_s19, %s65_s19 }
  0x4e   :  { %p418_p7 = scmp.ne.s32.totalorder %s65_s19, %s417_s29  ;;  %p423_p9 = scmp.lt.s32.totalorder %s417_s29, %s417_s29 }
  0x50   :  { %p424_p10 = por %p423_p9, %p422_p8 }
  0x52   :  { %p425_p11 = pnand %p424_p10, %p418_p7 }
  0x54   :  { %428 = shalt.err (!%p425_p11)
}
  0x55   :  { %67 = dma.hbm_to_vmem [thread:$0]  %s594_s4, 32, %s65_s19, [#allocation9]  }
  0x56   :  { %451 = dma.done.wait [#allocation3], 256  }
  0x57   :  { %452 = vsyncadd [#allocation3], 4294967040 }
  0x58   :  { %453 = dma.done.wait [#allocation6], 1040  }
  0x59   :  { %454 = vsyncadd [#allocation6], 4294966256 }
  0x5a   :  { %455 = dma.done.wait [#allocation9], 48  }
  0x5b   :  { %456 = vsyncadd [#allocation9], 4294967248  ;;  %vm86_vm0 = vcmask 523264   ;;  %v84_v0 = vld [vmem:[#allocation2] sm:$0xff]  ;;  %v85_v1 = vld [vmem:[#allocation2 + $0x8] sm:$0x3]  ;;  %v144_v40 = vlaneseq }
  0x5c   :  { %vm90_vm1 = vcmask 517120   ;;  %v87_v2 = vsel %vm86_vm0, %v84_v0, 0.0  ;;  %v303_v14 = vld [vmem:[#allocation5 + $0x4] ss:$8 sps:$4 sm:$0xff]   ;;  %v305_v15 = vld [vmem:[#allocation5] ss:$8 sps:$4 sm:$0xff]  }
  0x5d   :  { %88 = vadd.xlane.f32.xlu0 %v87_v2  ;;  %v91_v3 = vsel %vm90_vm1, %v85_v1, 0.0  ;;  %197 = vmatprep.subr.bf16.mxu0 %v303_v14  ;;  %v306_v16 = vld [vmem:[#allocation5 + $0x14] ss:$8 sps:$4 sm:$0xff]   ;;  %v308_v17 = vld [vmem:[#allocation5 + $0x10] ss:$8 sps:$4 sm:$0xff]   ;;  %v466_v22 = vmov 0  }
  0x5e   :  { %198 = vmatpush1.bf16.msra.mxu0 %v305_v15  ;;  %v309_v18 = vld [vmem:[#allocation5 + $0x24] ss:$8 sps:$4 sm:$0xff]   ;;  %v311_v19 = vld [vmem:[#allocation5 + $0x20] ss:$8 sps:$4 sm:$0xff]   ;;  %v312_v20 = vld [vmem:[#allocation5 + $0x34] ss:$8 sps:$4 sm:$0xff]   ;;  %229 = vmatprep.mubr.bf16.mxu0 %v466_v22 }
  0x5f   :  { %199 = vmatprep.subr.bf16.mxu0 %v306_v16  ;;  %v314_v21 = vld [vmem:[#allocation5 + $0x30] ss:$8 sps:$4 sm:$0xff]   ;;  %v279_v31 = vld [vmem:[#allocation7] ss:$0 sm:$0xff]  ;;  %v280_v35 = vld [vmem:[#allocation8] ss:$0 sm:$0xff] }
  0x60   :  { %v145_v41 = vshrl.u32 %v144_v40, 7  ;;  %v142_v43 = vld [vmem:[#allocation10] sm:$0x3]  ;;  %vm252_vm2 = vcmask 1043456   ;;  %vm253_vm3 = vcmask 523268   ;;  %vm256_vm4 = vcmask 1040384  }
  0x61   :  { %92 = vadd.xlane.f32.xlu0 %v91_v3  ;;  %vm257_vm5 = vcmask 520196   ;;  %vm254_vm6 = vmor %vm253_vm3, %vm252_vm2  ;;  %s467_s4 = smov [#allocation11]  }
  0x62   :  { %200 = vmatpush1.bf16.msra.mxu0 %v308_v17  ;;  %v146_v42 = vsub.s32 0, %v145_v41  ;;  %v150_v44 = vsub.s32 1, %v145_v41  ;;  %s265_s7 = sshll.u32 %s467_s4, 4  ;;  %vm258_vm7 = vmor %vm257_vm5, %vm256_vm4  ;;  %s266_s7 = int_to_ptr.vmem [resolvable:$true] %s265_s7 }
  0x63   :  { %201 = vmatprep.subr.bf16.mxu0 %v309_v18  ;;  %s429_s3 = scalar_lea.vmem %s266_s7, 256  ;;  %p434_p13 = scmp.lt.s32.totalorder %s266_s7, %s266_s7 }
  0x64   :  { %v147_v45 = vrot.slane %v142_v43, %v146_v42  ;;  %v151_v46 = vrot.slane %v142_v43, %v150_v44  ;;  %p430_p12 = scmp.ne.s32.totalorder %s266_s7, %s429_s3  ;;  %p435_p0 = scmp.lt.s32.totalorder %s429_s3, %s429_s3 }
  0x66   :  { %202 = vmatpush1.bf16.msra.mxu0 %v311_v19  ;;  %p436_p1 = por %p435_p0, %p434_p13 }
  0x67   :  { %203 = vmatprep.subr.bf16.mxu0 %v312_v20 }
  0x68   :  { %p437_p2 = pnand %p436_p1, %p430_p12 }
  0x6a   :  { %204 = vmatpush1.bf16.msra.mxu0 %v314_v21 }
  0xea   :  { %v89_v4 = vpop.xlane.xlu0 %88 }
  0xeb   :  { %v95_v5 = vmul.f32 0.015625, %v89_v4 }
  0xed   :  { %v97_v6 = vsub.f32 %v84_v0, %v95_v5 }
  0xee   :  { %v93_v7 = vpop.xlane.xlu0 %92 }
  0xef   :  { %v96_v8 = vmul.f32 0.015625, %v93_v7  ;;  %v99_v9 = vmul.f32 %v97_v6, %v97_v6 }
  0xf1   :  { %v98_v10 = vsub.f32 %v85_v1, %v96_v8  ;;  %v101_v11 = vsel %vm86_vm0, %v99_v9, 0.0 }
  0xf2   :  { %102 = vadd.xlane.f32.xlu1 %v101_v11 }
  0xf3   :  { %v100_v12 = vmul.f32 %v98_v10, %v98_v10 }
  0xf5   :  { %v104_v13 = vsel %vm90_vm1, %v100_v12, 0.0 }
  0xf6   :  { %105 = vadd.xlane.f32.xlu1 %v104_v13 }
 0x17f   :  { %v103_v23 = vpop.xlane.xlu1 %102 }
 0x180   :  { %v107_v24 = vmul.f32 0.015625, %v103_v23 }
 0x182   :  { %v109_v25 = vadd.f32 1e-05, %v107_v24 }
 0x183   :  { %v106_v26 = vpop.xlane.xlu1 %105 }
 0x184   :  { %315 = vrsqrt.f32 %v109_v25  ;;  %v108_v27 = vmul.f32 0.015625, %v106_v26 }
 0x186   :  { %v110_v28 = vadd.f32 1e-05, %v108_v27 }
 0x188   :  { %317 = vrsqrt.f32 %v110_v28 }
 0x18e   :  { %v316_v29 = vpop.eup %315 }
 0x18f   :  { %v113_v30 = vmul.f32 %v316_v29, %v97_v6 }
 0x191   :  { %v122_v34 = vmul.f32 %v279_v31, %v113_v30 }
 0x192   :  { %v318_v32 = vpop.eup %317 }
 0x193   :  { %v114_v33 = vmul.f32 %v318_v32, %v98_v10  ;;  %v131_v37 = vadd.f32 %v280_v35, %v122_v34 }
 0x195   :  { %v123_v36 = vmul.f32 %v279_v31, %v114_v33 }
 0x197   :  { %v132_v38 = vadd.f32 %v280_v35, %v123_v36 }
 0x199   :  { %v133_v39 = vpack.c.bf16 %v132_v38, %v131_v37 }
 0x19b   :  { %289 = vmatmul.mubr.msk.bf16.vlgmr.msra.gmra.mrb[0].mxu0 %vm86_vm0, %v133_v39 }
 0x26e   :  { %v231_v47 = vpop.f32.mrb[0].mxu0 }
 0x26f   :  { %v232_v48 = vadd.f32 %v231_v47, %v147_v45  ;;  %v233_v49 = vpop.f32.mrb[1].mxu0 }
 0x270   :  { %v234_v50 = vadd.f32 %v233_v49, %v151_v46  ;;  %v235_v51 = vpop.f32.mrb[2].mxu0 }
 0x271   :  { %v236_v52 = vadd.f32 %v235_v51, %v147_v45  ;;  %v237_v53 = vpop.f32.mrb[3].mxu0 }
 0x272   :  { %v292_v54 = vpack.c.bf16 %v234_v50, %v232_v48  ;;  %v238_v55 = vadd.f32 %v237_v53, %v151_v46 }
 0x274   :  { %v293_v56 = vpack.c.bf16 %v238_v55, %v236_v52  ;;  %255 = vst.msk [vmem:[#allocation11] sm:$0xff] %vm254_vm6, %v292_v54 }
 0x276   :  { %259 = vst.msk [vmem:[#allocation11 + $0x8] sm:$0x11] %vm258_vm7, %v293_v56 }
 0x277   :  { %440 = shalt.err (!%p437_p2)
}
 0x278   :  { %s441_s9 = scalar_lea.hbm %s595_s5, 256 }
 0x279   :  { %p442_p3 = scmp.ne.s32.totalorder %s595_s5, %s441_s9  ;;  %p445_p4 = scmp.lt.u32.totalorder %s441_s9, %s595_s5 }
 0x27b   :  { %p447_p5 = pnand %p445_p4, %p442_p3 }
 0x27d   :  { %450 = shalt.err (!%p447_p5)
}
 0x27e   :  { %271 = dma.vmem_to_hbm [thread:$0]  %s266_s7, 256, %s595_s5, [#allocation4], %s461_s30, %s461_s30, %s462_s6  }
 0x27f   :  { %457 = dma.done.wait [#allocation4], 256  }
 0x280   :  { %458 = vsyncadd [#allocation4], 4294967040 }
 0x281   :  { %275 = vsyncpa [#allocation3], 1 }
 0x282   :  { %276 = vsyncpa [#allocation6], 1 }
 0x283   :  { %277 = vsyncpa [#allocation9], 1 }
 0x284   :  { %278 = vsyncpa [#allocation4], 1 }

// kernel: _lambda_.28
= control target key start
LH: loop header
LB: loop body
LE: loop exit
PB: predicated region body
PF: predicated region fallthrough
CT: control target
= control target key end

     0   :  { %s1198_s0 = inlined_call_operand.hbm [shape: bf16[2,5,64], index: 0, kind: input, shape index: {}]   ;;  %s1199_s1 = inlined_call_operand.hbm [shape: bf16[2,5,64], index: 1, kind: input, shape index: {}]   ;;  %s1200_s2 = inlined_call_operand.hbm [shape: bf16[2,5,64], index: 2, kind: input, shape index: {}]   ;;  %s1201_s3 = inlined_call_operand.hbm [shape: bf16[2,5,64], index: 3, kind: output, shape index: {}]  }
   0x1   :  { %1207 = sst [smem:[#allocation18_spill]] %s1199_s1 }
   0x2   :  { %8 = vsyncpa [#allocation6], 0 }
   0x3   :  { %10 = vsyncpa [#allocation6 + $0x1], 0 }
   0x4   :  { %11 = vsyncpa [#allocation9], 0 }
   0x5   :  { %13 = vsyncpa [#allocation9 + $0x1], 0 }
   0x6   :  { %14 = vsyncpa [#allocation7], 0 }
   0x7   :  { %16 = vsyncpa [#allocation7 + $0x1], 0  ;;  %s926_s12 = smov 0   ;;  %s928_s13 = smov 0  }
   0x8   :  { %s930_s14 = smov 0   ;;  %s932_s15 = smov 0  }
   0x9   :  { %s934_s16 = smov 0   ;;  %s936_s17 = smov 0  }
   0xa LB: > { %1208 = sst [smem:[#allocation15_spill]] %s891_s16  ;;  %s957_s18 = sadd.s32 4294967295, %s895_s17   ;;  %s895_s17 = sphi %s936_s17, %s22_s17   ;;  %s891_s16 = sphi %s934_s16, %s1229_s16   ;;  %s887_s15 = sphi %s932_s15, %s1228_s15   ;;  %s883_s14 = sphi %s930_s14, %s1232_s14   ;;  %s879_s13 = sphi %s928_s13, %s1231_s13   ;;  %s875_s12 = sphi %s926_s12, %s1230_s12  }
   0xb   : > { %s598_s19 = sadd.s32 4294967294, %s895_s17   ;;  %s41_s20 = sadd.s32 1, %s891_s16 }
   0xc   : > { %s50_s21 = sadd.s32 1, %s883_s14  ;;  %p43_p0 = scmp.ge.s32.totalorder %s41_s20, 2 }
   0xd   : > { %p57_p1 = scmp.ne.s32.totalorder %s883_s14, %s879_s13  ;;  %p58_p2 = scmp.eq.s32.totalorder %s895_s17, 0 }
   0xe   : > { %p63_p3 = scmp.ne.s32.totalorder %s879_s13, %s875_s12  ;;  %s1234_s20 = smov (%p43_p0, %s41_s20), 0 }
   0xf   : > { %1209 = sst [smem:[#allocation16_spill]] %s1234_s20  ;;  %p969_p4 = por %p58_p2, %p57_p1 }
  0x10   : > { %p64_p5 = scmp.eq.s32.totalorder %s957_s18, 0  ;;  %s45_s23 = ssub.s32 %s891_s16, %s1234_s20 }
  0x11   : > { %p145_p6 = scmp.eq.s32.totalorder %s957_s18, 1  ;;  %p48_p7 = scmp.eq.s32.totalorder %s45_s23, 0 }
  0x12   : > { %p977_p8 = por %p64_p5, %p63_p3  ;;  %p151_p10 = scmp.eq.s32.totalorder %s598_s19, 1 }
  0x13   : > { %p981_p9 = por %p145_p6, %p57_p1  ;;  %p656_p13 = scmp.lt.s32.totalorder %s895_s17, 2 }
  0x14   : > { %s1211_s24 = scalar_select %p977_p8, 1, 0 }
  0x15   : > { %s1212_s25 = scalar_select %p981_p9, 1, 0 }
  0x16   : > { %s986_s26 = scalar_select %p48_p7, %s883_s14, %s50_s21  }
  0x17   : > { %p988_p11 = por %p151_p10, %p63_p3  ;;  %s171_s28 = sand.u32 1, %s883_s14  }
  0x18   : > { %1213 = sst [smem:[#allocation17_spill]] %s986_s26  ;;  %s997_s29 = sshll.u32 %s171_s28, 2 }
  0x19   : > { %s1214_s27 = scalar_select %p988_p11, 1, 0 }
  0x1a   : > { %s1000_s30 = sshll.u32 %s891_s16, 6  ;;  %p1004_p0 = pnand %p656_p13, %p969_p4 }
  0x1b   : > { %s190_s5 = sand.u32 1, %s895_s17   ;;  %s1216_s1 = sld [smem:[#allocation18_spill]] }
  0x1c   : > { %s1215_s4 = scalar_select %p1004_p0, 1, 0 }
  0x1d   : > { %s194_s9 = scalar_lea.vmem [#allocation8], %s997_s29  ;;  %s1020_s11 = scalar_lea.sflag [#allocation9], %s190_s5 }
  0x1e   : > { %s202_s10 = sshll.u32 %s194_s9, 4  ;;  %p1026_p4 = pneg %p1004_p0  ;;  %s1017_s10 = int_to_ptr.vmem [resolvable:$true] %s202_s10 }
  0x21   : > { %s1013_s8 = scalar_lea.hbm %s1216_s1, %s1000_s30  ;;  %s724_s6 = scalar_lea.hbm %s1216_s1, 128 }
  0x22   : > { %s719_s19 = scalar_lea.hbm %s1013_s8, 64  ;;  %p725_p7 = scmp.lt.u32.totalorder %s1013_s8, %s1216_s1 }
  0x23   : > { %p720_p3 = scmp.ne.s32.totalorder %s1013_s8, %s719_s19  ;;  %p726_p10 = scmp.lt.u32.totalorder %s724_s6, %s719_s19 }
  0x24   : > { %p728_p12 = scmp.lt.u32.totalorder %s719_s19, %s1013_s8 }
  0x25   : > { %p722_p5 = pnand %p1026_p4, %p720_p3  ;;  %p727_p13 = por %p726_p10, %p725_p7 }
  0x27   : > { %p723_p6 = pneg %p722_p5  ;;  %p729_p1 = por %p728_p12, %p727_p13 }
  0x29   : > { %p730_p2 = pnand %p729_p1, %p723_p6 }
  0x2b   : > { %733 = shalt.err (!%p730_p2)
}
  0x2c   : > { %s734_s5 = scalar_lea.vmem %s1017_s10, 64  ;;  %s897_s22 = smov [#allocation8]  }
  0x2d   : > { %p735_p3 = scmp.ne.s32.totalorder %s1017_s10, %s734_s5  ;;  %s739_s23 = sshll.u32 %s897_s22, 4  ;;  %s740_s23 = int_to_ptr.vmem [resolvable:$false] %s739_s23 }
  0x2e   : > { %s741_s7 = scalar_lea.vmem %s740_s23, 128  ;;  %p742_p9 = scmp.lt.s32.totalorder %s1017_s10, %s740_s23 }
  0x2f   : > { %p737_p5 = pnand %p735_p3, %p1026_p4  ;;  %p743_p8 = scmp.lt.s32.totalorder %s741_s7, %s734_s5 }
  0x31   : > { %p738_p11 = pneg %p737_p5  ;;  %p744_p7 = por %p743_p8, %p742_p9 }
  0x33   : > { %p745_p10 = pnand %p744_p7, %p738_p11 }
  0x35   : > { %748 = shalt.err (!%p745_p10)
}
  0x36   : > { %648 = dma.hbm_to_vmem [thread:$0]  (!%p1004_p0), %s1013_s8, 64, %s1017_s10, %s1020_s11  }
  0x37   : > { %p1218_p12 = scmp.lt.s32.totalorder %s895_s17, 3  ;;  %p1219_p1 = scmp.ge.s32.totalorder %s895_s17, 1 }
  0x38   : > { %s1062_s5 = scalar_lea.hbm %s1198_s0, %s1000_s30  ;;  %s175_s22 = scalar_lea.vmem [#allocation5], %s997_s29 }
  0x39   : > { %p1054_p2 = pnand %p1219_p1, %p1218_p12  ;;  %s183_s23 = sshll.u32 %s175_s22, 4  ;;  %s1065_s23 = int_to_ptr.vmem [resolvable:$true] %s183_s23 }
  0x3a   : > { %s1071_s7 = scalar_lea.hbm %s1200_s2, %s1000_s30  ;;  %s172_s1 = scalar_lea.sflag [#allocation6], %s171_s28 }
  0x3b   : > { %s1220_s19 = scalar_select %p1054_p2, 1, 0 }
  0x3c   : > { %s749_s20 = scalar_lea.hbm %s1062_s5, 64  ;;  %s754_s16 = scalar_lea.hbm %s1198_s0, 128 }
  0x3d   : > { %p750_p8 = scmp.ne.s32.totalorder %s1062_s5, %s749_s20  ;;  %p755_p6 = scmp.lt.u32.totalorder %s1062_s5, %s1198_s0 }
  0x3e   : > { %p756_p13 = scmp.lt.u32.totalorder %s754_s16, %s749_s20  ;;  %p758_p5 = scmp.lt.u32.totalorder %s749_s20, %s1062_s5 }
  0x3f   : > { %p752_p9 = pnand %p750_p8, %p1026_p4 }
  0x40   : > { %p757_p3 = por %p756_p13, %p755_p6 }
  0x41   : > { %p753_p11 = pneg %p752_p9 }
  0x42   : > { %p759_p7 = por %p758_p5, %p757_p3 }
  0x44   : > { %p760_p10 = pnand %p759_p7, %p753_p11 }
  0x46   : > { %763 = shalt.err (!%p760_p10)
}
  0x47   : > { %s764_s28 = scalar_lea.vmem %s1065_s23, 64  ;;  %s898_s30 = smov [#allocation5]  }
  0x48   : > { %p765_p12 = scmp.ne.s32.totalorder %s1065_s23, %s764_s28  ;;  %s769_s8 = sshll.u32 %s898_s30, 4  ;;  %s770_s8 = int_to_ptr.vmem [resolvable:$false] %s769_s8 }
  0x49   : > { %s771_s26 = scalar_lea.vmem %s770_s8, 128  ;;  %p772_p9 = scmp.lt.s32.totalorder %s1065_s23, %s770_s8 }
  0x4a   : > { %p767_p1 = pnand %p765_p12, %p1026_p4  ;;  %p773_p2 = scmp.lt.s32.totalorder %s771_s26, %s764_s28 }
  0x4c   : > { %p768_p8 = pneg %p767_p1  ;;  %p774_p6 = por %p773_p2, %p772_p9 }
  0x4e   : > { %p775_p13 = pnand %p774_p6, %p768_p8 }
  0x50   : > { %778 = shalt.err (!%p775_p13)
}
  0x51   : > { %645 = dma.hbm_to_vmem [thread:$0]  (!%p1004_p0), %s1062_s5, 64, %s1065_s23, %s172_s1  }
  0x52   : > { %s213_s16 = scalar_lea.vmem [#allocation10], %s997_s29  ;;  %s779_s10 = scalar_lea.hbm %s1071_s7, 64 }
  0x53   : > { %s221_s20 = sshll.u32 %s213_s16, 4  ;;  %p780_p11 = scmp.ne.s32.totalorder %s1071_s7, %s779_s10  ;;  %s222_s20 = int_to_ptr.vmem [resolvable:$true] %s221_s20 }
  0x54   : > { %s784_s22 = scalar_lea.hbm %s1200_s2, 128  ;;  %p785_p5 = scmp.lt.u32.totalorder %s1071_s7, %s1200_s2 }
  0x55   : > { %p782_p2 = pnand %p780_p11, %p1026_p4  ;;  %p786_p7 = scmp.lt.u32.totalorder %s784_s22, %s779_s10 }
  0x56   : > { %p788_p12 = scmp.lt.u32.totalorder %s779_s10, %s1071_s7 }
  0x57   : > { %p783_p3 = pneg %p782_p2  ;;  %p787_p10 = por %p786_p7, %p785_p5 }
  0x59   : > { %p789_p1 = por %p788_p12, %p787_p10 }
  0x5b   : > { %p790_p8 = pnand %p789_p1, %p783_p3 }
  0x5d   : > { %793 = shalt.err (!%p790_p8)
}
  0x5e   : > { %s794_s1 = scalar_lea.vmem %s222_s20, 64  ;;  %s899_s29 = smov [#allocation10]  }
  0x5f   : > { %p795_p9 = scmp.ne.s32.totalorder %s222_s20, %s794_s1  ;;  %s799_s5 = sshll.u32 %s899_s29, 4  ;;  %s800_s5 = int_to_ptr.vmem [resolvable:$false] %s799_s5 }
  0x60   : > { %s801_s23 = scalar_lea.vmem %s800_s5, 128  ;;  %p802_p11 = scmp.lt.s32.totalorder %s222_s20, %s800_s5 }
  0x61   : > { %p797_p6 = pnand %p795_p9, %p1026_p4  ;;  %p803_p2 = scmp.lt.s32.totalorder %s801_s23, %s794_s1 }
  0x63   : > { %p798_p13 = pneg %p797_p6  ;;  %p804_p0 = por %p803_p2, %p802_p11 }
  0x65   : > { %p805_p5 = pnand %p804_p0, %p798_p13 }
  0x67   : > { %808 = shalt.err (!%p805_p5)
}
  0x68   : > { %p1221_p7 = scmp.ne.s32.totalorder %s1215_s4, 0  ;;  %p1222_p3 = scmp.ne.s32.totalorder %s1220_s19, 0 }
  0x69   : > { %s1118_s21 = sand.u32 (!%p1222_p3), 1, %s879_s13   ;;  %p1223_p0 = scmp.ne.s32.totalorder (!%p1222_p3), %s1211_s24, 0 }
  0x6a   : > { %651 = dma.hbm_to_vmem [thread:$0]  (!%p1221_p7), %s1071_s7, 64, %s222_s20, %s1020_s11  }
  0x6b   : > { %230 = sbr.rel (%p1222_p3) target bundleno = 939 (0x3ab), region = 32  ;;  %s1121_s8 = sshll.u32 (!%p1222_p3), %s1118_s21, 2 }
  0x6c   : > { %s233_s26 = scalar_lea.sflag (!%p1222_p3), [#allocation6], %s1118_s21  ;;  %s236_s16 = scalar_lea.vmem (!%p1222_p3), [#allocation5], %s1121_s8 }
  0x72   : > { %862 = dma.done.wait (%p1223_p0), %s233_s26, 64  }
  0x73   : > { %864 = vsyncadd (%p1223_p0), %s233_s26, 4294967232  ;;  %s241_s4 = sand.u32 1, %s957_s18   ;;  %s245_s19 = scalar_lea.vmem [#allocation8], %s1121_s8 }
  0x74   : > { %s242_s11 = scalar_lea.sflag [#allocation9], %s241_s4 }
  0x75   : > { %866 = dma.done.wait (%p1223_p0), %s242_s11, 128  }
  0x76   : > { %868 = vsyncadd (%p1223_p0), %s242_s11, 4294967168  ;;  %vm295_vm0 = vcmask 520192   ;;  %v900_v0 = vmov 0.0   ;;  %vm901_vm1 = vmmov 0   ;;  %vm300_vm2 = vcmask 523264   ;;  %s254_s18 = scalar_lea.vmem [#allocation10], %s1121_s8 }
  0x77   : > { %296 = vst.msk [vmem:[#allocation4] sm:$0x1f] %vm295_vm0, %v900_v0  ;;  %622 = vmatprep.subr.bf16.mxu0 %v900_v0  ;;  %624 = vmatprep.mubr.msk.bf16.mxu0 %vm901_vm1, %v900_v0  ;;  %v298_v1 = vld [vmem:[%s245_s19] sm:$0x7]  ;;  %v297_v3 = vld [vmem:[%s236_s16] sm:$0x7] }
  0x78   : > { %628 = vmatprep.subr.bf16.mxu1 %v900_v0  ;;  %630 = vmatprep.mubr.msk.bf16.mxu1 %vm901_vm1, %v900_v0  ;;  %v305_v2 = vsel %vm300_vm2, %v298_v1, 0  ;;  %vm292_vm3 = vcmask 4096   ;;  %v902_v4 = vmov -inf   ;;  %vm348_vm4 = vcmask 36864   ;;  %v299_v15 = vld [vmem:[%s254_s18] sm:$0x7] }
  0x79   : > { %623 = vmatpush3.bf16.xpose.msra.mxu0 %v305_v2  ;;  %293 = vst.msk [vmem:[#allocation2] sm:$0x1f] %vm292_vm3, %v902_v4  ;;  %294 = vst.msk [vmem:[#allocation3] sm:$0x1f] %vm292_vm3, %v900_v0  ;;  %v903_v10 = vmov 0   ;;  %vm384_vm5 = vcmask 1041408  }
  0x7a   : > { %711 = vset.pattern.permute.xlu0 %v903_v10  ;;  %712 = vset.pattern.permute.xlu1 %v903_v10  ;;  %vm385_vm6 = vcmask 1042432   ;;  %v904_v16 = vmov 65535   ;;  %vm380_vm7 = vcmask 39936   ;;  %vm448_vm8 = vcmask 518144   ;;  %s615_s24 = sshll.u32 %s887_s15, 6  ;;  %s286_s7 = scalar_lea.vmem [#allocation11], %s1121_s8 }
  0x7b   : > { %v386_v17 = vsel %vm384_vm5, 4294967295, %v904_v16  ;;  %vm449_vm9 = vsmask.f32 2304  ;;  %s469_s20 = sshll.u32 %s286_s7, 4  ;;  %v451_v45 = vld [vmem:[%s286_s7] sm:$0x7]  ;;  %s1149_s9 = scalar_lea.hbm %s1201_s3, %s615_s24  ;;  %s1151_s20 = int_to_ptr.vmem [resolvable:$true] %s469_s20 }
  0x7c   : > { %v387_v18 = vsel %vm385_vm6, %v386_v17, 0  ;;  %vm450_vm10 = vmand %vm448_vm8, %vm449_vm9  ;;  %s455_s22 = scalar_lea.sflag [#allocation7], %s1118_s21  ;;  %s809_s28 = scalar_lea.vmem %s1151_s20, 64 }
  0x7d   : > { %v389_v19 = vand.u32 %v387_v18, %v299_v15  ;;  %p810_p4 = scmp.ne.s32.totalorder %s1151_s20, %s809_s28  ;;  %p1224_p10 = scmp.ne.s32.totalorder %s1212_s25, 0 }
  0x7e   : > { %v372_v33 = vld [vmem:[#allocation4] sm:$0x1f]  ;;  %s905_s15 = smov [#allocation11]  }
  0x7f   : > { %629 = vmatpush3.bf16.msra.mxu1 %v389_v19  ;;  %p811_p12 = pnand %p810_p4, %p1224_p10  ;;  %s813_s30 = sshll.u32 %s905_s15, 4  ;;  %s814_s30 = int_to_ptr.vmem [resolvable:$false] %s813_s30 }
  0x80   : > { %625 = vmatmul.mubr.msk.bf16.vlgmr.msra.gmra.mrb[0].mxu0 %vm300_vm2, %v297_v3  ;;  %v347_v11 = vld [vmem:[#allocation2] sm:$0x1f]  ;;  %v364_v28 = vld [vmem:[#allocation3] sm:$0x1f]  ;;  %s815_s1 = scalar_lea.vmem %s814_s30, 128  ;;  %p816_p8 = scmp.lt.s32.totalorder %s1151_s20, %s814_s30 }
  0x81   : > { %p812_p1 = pneg %p811_p12  ;;  %p817_p9 = scmp.lt.s32.totalorder %s815_s1, %s809_s28 }
  0x83   : > { %p818_p6 = por %p817_p9, %p816_p8 }
  0x85   : > { %p819_p13 = pnand %p818_p6, %p812_p1 }
 0x153   : > { %v341_v5 = vpop.f32.mrb[0].mxu0 }
 0x154   : > { %v626_v6 = vpop.f32.mrb[1].mxu0  ;;  %v349_v7 = vsel %vm348_vm4, %v341_v5, -inf }
 0x155   : > { %350 = vmax.xlane.f32.xlu0 %v349_v7  ;;  %v344_v8 = vpop.f32.mrb[2].mxu0 }
 0x156   : > { %v627_v9 = vpop.f32.mrb[3].mxu0 }
 0x1e2   : > { %v351_v12 = vpop.xlane.xlu0 %350 }
 0x1e3   : > { %v352_v13 = vmax.f32 %v347_v11, %v351_v12 }
 0x1e5   : > { %v353_v14 = vsub.f32 %v347_v11, %v352_v13  ;;  %434 = vst.msk [vmem:[#allocation2] sm:$0x1f] %vm292_vm3, %v352_v13  ;;  %358 = vperm.xlu0 %711, %v352_v13  }
 0x1e7   : > { %v354_v26 = vmul.f32 1.442695, %v353_v14 }
 0x264   : > { %v359_v20 = vpop.permute.xlu0 %358 }
 0x265   : > { %v361_v21 = vsub.f32 %v341_v5, %v359_v20 }
 0x267   : > { %v362_v22 = vmul.f32 1.442695, %v361_v21 }
 0x269   : > { %713 = vpow2.f32 %v362_v22 }
 0x26a   : > { %715 = vpow2.f32 %v354_v26 }
 0x273   : > { %v714_v23 = vpop.eup %713 }
 0x274   : > { %v366_v24 = vsel %vm348_vm4, %v714_v23, 0.0  ;;  %v379_v25 = vpack.c.bf16 %v714_v23, %v714_v23  ;;  %v716_v27 = vpop.eup %715 }
 0x275   : > { %367 = vadd.xlane.f32.xlu1 %v366_v24  ;;  %v365_v29 = vmul.f32 %v716_v27, %v364_v28 }
 0x276   : > { %631 = vmatmul.mubr.msk.bf16.vlgmr.msra.gmra.mrb[0].mxu1 %vm380_vm7, %v379_v25 }
 0x286   : > { %375 = vperm.xlu1 %712, %v716_v27  }
 0x302   : > { %v368_v30 = vpop.xlane.xlu1 %367 }
 0x303   : > { %v369_v31 = vadd.f32 %v368_v30, %v365_v29 }
 0x305   : > { %371 = vst.msk [vmem:[#allocation3] sm:$0x1f] %vm292_vm3, %v369_v31 }
 0x306   : > { %v376_v34 = vpop.permute.xlu1 %375 }
 0x307   : > { %v378_v35 = vmul.f32 %v376_v34, %v372_v33 }
 0x30c   : > { %v439_v32 = vld [vmem:[#allocation3] sm:$0x1f] }
 0x30d   : > { %442 = vperm.xlu1 %712, %v439_v32  }
 0x349   : > { %v425_v36 = vpop.f32.mrb[0].mxu1 }
 0x34a   : > { %v431_v37 = vadd.f32 %v425_v36, %v378_v35  ;;  %v632_v38 = vpop.f32.mrb[1].mxu1 }
 0x34b   : > { %v428_v39 = vpop.f32.mrb[2].mxu1 }
 0x34c   : > { %433 = vst.msk [vmem:[#allocation4] sm:$0x1f] %vm295_vm0, %v431_v37  ;;  %v633_v40 = vpop.f32.mrb[3].mxu1 }
 0x353   : > { %v438_v43 = vld [vmem:[#allocation4] sm:$0x1f] }
 0x38c   : > { %v443_v41 = vpop.permute.xlu1 %442 }
 0x38d   : > { %717 = vrcp.f32 %v443_v41 }
 0x397   : > { %v718_v42 = vpop.eup %717 }
 0x398   : > { %v446_v44 = vmul.f32 %v718_v42, %v438_v43 }
 0x39a   : > { %v447_v46 = vpack.c.bf16 %v446_v44, %v446_v44 }
 0x39c   : > { %v452_v47 = vsel %vm450_vm10, %v447_v46, %v451_v45 }
 0x39d   : > { %453 = vst [vmem:[%s286_s7] sm:$0x7] %v452_v47 }
 0x39e   : > { %822 = shalt.err (!%p819_p13)
}
 0x39f   : > { %s823_s29 = scalar_lea.hbm %s1149_s9, 64  ;;  %s827_s21 = scalar_lea.hbm %s1201_s3, 128 }
 0x3a0   : > { %p824_p11 = scmp.ne.s32.totalorder %s1149_s9, %s823_s29  ;;  %p828_p7 = scmp.lt.u32.totalorder %s1149_s9, %s1201_s3 }
 0x3a1   : > { %p829_p3 = scmp.lt.u32.totalorder %s827_s21, %s823_s29  ;;  %p831_p4 = scmp.lt.u32.totalorder %s823_s29, %s1149_s9 }
 0x3a2   : > { %p825_p2 = pnand %p824_p11, %p1224_p10 }
 0x3a3   : > { %p830_p0 = por %p829_p3, %p828_p7 }
 0x3a4   : > { %p826_p5 = pneg %p825_p2 }
 0x3a5   : > { %p832_p12 = por %p831_p4, %p830_p0 }
 0x3a7   : > { %p833_p1 = pnand %p832_p12, %p826_p5 }
 0x3a9   : > { %836 = shalt.err (!%p833_p1)
}
 0x3aa   : > { %640 = dma.vmem_to_hbm [thread:$0]  (%p1224_p10), %s1151_s20, 64, %s1149_s9, %s455_s22  }
 0x3ab PF: > { %s481_s16 = sand.u32 1, %s875_s12   ;;  %p1225_p8 = scmp.ne.s32.totalorder %s1214_s27, 0 }
 0x3ac   : > { %p1226_p9 = scmp.ge.s32.totalorder %s895_s17, 2  ;;  %s482_s4 = scalar_lea.sflag [#allocation7], %s481_s16 }
 0x3ae   : > { %p653_p6 = pnand %p1226_p9, %p1225_p8 }
 0x3b0   : > { %870 = dma.done.wait (!%p653_p6), %s482_s4, 64  }
 0x3b1   : > { %872 = vsyncadd (!%p653_p6), %s482_s4, 4294967232  ;;  %s22_s17 = sadd.s32 1, %s895_s17   ;;  %s1227_s25 = sld [smem:[#allocation17_spill]] }
 0x3b2   : > { %p19_p13 = scmp.ge.s32.totalorder %s22_s17, 4   ;;  %s1228_s15 = sld [smem:[#allocation15_spill]] }
 0x3b3   : > { %s1229_s16 = sld [smem:[#allocation16_spill]]  ;;  %s1230_s12 = smov %s879_s13 }
 0x3b4   : > { %s1231_s13 = smov %s883_s14  ;;  %21 = sbr.rel (!%p19_p13) target bundleno = 10 (0xa), region = 109 }
 0x3b7   : > { %s1232_s14 = smov %s1227_s25 }
 0x3bb   :  { %487 = vsyncpa [#allocation6], 1 }
 0x3bc   :  { %489 = vsyncpa [#allocation6 + $0x1], 1 }
 0x3bd   :  { %490 = vsyncpa [#allocation9], 1 }
 0x3be   :  { %492 = vsyncpa [#allocation9 + $0x1], 1 }
 0x3bf   :  { %493 = vsyncpa [#allocation7], 1 }
 0x3c0   :  { %495 = vsyncpa [#allocation7 + $0x1], 1 }

// kernel: _lambda_.29
= control target key start
LH: loop header
LB: loop body
LE: loop exit
PB: predicated region body
PF: predicated region fallthrough
CT: control target
= control target key end

     0   :  { %9 = vsyncpa [#allocation3], 0  ;;  %s463_s0 = inlined_call_operand.hbm [shape: bf16[10,64], index: 0, kind: input, shape index: {}]   ;;  %s464_s1 = inlined_call_operand.hbm [shape: bf16[64,64], index: 1, kind: input, shape index: {}]   ;;  %s465_s2 = inlined_call_operand.hbm [shape: f32[1,64], index: 2, kind: input, shape index: {}]   ;;  %s466_s3 = inlined_call_operand.hbm [shape: f32[10,64], index: 3, kind: input, shape index: {}]   ;;  %s467_s4 = inlined_call_operand.hbm [shape: f32[10,64], index: 4, kind: output, shape index: {}]  }
   0x1   :  { %10 = vsyncpa [#allocation6], 0 }
   0x2   :  { %11 = vsyncpa [#allocation9], 0 }
   0x3   :  { %12 = vsyncpa [#allocation4], 0  ;;  %s347_s15 = smov [#allocation5]   ;;  %s348_s17 = smov [#allocation2]  }
   0x4   :  { %s30_s16 = sshll.u32 %s347_s15, 4  ;;  %s18_s18 = sshll.u32 %s348_s17, 4  ;;  %s31_s16 = int_to_ptr.vmem [resolvable:$true] %s30_s16  ;;  %s383_s18 = int_to_ptr.vmem [resolvable:$true] %s18_s18 }
   0x5   :  { %s229_s21 = scalar_lea.hbm %s464_s1, 512 }
   0x6   :  { %p230_p0 = scmp.ne.s32.totalorder %s464_s1, %s229_s21  ;;  %p233_p1 = scmp.lt.u32.totalorder %s229_s21, %s464_s1 }
   0x8   :  { %p235_p2 = pnand %p233_p1, %p230_p0 }
   0xa   :  { %238 = shalt.err (!%p235_p2)
}
   0xb   :  { %s239_s26 = scalar_lea.vmem %s31_s16, 512  ;;  %p244_p4 = scmp.lt.s32.totalorder %s31_s16, %s31_s16 }
   0xc   :  { %p240_p3 = scmp.ne.s32.totalorder %s31_s16, %s239_s26  ;;  %p245_p5 = scmp.lt.s32.totalorder %s239_s26, %s239_s26 }
   0xe   :  { %p246_p6 = por %p245_p5, %p244_p4 }
  0x10   :  { %p247_p7 = pnand %p246_p6, %p240_p3 }
  0x12   :  { %250 = shalt.err (!%p247_p7)
}
  0x13   :  { %s349_s27 = smov 64   ;;  %s350_s28 = smov 4  }
  0x14   :  { %36 = dma.hbm_to_vmem [thread:$0]  %s464_s1, 512, %s31_s16, [#allocation6], %s349_s27, %s349_s27, %s350_s28  }
  0x15   :  { %s251_s7 = scalar_lea.hbm %s463_s0, 128 }
  0x16   :  { %p252_p8 = scmp.ne.s32.totalorder %s463_s0, %s251_s7  ;;  %p255_p9 = scmp.lt.u32.totalorder %s251_s7, %s463_s0 }
  0x18   :  { %p257_p10 = pnand %p255_p9, %p252_p8 }
  0x1a   :  { %260 = shalt.err (!%p257_p10)
}
  0x1b   :  { %s261_s12 = scalar_lea.vmem %s383_s18, 128  ;;  %p266_p12 = scmp.lt.s32.totalorder %s383_s18, %s383_s18 }
  0x1c   :  { %p262_p11 = scmp.ne.s32.totalorder %s383_s18, %s261_s12  ;;  %p267_p13 = scmp.lt.s32.totalorder %s261_s12, %s261_s12 }
  0x1e   :  { %p268_p0 = por %p267_p13, %p266_p12 }
  0x20   :  { %p269_p1 = pnand %p268_p0, %p262_p11 }
  0x22   :  { %272 = shalt.err (!%p269_p1)
}
  0x23   :  { %24 = dma.hbm_to_vmem [thread:$0]  %s463_s0, 128, %s383_s18, [#allocation3], %s349_s27, %s349_s27, %s350_s28  }
  0x24   :  { %s351_s14 = smov [#allocation7]   ;;  %s352_s16 = smov [#allocation8]  }
  0x25   :  { %s43_s15 = sshll.u32 %s351_s14, 4  ;;  %s52_s17 = sshll.u32 %s352_s16, 4  ;;  %s44_s15 = int_to_ptr.vmem [resolvable:$true] %s43_s15  ;;  %s414_s17 = int_to_ptr.vmem [resolvable:$true] %s52_s17 }
  0x26   :  { %s273_s21 = scalar_lea.hbm %s465_s2, 16 }
  0x27   :  { %p274_p2 = scmp.ne.s32.totalorder %s465_s2, %s273_s21  ;;  %p277_p3 = scmp.lt.u32.totalorder %s273_s21, %s465_s2 }
  0x29   :  { %p279_p4 = pnand %p277_p3, %p274_p2 }
  0x2b   :  { %282 = shalt.err (!%p279_p4)
}
  0x2c   :  { %s283_s0 = scalar_lea.vmem %s44_s15, 16  ;;  %s287_s18 = scalar_lea.vmem %s44_s15, 32 }
  0x2d   :  { %p284_p5 = scmp.ne.s32.totalorder %s44_s15, %s283_s0  ;;  %p288_p6 = scmp.lt.s32.totalorder %s44_s15, %s44_s15 }
  0x2e   :  { %p289_p7 = scmp.lt.s32.totalorder %s287_s18, %s283_s0 }
  0x30   :  { %p290_p8 = por %p289_p7, %p288_p6 }
  0x32   :  { %p291_p9 = pnand %p290_p8, %p284_p5 }
  0x34   :  { %294 = shalt.err (!%p291_p9)
}
  0x35   :  { %46 = dma.hbm_to_vmem [thread:$0]  %s465_s2, 16, %s44_s15, [#allocation6]  }
  0x36   :  { %s295_s30 = scalar_lea.hbm %s466_s3, 256 }
  0x37   :  { %p296_p10 = scmp.ne.s32.totalorder %s466_s3, %s295_s30  ;;  %p299_p11 = scmp.lt.u32.totalorder %s295_s30, %s466_s3 }
  0x39   :  { %p301_p12 = pnand %p299_p11, %p296_p10 }
  0x3b   :  { %304 = shalt.err (!%p301_p12)
}
  0x3c   :  { %s305_s9 = scalar_lea.vmem %s414_s17, 256  ;;  %p310_p0 = scmp.lt.s32.totalorder %s414_s17, %s414_s17 }
  0x3d   :  { %p306_p13 = scmp.ne.s32.totalorder %s414_s17, %s305_s9  ;;  %p311_p1 = scmp.lt.s32.totalorder %s305_s9, %s305_s9 }
  0x3f   :  { %p312_p2 = por %p311_p1, %p310_p0 }
  0x41   :  { %p313_p3 = pnand %p312_p2, %p306_p13 }
  0x43   :  { %316 = shalt.err (!%p313_p3)
}
  0x44   :  { %s353_s2 = smov 128   ;;  %s354_s10 = smov 8  }
  0x45   :  { %58 = dma.hbm_to_vmem [thread:$0]  %s466_s3, 256, %s414_s17, [#allocation9], %s353_s2, %s353_s2, %s354_s10  }
  0x46   :  { %339 = dma.done.wait [#allocation3], 128  }
  0x47   :  { %340 = vsyncadd [#allocation3], 4294967168 }
  0x48   :  { %341 = dma.done.wait [#allocation6], 528  }
  0x49   :  { %342 = vsyncadd [#allocation6], 4294966768 }
  0x4a   :  { %343 = dma.done.wait [#allocation9], 256  }
  0x4b   :  { %344 = vsyncadd [#allocation9], 4294967040  ;;  %v355_v0 = vmov 0.0   ;;  %vm356_vm0 = vmmov 0   ;;  %v224_v1 = vld [vmem:[#allocation5] sm:$0xff]   ;;  %v225_v2 = vld [vmem:[#allocation5 + $0x8] sm:$0xff]  }
  0x4c   :  { %201 = vmatprep.subr.bf16.mxu0 %v355_v0  ;;  %209 = vmatprep.mubr.msk.bf16.mxu0 %vm356_vm0, %v355_v0  ;;  %v226_v3 = vld [vmem:[#allocation5 + $0x10] sm:$0xff]   ;;  %v227_v4 = vld [vmem:[#allocation5 + $0x18] sm:$0xff]   ;;  %vm118_vm1 = vcmask 523264   ;;  %v189_v6 = vld [vmem:[#allocation7] ss:$0 sm:$0xff]  ;;  %s357_s3 = smov [#allocation10]  }
  0x4d   :  { %202 = vmatpush3.bf16.msra.mxu0 %v224_v1  ;;  %v228_v5 = vld [vmem:[#allocation2] sm:$0x1f]   ;;  %v163_v8 = vld [vmem:[#allocation8] sm:$0xff]  ;;  %v164_v12 = vld [vmem:[#allocation8 + $0x8] sm:$0x3]  ;;  %s175_s1 = sshll.u32 %s357_s3, 4  ;;  %s176_s1 = int_to_ptr.vmem [resolvable:$true] %s175_s1 }
  0x4e   :  { %203 = vmatprep.subr.bf16.mxu0 %v355_v0  ;;  %vm168_vm2 = vcmask 517120   ;;  %s317_s13 = scalar_lea.vmem %s176_s1, 256  ;;  %p322_p5 = scmp.lt.s32.totalorder %s176_s1, %s176_s1 }
  0x4f   :  { %p318_p4 = scmp.ne.s32.totalorder %s176_s1, %s317_s13  ;;  %p323_p6 = scmp.lt.s32.totalorder %s317_s13, %s317_s13 }
  0x51   :  { %204 = vmatpush3.bf16.msra.mxu0 %v225_v2  ;;  %p324_p7 = por %p323_p6, %p322_p5 }
  0x52   :  { %205 = vmatprep.subr.bf16.mxu0 %v355_v0 }
  0x53   :  { %p325_p8 = pnand %p324_p7, %p318_p4 }
  0x55   :  { %206 = vmatpush3.bf16.msra.mxu0 %v226_v3 }
  0x56   :  { %207 = vmatprep.subr.bf16.mxu0 %v355_v0 }
  0x59   :  { %208 = vmatpush3.bf16.msra.mxu0 %v227_v4 }
  0x5c   :  { %210 = vmatmul.mubr.msk.bf16.vlgmr.msra.gmra.mrb[0].mxu0 %vm118_vm1, %v228_v5 }
 0x12f   :  { %v156_v7 = vpop.f32.mrb[0].mxu0 }
 0x130   :  { %v157_v9 = vadd.f32 %v189_v6, %v156_v7  ;;  %v211_v10 = vpop.f32.mrb[1].mxu0 }
 0x131   :  { %v159_v11 = vpop.f32.mrb[2].mxu0 }
 0x132   :  { %v165_v13 = vadd.f32 %v163_v8, %v157_v9  ;;  %v160_v14 = vadd.f32 %v189_v6, %v159_v11  ;;  %v212_v15 = vpop.f32.mrb[3].mxu0 }
 0x134   :  { %167 = vst.msk [vmem:[#allocation10] sm:$0xff] %vm118_vm1, %v165_v13  ;;  %v166_v16 = vadd.f32 %v164_v12, %v160_v14 }
 0x136   :  { %169 = vst.msk [vmem:[#allocation10 + $0x8] sm:$0x3] %vm168_vm2, %v166_v16 }
 0x137   :  { %328 = shalt.err (!%p325_p8)
}
 0x138   :  { %s329_s16 = scalar_lea.hbm %s467_s4, 256 }
 0x139   :  { %p330_p9 = scmp.ne.s32.totalorder %s467_s4, %s329_s16  ;;  %p333_p10 = scmp.lt.u32.totalorder %s329_s16, %s467_s4 }
 0x13b   :  { %p335_p11 = pnand %p333_p10, %p330_p9 }
 0x13d   :  { %338 = shalt.err (!%p335_p11)
}
 0x13e   :  { %181 = dma.vmem_to_hbm [thread:$0]  %s176_s1, 256, %s467_s4, [#allocation4], %s353_s2, %s353_s2, %s354_s10  }
 0x13f   :  { %345 = dma.done.wait [#allocation4], 256  }
 0x140   :  { %346 = vsyncadd [#allocation4], 4294967040 }
 0x141   :  { %185 = vsyncpa [#allocation3], 1 }
 0x142   :  { %186 = vsyncpa [#allocation6], 1 }
 0x143   :  { %187 = vsyncpa [#allocation9], 1 }
 0x144   :  { %188 = vsyncpa [#allocation4], 1 }

// kernel: _lambda_.30
= control target key start
LH: loop header
LB: loop body
LE: loop exit
PB: predicated region body
PF: predicated region fallthrough
CT: control target
= control target key end

     0   :  { %10 = vsyncpa [#allocation3], 0  ;;  %s624_s0 = inlined_call_operand.hbm [shape: f32[10,64], index: 0, kind: input, shape index: {}]   ;;  %s625_s1 = inlined_call_operand.hbm [shape: bf16[64,256], index: 1, kind: input, shape index: {}]   ;;  %s626_s2 = inlined_call_operand.hbm [shape: f32[1,64], index: 2, kind: input, shape index: {}]   ;;  %s627_s3 = inlined_call_operand.hbm [shape: f32[1,64], index: 3, kind: input, shape index: {}]   ;;  %s628_s4 = inlined_call_operand.hbm [shape: f32[1,256], index: 4, kind: input, shape index: {}]   ;;  %s629_s5 = inlined_call_operand.hbm [shape: bf16[10,256], index: 5, kind: output, shape index: {}]  }
   0x1   :  { %11 = vsyncpa [#allocation6], 0 }
   0x2   :  { %12 = vsyncpa [#allocation9], 0 }
   0x3   :  { %13 = vsyncpa [#allocation4], 0  ;;  %s493_s18 = smov [#allocation5]   ;;  %s494_s20 = smov [#allocation8]  }
   0x4   :  { %s31_s19 = sshll.u32 %s493_s18, 4  ;;  %s54_s21 = sshll.u32 %s494_s20, 4  ;;  %s32_s19 = int_to_ptr.vmem [resolvable:$true] %s31_s19  ;;  %s532_s21 = int_to_ptr.vmem [resolvable:$true] %s54_s21 }
   0x5   :  { %s353_s24 = scalar_lea.hbm %s625_s1, 1024 }
   0x6   :  { %p354_p0 = scmp.ne.s32.totalorder %s625_s1, %s353_s24  ;;  %p357_p1 = scmp.lt.u32.totalorder %s353_s24, %s625_s1 }
   0x8   :  { %p359_p2 = pnand %p357_p1, %p354_p0 }
   0xa   :  { %362 = shalt.err (!%p359_p2)
}
   0xb   :  { %s363_s29 = scalar_lea.vmem %s32_s19, 1024  ;;  %p368_p4 = scmp.lt.s32.totalorder %s32_s19, %s32_s19 }
   0xc   :  { %p364_p3 = scmp.ne.s32.totalorder %s32_s19, %s363_s29  ;;  %p369_p5 = scmp.lt.s32.totalorder %s363_s29, %s363_s29 }
   0xe   :  { %p370_p6 = por %p369_p5, %p368_p4 }
  0x10   :  { %p371_p7 = pnand %p370_p6, %p364_p3 }
  0x12   :  { %374 = shalt.err (!%p371_p7)
}
  0x13   :  { %s495_s30 = smov 128   ;;  %s496_s6 = smov 8  }
  0x14   :  { %37 = dma.hbm_to_vmem [thread:$0]  %s625_s1, 1024, %s32_s19, [#allocation6], %s495_s30, %s495_s30, %s496_s6  }
  0x15   :  { %s375_s11 = scalar_lea.hbm %s627_s3, 16 }
  0x16   :  { %p376_p8 = scmp.ne.s32.totalorder %s627_s3, %s375_s11  ;;  %p379_p9 = scmp.lt.u32.totalorder %s375_s11, %s627_s3 }
  0x18   :  { %p381_p10 = pnand %p379_p9, %p376_p8 }
  0x1a   :  { %384 = shalt.err (!%p381_p10)
}
  0x1b   :  { %s385_s16 = scalar_lea.vmem %s532_s21, 16  ;;  %s389_s1 = scalar_lea.vmem %s532_s21, 32 }
  0x1c   :  { %p386_p11 = scmp.ne.s32.totalorder %s532_s21, %s385_s16  ;;  %p390_p12 = scmp.lt.s32.totalorder %s532_s21, %s532_s21 }
  0x1d   :  { %p391_p13 = scmp.lt.s32.totalorder %s389_s1, %s385_s16 }
  0x1f   :  { %p392_p0 = por %p391_p13, %p390_p12 }
  0x21   :  { %p393_p1 = pnand %p392_p0, %p386_p11 }
  0x23   :  { %396 = shalt.err (!%p393_p1)
}
  0x24   :  { %57 = dma.hbm_to_vmem [thread:$0]  %s627_s3, 16, %s532_s21, [#allocation9]  }
  0x25   :  { %s497_s19 = smov [#allocation2]   ;;  %s498_s22 = smov [#allocation7]  }
  0x26   :  { %s19_s20 = sshll.u32 %s497_s19, 4  ;;  %s44_s23 = sshll.u32 %s498_s22, 4  ;;  %s20_s20 = int_to_ptr.vmem [resolvable:$true] %s19_s20  ;;  %s45_s23 = int_to_ptr.vmem [resolvable:$true] %s44_s23 }
  0x27   :  { %s397_s26 = scalar_lea.hbm %s624_s0, 256 }
  0x28   :  { %p398_p2 = scmp.ne.s32.totalorder %s624_s0, %s397_s26  ;;  %p401_p3 = scmp.lt.u32.totalorder %s397_s26, %s624_s0 }
  0x2a   :  { %p403_p4 = pnand %p401_p3, %p398_p2 }
  0x2c   :  { %406 = shalt.err (!%p403_p4)
}
  0x2d   :  { %s407_s3 = scalar_lea.vmem %s20_s20, 256  ;;  %p412_p6 = scmp.lt.s32.totalorder %s20_s20, %s20_s20 }
  0x2e   :  { %p408_p5 = scmp.ne.s32.totalorder %s20_s20, %s407_s3  ;;  %p413_p7 = scmp.lt.s32.totalorder %s407_s3, %s407_s3 }
  0x30   :  { %p414_p8 = por %p413_p7, %p412_p6 }
  0x32   :  { %p415_p9 = pnand %p414_p8, %p408_p5 }
  0x34   :  { %418 = shalt.err (!%p415_p9)
}
  0x35   :  { %25 = dma.hbm_to_vmem [thread:$0]  %s624_s0, 256, %s20_s20, [#allocation3], %s495_s30, %s495_s30, %s496_s6  }
  0x36   :  { %s419_s11 = scalar_lea.hbm %s626_s2, 16 }
  0x37   :  { %p420_p10 = scmp.ne.s32.totalorder %s626_s2, %s419_s11  ;;  %p423_p11 = scmp.lt.u32.totalorder %s419_s11, %s626_s2 }
  0x39   :  { %p425_p12 = pnand %p423_p11, %p420_p10 }
  0x3b   :  { %428 = shalt.err (!%p425_p12)
}
  0x3c   :  { %s429_s16 = scalar_lea.vmem %s45_s23, 16  ;;  %s433_s1 = scalar_lea.vmem %s45_s23, 32 }
  0x3d   :  { %p430_p13 = scmp.ne.s32.totalorder %s45_s23, %s429_s16  ;;  %p434_p0 = scmp.lt.s32.totalorder %s45_s23, %s45_s23 }
  0x3e   :  { %p435_p1 = scmp.lt.s32.totalorder %s433_s1, %s429_s16 }
  0x40   :  { %p436_p2 = por %p435_p1, %p434_p0 }
  0x42   :  { %p437_p3 = pnand %p436_p2, %p430_p13 }
  0x44   :  { %440 = shalt.err (!%p437_p3)
}
  0x45   :  { %47 = dma.hbm_to_vmem [thread:$0]  %s626_s2, 16, %s45_s23, [#allocation6]  }
  0x46   :  { %s499_s18 = smov [#allocation10]   ;;  %s441_s24 = scalar_lea.hbm %s628_s4, 32 }
  0x47   :  { %s64_s19 = sshll.u32 %s499_s18, 4  ;;  %p442_p4 = scmp.ne.s32.totalorder %s628_s4, %s441_s24  ;;  %s65_s19 = int_to_ptr.vmem [resolvable:$true] %s64_s19 }
  0x48   :  { %p445_p5 = scmp.lt.u32.totalorder %s441_s24, %s628_s4 }
  0x4a   :  { %p447_p6 = pnand %p445_p5, %p442_p4 }
  0x4c   :  { %450 = shalt.err (!%p447_p6)
}
  0x4d   :  { %s451_s29 = scalar_lea.vmem %s65_s19, 32  ;;  %p456_p8 = scmp.lt.s32.totalorder %s65_s19, %s65_s19 }
  0x4e   :  { %p452_p7 = scmp.ne.s32.totalorder %s65_s19, %s451_s29  ;;  %p457_p9 = scmp.lt.s32.totalorder %s451_s29, %s451_s29 }
  0x50   :  { %p458_p10 = por %p457_p9, %p456_p8 }
  0x52   :  { %p459_p11 = pnand %p458_p10, %p452_p7 }
  0x54   :  { %462 = shalt.err (!%p459_p11)
}
  0x55   :  { %67 = dma.hbm_to_vmem [thread:$0]  %s628_s4, 32, %s65_s19, [#allocation9]  }
  0x56   :  { %485 = dma.done.wait [#allocation3], 256  }
  0x57   :  { %486 = vsyncadd [#allocation3], 4294967040 }
  0x58   :  { %487 = dma.done.wait [#allocation6], 1040  }
  0x59   :  { %488 = vsyncadd [#allocation6], 4294966256 }
  0x5a   :  { %489 = dma.done.wait [#allocation9], 48  }
  0x5b   :  { %490 = vsyncadd [#allocation9], 4294967248  ;;  %vm86_vm0 = vcmask 523264   ;;  %v84_v0 = vld [vmem:[#allocation2] sm:$0xff]  ;;  %v85_v1 = vld [vmem:[#allocation2 + $0x8] sm:$0x3]  ;;  %v144_v40 = vlaneseq }
  0x5c   :  { %vm90_vm1 = vcmask 517120   ;;  %v87_v2 = vsel %vm86_vm0, %v84_v0, 0.0  ;;  %v321_v14 = vld [vmem:[#allocation5 + $0x4] ss:$8 sps:$4 sm:$0xff]   ;;  %v323_v15 = vld [vmem:[#allocation5] ss:$8 sps:$4 sm:$0xff]  }
  0x5d   :  { %88 = vadd.xlane.f32.xlu0 %v87_v2  ;;  %v91_v3 = vsel %vm90_vm1, %v85_v1, 0.0  ;;  %197 = vmatprep.subr.bf16.mxu0 %v321_v14  ;;  %v324_v16 = vld [vmem:[#allocation5 + $0x14] ss:$8 sps:$4 sm:$0xff]   ;;  %v326_v17 = vld [vmem:[#allocation5 + $0x10] ss:$8 sps:$4 sm:$0xff]   ;;  %v500_v22 = vmov 0  }
  0x5e   :  { %198 = vmatpush1.bf16.msra.mxu0 %v323_v15  ;;  %v327_v18 = vld [vmem:[#allocation5 + $0x24] ss:$8 sps:$4 sm:$0xff]   ;;  %v329_v19 = vld [vmem:[#allocation5 + $0x20] ss:$8 sps:$4 sm:$0xff]   ;;  %v330_v20 = vld [vmem:[#allocation5 + $0x34] ss:$8 sps:$4 sm:$0xff]   ;;  %229 = vmatprep.mubr.bf16.mxu0 %v500_v22 }
  0x5f   :  { %199 = vmatprep.subr.bf16.mxu0 %v324_v16  ;;  %v332_v21 = vld [vmem:[#allocation5 + $0x30] ss:$8 sps:$4 sm:$0xff]   ;;  %v297_v31 = vld [vmem:[#allocation7] ss:$0 sm:$0xff]  ;;  %v298_v35 = vld [vmem:[#allocation8] ss:$0 sm:$0xff] }
  0x60   :  { %v145_v41 = vshrl.u32 %v144_v40, 7  ;;  %v142_v43 = vld [vmem:[#allocation10] sm:$0x3]  ;;  %s501_s4 = smov [#allocation11]  }
  0x61   :  { %92 = vadd.xlane.f32.xlu0 %v91_v3  ;;  %s283_s7 = sshll.u32 %s501_s4, 4  ;;  %s284_s7 = int_to_ptr.vmem [resolvable:$true] %s283_s7 }
  0x62   :  { %200 = vmatpush1.bf16.msra.mxu0 %v326_v17  ;;  %v146_v42 = vsub.s32 0, %v145_v41  ;;  %v150_v44 = vsub.s32 1, %v145_v41  ;;  %s463_s3 = scalar_lea.vmem %s284_s7, 256  ;;  %p468_p13 = scmp.lt.s32.totalorder %s284_s7, %s284_s7 }
  0x63   :  { %201 = vmatprep.subr.bf16.mxu0 %v327_v18  ;;  %p464_p12 = scmp.ne.s32.totalorder %s284_s7, %s463_s3  ;;  %p469_p0 = scmp.lt.s32.totalorder %s463_s3, %s463_s3 }
  0x64   :  { %v147_v45 = vrot.slane %v142_v43, %v146_v42  ;;  %v151_v46 = vrot.slane %v142_v43, %v150_v44 }
  0x65   :  { %p470_p1 = por %p469_p0, %p468_p13 }
  0x66   :  { %202 = vmatpush1.bf16.msra.mxu0 %v329_v19 }
  0x67   :  { %203 = vmatprep.subr.bf16.mxu0 %v330_v20  ;;  %p471_p2 = pnand %p470_p1, %p464_p12 }
  0x6a   :  { %204 = vmatpush1.bf16.msra.mxu0 %v332_v21 }
  0xea   :  { %v89_v4 = vpop.xlane.xlu0 %88 }
  0xeb   :  { %v95_v5 = vmul.f32 0.015625, %v89_v4 }
  0xed   :  { %v97_v6 = vsub.f32 %v84_v0, %v95_v5 }
  0xee   :  { %v93_v7 = vpop.xlane.xlu0 %92 }
  0xef   :  { %v96_v8 = vmul.f32 0.015625, %v93_v7  ;;  %v99_v9 = vmul.f32 %v97_v6, %v97_v6 }
  0xf1   :  { %v98_v10 = vsub.f32 %v85_v1, %v96_v8  ;;  %v101_v11 = vsel %vm86_vm0, %v99_v9, 0.0 }
  0xf2   :  { %102 = vadd.xlane.f32.xlu1 %v101_v11 }
  0xf3   :  { %v100_v12 = vmul.f32 %v98_v10, %v98_v10 }
  0xf5   :  { %v104_v13 = vsel %vm90_vm1, %v100_v12, 0.0 }
  0xf6   :  { %105 = vadd.xlane.f32.xlu1 %v104_v13 }
 0x17f   :  { %v103_v23 = vpop.xlane.xlu1 %102 }
 0x180   :  { %v107_v24 = vmul.f32 0.015625, %v103_v23 }
 0x182   :  { %v109_v25 = vadd.f32 1e-05, %v107_v24 }
 0x183   :  { %v106_v26 = vpop.xlane.xlu1 %105 }
 0x184   :  { %333 = vrsqrt.f32 %v109_v25  ;;  %v108_v27 = vmul.f32 0.015625, %v106_v26 }
 0x186   :  { %v110_v28 = vadd.f32 1e-05, %v108_v27 }
 0x188   :  { %335 = vrsqrt.f32 %v110_v28 }
 0x18e   :  { %v334_v29 = vpop.eup %333 }
 0x18f   :  { %v113_v30 = vmul.f32 %v334_v29, %v97_v6 }
 0x191   :  { %v122_v34 = vmul.f32 %v297_v31, %v113_v30 }
 0x192   :  { %v336_v32 = vpop.eup %335 }
 0x193   :  { %v114_v33 = vmul.f32 %v336_v32, %v98_v10  ;;  %v131_v37 = vadd.f32 %v298_v35, %v122_v34 }
 0x195   :  { %v123_v36 = vmul.f32 %v297_v31, %v114_v33 }
 0x197   :  { %v132_v38 = vadd.f32 %v298_v35, %v123_v36 }
 0x199   :  { %v133_v39 = vpack.c.bf16 %v132_v38, %v131_v37 }
 0x19b   :  { %307 = vmatmul.mubr.msk.bf16.vlgmr.msra.gmra.mrb[0].mxu0 %vm86_vm0, %v133_v39 }
 0x26e   :  { %v231_v47 = vpop.f32.mrb[0].mxu0 }
 0x26f   :  { %v232_v48 = vadd.f32 %v231_v47, %v147_v45  ;;  %v233_v49 = vpop.f32.mrb[1].mxu0 }
 0x270   :  { %v234_v50 = vadd.f32 %v233_v49, %v151_v46  ;;  %v235_v51 = vpop.f32.mrb[2].mxu0 }
 0x271   :  { %v240_v52 = vmul.f32 -1.702, %v232_v48  ;;  %v236_v53 = vadd.f32 %v235_v51, %v147_v45  ;;  %v237_v54 = vpop.f32.mrb[3].mxu0 }
 0x272   :  { %v241_v55 = vmul.f32 -1.702, %v234_v50  ;;  %v238_v56 = vadd.f32 %v237_v54, %v151_v46 }
 0x273   :  { %v244_v57 = vmul.f32 1.442695, %v240_v52  ;;  %v242_v58 = vmul.f32 -1.702, %v236_v53 }
 0x274   :  { %v246_v59 = vmul.f32 1.442695, %v241_v55  ;;  %v243_v60 = vmul.f32 -1.702, %v238_v56 }
 0x275   :  { %337 = vpow2.f32 %v244_v57  ;;  %v248_v61 = vmul.f32 1.442695, %v242_v58 }
 0x276   :  { %339 = vpow2.f32 %v246_v59  ;;  %v250_v62 = vmul.f32 1.442695, %v243_v60 }
 0x277   :  { %341 = vpow2.f32 %v248_v61 }
 0x278   :  { %343 = vpow2.f32 %v250_v62 }
 0x27f   :  { %v338_v63 = vpop.eup %337 }
 0x280   :  { %v340_v0 = vpop.eup %339  ;;  %v252_v1 = vadd.f32 1.0, %v338_v63 }
 0x281   :  { %v342_v2 = vpop.eup %341  ;;  %v253_v3 = vadd.f32 1.0, %v340_v0 }
 0x282   :  { %v344_v4 = vpop.eup %343  ;;  %345 = vrcp.f32 %v252_v1  ;;  %v254_v5 = vadd.f32 1.0, %v342_v2 }
 0x283   :  { %347 = vrcp.f32 %v253_v3  ;;  %v255_v6 = vadd.f32 1.0, %v344_v4 }
 0x284   :  { %349 = vrcp.f32 %v254_v5 }
 0x285   :  { %351 = vrcp.f32 %v255_v6 }
 0x28c   :  { %v346_v7 = vpop.eup %345 }
 0x28d   :  { %v348_v8 = vpop.eup %347  ;;  %v260_v9 = vmul.f32 %v346_v7, %v232_v48 }
 0x28e   :  { %v350_v10 = vpop.eup %349  ;;  %v261_v11 = vmul.f32 %v348_v8, %v234_v50 }
 0x28f   :  { %v352_v12 = vpop.eup %351  ;;  %v262_v13 = vmul.f32 %v350_v10, %v236_v53 }
 0x290   :  { %v310_v14 = vpack.c.bf16 %v261_v11, %v260_v9  ;;  %v263_v15 = vmul.f32 %v352_v12, %v238_v56 }
 0x292   :  { %276 = vst [vmem:[#allocation11] sm:$0xff] %v310_v14  ;;  %v311_v16 = vpack.c.bf16 %v263_v15, %v262_v13 }
 0x294   :  { %277 = vst [vmem:[#allocation11 + $0x8] sm:$0x11] %v311_v16 }
 0x295   :  { %474 = shalt.err (!%p471_p2)
}
 0x296   :  { %s475_s9 = scalar_lea.hbm %s629_s5, 256 }
 0x297   :  { %p476_p3 = scmp.ne.s32.totalorder %s629_s5, %s475_s9  ;;  %p479_p4 = scmp.lt.u32.totalorder %s475_s9, %s629_s5 }
 0x299   :  { %p481_p5 = pnand %p479_p4, %p476_p3 }
 0x29b   :  { %484 = shalt.err (!%p481_p5)
}
 0x29c   :  { %289 = dma.vmem_to_hbm [thread:$0]  %s284_s7, 256, %s629_s5, [#allocation4], %s495_s30, %s495_s30, %s496_s6  }
 0x29d   :  { %491 = dma.done.wait [#allocation4], 256  }
 0x29e   :  { %492 = vsyncadd [#allocation4], 4294967040 }
 0x29f   :  { %293 = vsyncpa [#allocation3], 1 }
 0x2a0   :  { %294 = vsyncpa [#allocation6], 1 }
 0x2a1   :  { %295 = vsyncpa [#allocation9], 1 }
 0x2a2   :  { %296 = vsyncpa [#allocation4], 1 }

// kernel: _lambda_.31
= control target key start
LH: loop header
LB: loop body
LE: loop exit
PB: predicated region body
PF: predicated region fallthrough
CT: control target
= control target key end

     0   :  { %9 = vsyncpa [#allocation3], 0  ;;  %s584_s0 = inlined_call_operand.hbm [shape: bf16[10,256], index: 0, kind: input, shape index: {}]   ;;  %s585_s1 = inlined_call_operand.hbm [shape: bf16[256,64], index: 1, kind: input, shape index: {}]   ;;  %s586_s2 = inlined_call_operand.hbm [shape: f32[1,64], index: 2, kind: input, shape index: {}]   ;;  %s587_s3 = inlined_call_operand.hbm [shape: f32[10,64], index: 3, kind: input, shape index: {}]   ;;  %s588_s4 = inlined_call_operand.hbm [shape: f32[10,64], index: 4, kind: output, shape index: {}]  }
   0x1   :  { %10 = vsyncpa [#allocation6], 0 }
   0x2   :  { %11 = vsyncpa [#allocation9], 0 }
   0x3   :  { %12 = vsyncpa [#allocation4], 0  ;;  %s474_s15 = smov [#allocation5]   ;;  %s356_s19 = scalar_lea.hbm %s585_s1, 2048 }
   0x4   :  { %s30_s16 = sshll.u32 %s474_s15, 4  ;;  %p357_p0 = scmp.ne.s32.totalorder %s585_s1, %s356_s19  ;;  %s31_s16 = int_to_ptr.vmem [resolvable:$true] %s30_s16 }
   0x5   :  { %p360_p1 = scmp.lt.u32.totalorder %s356_s19, %s585_s1 }
   0x7   :  { %p362_p2 = pnand %p360_p1, %p357_p0 }
   0x9   :  { %365 = shalt.err (!%p362_p2)
}
   0xa   :  { %s366_s24 = scalar_lea.vmem %s31_s16, 2048  ;;  %p371_p4 = scmp.lt.s32.totalorder %s31_s16, %s31_s16 }
   0xb   :  { %p367_p3 = scmp.ne.s32.totalorder %s31_s16, %s366_s24  ;;  %p372_p5 = scmp.lt.s32.totalorder %s366_s24, %s366_s24 }
   0xd   :  { %p373_p6 = por %p372_p5, %p371_p4 }
   0xf   :  { %p374_p7 = pnand %p373_p6, %p367_p3 }
  0x11   :  { %377 = shalt.err (!%p374_p7)
}
  0x12   :  { %s475_s25 = smov 64   ;;  %s476_s26 = smov 4  }
  0x13   :  { %36 = dma.hbm_to_vmem [thread:$0]  %s585_s1, 2048, %s31_s16, [#allocation6], %s475_s25, %s475_s25, %s476_s26  }
  0x14   :  { %s477_s29 = smov [#allocation2]   ;;  %s378_s7 = scalar_lea.hbm %s584_s0, 256 }
  0x15   :  { %s18_s30 = sshll.u32 %s477_s29, 4  ;;  %p379_p8 = scmp.ne.s32.totalorder %s584_s0, %s378_s7  ;;  %s19_s30 = int_to_ptr.vmem [resolvable:$true] %s18_s30 }
  0x16   :  { %p382_p9 = scmp.lt.u32.totalorder %s378_s7, %s584_s0 }
  0x18   :  { %p384_p10 = pnand %p382_p9, %p379_p8 }
  0x1a   :  { %387 = shalt.err (!%p384_p10)
}
  0x1b   :  { %s388_s12 = scalar_lea.vmem %s19_s30, 256  ;;  %p393_p12 = scmp.lt.s32.totalorder %s19_s30, %s19_s30 }
  0x1c   :  { %p389_p11 = scmp.ne.s32.totalorder %s19_s30, %s388_s12  ;;  %p394_p13 = scmp.lt.s32.totalorder %s388_s12, %s388_s12 }
  0x1e   :  { %p395_p0 = por %p394_p13, %p393_p12 }
  0x20   :  { %p396_p1 = pnand %p395_p0, %p389_p11 }
  0x22   :  { %399 = shalt.err (!%p396_p1)
}
  0x23   :  { %s478_s1 = smov 128   ;;  %s479_s13 = smov 8  }
  0x24   :  { %24 = dma.hbm_to_vmem [thread:$0]  %s584_s0, 256, %s19_s30, [#allocation3], %s478_s1, %s478_s1, %s479_s13  }
  0x25   :  { %s480_s16 = smov [#allocation7]   ;;  %s481_s18 = smov [#allocation8]  }
  0x26   :  { %s43_s17 = sshll.u32 %s480_s16, 4  ;;  %s52_s19 = sshll.u32 %s481_s18, 4  ;;  %s44_s17 = int_to_ptr.vmem [resolvable:$true] %s43_s17  ;;  %s535_s19 = int_to_ptr.vmem [resolvable:$true] %s52_s19 }
  0x27   :  { %s400_s22 = scalar_lea.hbm %s586_s2, 16 }
  0x28   :  { %p401_p2 = scmp.ne.s32.totalorder %s586_s2, %s400_s22  ;;  %p404_p3 = scmp.lt.u32.totalorder %s400_s22, %s586_s2 }
  0x2a   :  { %p406_p4 = pnand %p404_p3, %p401_p2 }
  0x2c   :  { %409 = shalt.err (!%p406_p4)
}
  0x2d   :  { %s410_s0 = scalar_lea.vmem %s44_s17, 16  ;;  %s414_s27 = scalar_lea.vmem %s44_s17, 32 }
  0x2e   :  { %p411_p5 = scmp.ne.s32.totalorder %s44_s17, %s410_s0  ;;  %p415_p6 = scmp.lt.s32.totalorder %s44_s17, %s44_s17 }
  0x2f   :  { %p416_p7 = scmp.lt.s32.totalorder %s414_s27, %s410_s0 }
  0x31   :  { %p417_p8 = por %p416_p7, %p415_p6 }
  0x33   :  { %p418_p9 = pnand %p417_p8, %p411_p5 }
  0x35   :  { %421 = shalt.err (!%p418_p9)
}
  0x36   :  { %46 = dma.hbm_to_vmem [thread:$0]  %s586_s2, 16, %s44_s17, [#allocation6]  }
  0x37   :  { %s422_s6 = scalar_lea.hbm %s587_s3, 256 }
  0x38   :  { %p423_p10 = scmp.ne.s32.totalorder %s587_s3, %s422_s6  ;;  %p426_p11 = scmp.lt.u32.totalorder %s422_s6, %s587_s3 }
  0x3a   :  { %p428_p12 = pnand %p426_p11, %p423_p10 }
  0x3c   :  { %431 = shalt.err (!%p428_p12)
}
  0x3d   :  { %s432_s11 = scalar_lea.vmem %s535_s19, 256  ;;  %p437_p0 = scmp.lt.s32.totalorder %s535_s19, %s535_s19 }
  0x3e   :  { %p433_p13 = scmp.ne.s32.totalorder %s535_s19, %s432_s11  ;;  %p438_p1 = scmp.lt.s32.totalorder %s432_s11, %s432_s11 }
  0x40   :  { %p439_p2 = por %p438_p1, %p437_p0 }
  0x42   :  { %p440_p3 = pnand %p439_p2, %p433_p13 }
  0x44   :  { %443 = shalt.err (!%p440_p3)
}
  0x45   :  { %58 = dma.hbm_to_vmem [thread:$0]  %s587_s3, 256, %s535_s19, [#allocation9], %s478_s1, %s478_s1, %s479_s13  }
  0x46   :  { %466 = dma.done.wait [#allocation3], 256  }
  0x47   :  { %467 = vsyncadd [#allocation3], 4294967040 }
  0x48   :  { %468 = dma.done.wait [#allocation6], 2064  }
  0x49   :  { %469 = vsyncadd [#allocation6], 4294965232 }
  0x4a   :  { %470 = dma.done.wait [#allocation9], 256  }
  0x4b   :  { %471 = vsyncadd [#allocation9], 4294967040  ;;  %v337_v0 = vld [vmem:[#allocation5 + $0x40] sm:$0xff]   ;;  %v339_v2 = vld [vmem:[#allocation5 + $0x48] sm:$0xff]   ;;  %vm264_vm0 = vcmask 523264   ;;  %s482_s3 = smov [#allocation10]  }
  0x4c   :  { %v338_v1 = vld [vmem:[#allocation5] sm:$0xff]   ;;  %306 = vmatprep.subr.bf16.mxu0 %v337_v0  ;;  %v340_v3 = vld [vmem:[#allocation5 + $0x8] sm:$0xff]   ;;  %v341_v4 = vld [vmem:[#allocation5 + $0x50] sm:$0xff]   ;;  %s273_s14 = sshll.u32 %s482_s3, 4  ;;  %vm266_vm1 = vcmask 517120   ;;  %s274_s14 = int_to_ptr.vmem [resolvable:$true] %s273_s14 }
  0x4d   :  { %307 = vmatpush3.bf16.msra.mxu0 %v338_v1  ;;  %v342_v5 = vld [vmem:[#allocation5 + $0x10] sm:$0xff]   ;;  %v343_v6 = vld [vmem:[#allocation5 + $0x58] sm:$0xff]   ;;  %v345_v8 = vld [vmem:[#allocation5 + $0x60] sm:$0xff]   ;;  %s444_s15 = scalar_lea.vmem %s274_s14, 256  ;;  %p449_p5 = scmp.lt.s32.totalorder %s274_s14, %s274_s14 }
  0x4e   :  { %308 = vmatprep.subr.bf16.mxu0 %v339_v2  ;;  %v344_v7 = vld [vmem:[#allocation5 + $0x18] sm:$0xff]   ;;  %v346_v9 = vld [vmem:[#allocation5 + $0x20] sm:$0xff]   ;;  %v347_v10 = vld [vmem:[#allocation5 + $0x68] sm:$0xff]   ;;  %p445_p4 = scmp.ne.s32.totalorder %s274_s14, %s444_s15  ;;  %p450_p6 = scmp.lt.s32.totalorder %s444_s15, %s444_s15 }
  0x4f   :  { %v355_v11 = vld [vmem:[#allocation2 + $0x4] ss:$8 sps:$4 sm:$0x1f]   ;;  %v348_v12 = vld [vmem:[#allocation5 + $0x28] sm:$0xff]   ;;  %v287_v19 = vld [vmem:[#allocation7] ss:$0 sm:$0xff] }
  0x50   :  { %251 = vmatprep.mubr.bf16.mxu0 %v355_v11  ;;  %v349_v13 = vld [vmem:[#allocation5 + $0x70] sm:$0xff]   ;;  %v351_v15 = vld [vmem:[#allocation5 + $0x78] sm:$0xff]   ;;  %v260_v23 = vld [vmem:[#allocation8] sm:$0xff]  ;;  %p451_p7 = por %p450_p6, %p449_p5 }
  0x51   :  { %309 = vmatpush3.bf16.msra.mxu0 %v340_v3  ;;  %v350_v14 = vld [vmem:[#allocation5 + $0x30] sm:$0xff]   ;;  %v352_v16 = vld [vmem:[#allocation5 + $0x38] sm:$0xff]   ;;  %v261_v27 = vld [vmem:[#allocation8 + $0x8] sm:$0x3] }
  0x52   :  { %310 = vmatprep.subr.bf16.mxu0 %v341_v4  ;;  %v353_v17 = vld [vmem:[#allocation2] ss:$8 sps:$4 sm:$0x1f]   ;;  %p452_p8 = pnand %p451_p7, %p445_p4 }
  0x55   :  { %311 = vmatpush3.bf16.msra.mxu0 %v342_v5 }
  0x56   :  { %312 = vmatprep.subr.bf16.mxu0 %v343_v6 }
  0x59   :  { %313 = vmatpush3.bf16.msra.mxu0 %v344_v7 }
  0x5a   :  { %314 = vmatprep.subr.bf16.mxu0 %v345_v8 }
  0x5d   :  { %315 = vmatpush3.bf16.msra.mxu0 %v346_v9 }
  0x5e   :  { %316 = vmatprep.subr.bf16.mxu0 %v347_v10 }
  0x61   :  { %317 = vmatpush3.bf16.msra.mxu0 %v348_v12 }
  0x62   :  { %318 = vmatprep.subr.bf16.mxu0 %v349_v13 }
  0x65   :  { %319 = vmatpush3.bf16.msra.mxu0 %v350_v14 }
  0x66   :  { %320 = vmatprep.subr.bf16.mxu0 %v351_v15 }
  0x69   :  { %321 = vmatpush3.bf16.msra.mxu0 %v352_v16 }
  0x6c   :  { %252 = vmatmul.mubr.bf16.vlgmr.msra.gmra.mrb[0].mxu0 %v353_v17 }
 0x13f   :  { %v322_v18 = vpop.f32.mrb[0].mxu0 }
 0x140   :  { %v323_v20 = vpop.f32.mrb[1].mxu0 }
 0x141   :  { %v324_v21 = vadd.f32 %v323_v20, %v322_v18  ;;  %v325_v22 = vpop.f32.mrb[2].mxu0 }
 0x142   :  { %v326_v24 = vpop.f32.mrb[3].mxu0 }
 0x143   :  { %v254_v25 = vadd.f32 %v324_v21, %v287_v19  ;;  %v327_v26 = vadd.f32 %v326_v24, %v325_v22 }
 0x145   :  { %v262_v28 = vadd.f32 %v260_v23, %v254_v25  ;;  %v257_v29 = vadd.f32 %v327_v26, %v287_v19 }
 0x147   :  { %v263_v30 = vadd.f32 %v261_v27, %v257_v29  ;;  %265 = vst.msk [vmem:[#allocation10] sm:$0xff] %vm264_vm0, %v262_v28 }
 0x149   :  { %267 = vst.msk [vmem:[#allocation10 + $0x8] sm:$0x3] %vm266_vm1, %v263_v30 }
 0x14a   :  { %455 = shalt.err (!%p452_p8)
}
 0x14b   :  { %s456_s18 = scalar_lea.hbm %s588_s4, 256 }
 0x14c   :  { %p457_p9 = scmp.ne.s32.totalorder %s588_s4, %s456_s18  ;;  %p460_p10 = scmp.lt.u32.totalorder %s456_s18, %s588_s4 }
 0x14e   :  { %p462_p11 = pnand %p460_p10, %p457_p9 }
 0x150   :  { %465 = shalt.err (!%p462_p11)
}
 0x151   :  { %279 = dma.vmem_to_hbm [thread:$0]  %s274_s14, 256, %s588_s4, [#allocation4], %s478_s1, %s478_s1, %s479_s13  }
 0x152   :  { %472 = dma.done.wait [#allocation4], 256  }
 0x153   :  { %473 = vsyncadd [#allocation4], 4294967040 }
 0x154   :  { %283 = vsyncpa [#allocation3], 1 }
 0x155   :  { %284 = vsyncpa [#allocation6], 1 }
 0x156   :  { %285 = vsyncpa [#allocation9], 1 }
 0x157   :  { %286 = vsyncpa [#allocation4], 1 }

// kernel: _lambda_.37
= control target key start
LH: loop header
LB: loop body
LE: loop exit
PB: predicated region body
PF: predicated region fallthrough
CT: control target
= control target key end

     0   :  { %9 = vsyncpa [#allocation3], 0  ;;  %s447_s0 = inlined_call_operand.hbm [shape: f32[2,64], index: 0, kind: input, shape index: {}]   ;;  %s448_s1 = inlined_call_operand.hbm [shape: bf16[64,32], index: 1, kind: input, shape index: {}]   ;;  %s449_s2 = inlined_call_operand.hbm [shape: f32[1,64], index: 2, kind: input, shape index: {}]   ;;  %s450_s3 = inlined_call_operand.hbm [shape: f32[1,64], index: 3, kind: input, shape index: {}]   ;;  %s451_s4 = inlined_call_operand.hbm [shape: f32[2,32], index: 4, kind: output, shape index: {}]  }
   0x1   :  { %10 = vsyncpa [#allocation6], 0 }
   0x2   :  { %11 = vsyncpa [#allocation9], 0 }
   0x3   :  { %12 = vsyncpa [#allocation4], 0  ;;  %s353_s15 = smov [#allocation5]   ;;  %s235_s19 = scalar_lea.hbm %s448_s1, 512 }
   0x4   :  { %s28_s16 = sshll.u32 %s353_s15, 4  ;;  %p236_p0 = scmp.ne.s32.totalorder %s448_s1, %s235_s19  ;;  %s29_s16 = int_to_ptr.vmem [resolvable:$true] %s28_s16 }
   0x5   :  { %p239_p1 = scmp.lt.u32.totalorder %s235_s19, %s448_s1 }
   0x7   :  { %p241_p2 = pnand %p239_p1, %p236_p0 }
   0x9   :  { %244 = shalt.err (!%p241_p2)
}
   0xa   :  { %s245_s24 = scalar_lea.vmem %s29_s16, 512  ;;  %p250_p4 = scmp.lt.s32.totalorder %s29_s16, %s29_s16 }
   0xb   :  { %p246_p3 = scmp.ne.s32.totalorder %s29_s16, %s245_s24  ;;  %p251_p5 = scmp.lt.s32.totalorder %s245_s24, %s245_s24 }
   0xd   :  { %p252_p6 = por %p251_p5, %p250_p4 }
   0xf   :  { %p253_p7 = pnand %p252_p6, %p246_p3 }
  0x11   :  { %256 = shalt.err (!%p253_p7)
}
  0x12   :  { %s354_s25 = smov 64   ;;  %s355_s26 = smov 4  }
  0x13   :  { %34 = dma.hbm_to_vmem [thread:$0]  %s448_s1, 512, %s29_s16, [#allocation6], %s354_s25, %s354_s25, %s355_s26  }
  0x14   :  { %s356_s29 = smov [#allocation2]   ;;  %s357_s5 = smov [#allocation7]  }
  0x15   :  { %s19_s30 = sshll.u32 %s356_s29, 4  ;;  %s41_s6 = sshll.u32 %s357_s5, 4  ;;  %s20_s30 = int_to_ptr.vmem [resolvable:$true] %s19_s30  ;;  %s42_s6 = int_to_ptr.vmem [resolvable:$true] %s41_s6 }
  0x16   :  { %s257_s9 = scalar_lea.hbm %s447_s0, 32 }
  0x17   :  { %p258_p8 = scmp.ne.s32.totalorder %s447_s0, %s257_s9  ;;  %p261_p9 = scmp.lt.u32.totalorder %s257_s9, %s447_s0 }
  0x19   :  { %p263_p10 = pnand %p261_p9, %p258_p8 }
  0x1b   :  { %266 = shalt.err (!%p263_p10)
}
  0x1c   :  { %s267_s1 = scalar_lea.vmem %s20_s30, 32  ;;  %p272_p12 = scmp.lt.s32.totalorder %s20_s30, %s20_s30 }
  0x1d   :  { %p268_p11 = scmp.ne.s32.totalorder %s20_s30, %s267_s1  ;;  %p273_p13 = scmp.lt.s32.totalorder %s267_s1, %s267_s1 }
  0x1f   :  { %p274_p0 = por %p273_p13, %p272_p12 }
  0x21   :  { %p275_p1 = pnand %p274_p0, %p268_p11 }
  0x23   :  { %278 = shalt.err (!%p275_p1)
}
  0x24   :  { %22 = dma.hbm_to_vmem [thread:$0]  %s447_s0, 32, %s20_s30, [#allocation3]  }
  0x25   :  { %s279_s18 = scalar_lea.hbm %s449_s2, 16 }
  0x26   :  { %p280_p2 = scmp.ne.s32.totalorder %s449_s2, %s279_s18  ;;  %p283_p3 = scmp.lt.u32.totalorder %s279_s18, %s449_s2 }
  0x28   :  { %p285_p4 = pnand %p283_p3, %p280_p2 }
  0x2a   :  { %288 = shalt.err (!%p285_p4)
}
  0x2b   :  { %s289_s23 = scalar_lea.vmem %s42_s6, 16  ;;  %s293_s24 = scalar_lea.vmem %s42_s6, 32 }
  0x2c   :  { %p290_p5 = scmp.ne.s32.totalorder %s42_s6, %s289_s23  ;;  %p294_p6 = scmp.lt.s32.totalorder %s42_s6, %s42_s6 }
  0x2d   :  { %p295_p7 = scmp.lt.s32.totalorder %s293_s24, %s289_s23 }
  0x2f   :  { %p296_p8 = por %p295_p7, %p294_p6 }
  0x31   :  { %p297_p9 = pnand %p296_p8, %p290_p5 }
  0x33   :  { %300 = shalt.err (!%p297_p9)
}
  0x34   :  { %44 = dma.hbm_to_vmem [thread:$0]  %s449_s2, 16, %s42_s6, [#allocation6]  }
  0x35   :  { %s358_s26 = smov [#allocation8]   ;;  %s301_s30 = scalar_lea.hbm %s450_s3, 16 }
  0x36   :  { %s51_s27 = sshll.u32 %s358_s26, 4  ;;  %p302_p10 = scmp.ne.s32.totalorder %s450_s3, %s301_s30  ;;  %s52_s27 = int_to_ptr.vmem [resolvable:$true] %s51_s27 }
  0x37   :  { %p305_p11 = scmp.lt.u32.totalorder %s301_s30, %s450_s3 }
  0x39   :  { %p307_p12 = pnand %p305_p11, %p302_p10 }
  0x3b   :  { %310 = shalt.err (!%p307_p12)
}
  0x3c   :  { %s311_s10 = scalar_lea.vmem %s52_s27, 16  ;;  %s315_s2 = scalar_lea.vmem %s52_s27, 32 }
  0x3d   :  { %p312_p13 = scmp.ne.s32.totalorder %s52_s27, %s311_s10  ;;  %p316_p0 = scmp.lt.s32.totalorder %s52_s27, %s52_s27 }
  0x3e   :  { %p317_p1 = scmp.lt.s32.totalorder %s315_s2, %s311_s10 }
  0x40   :  { %p318_p2 = por %p317_p1, %p316_p0 }
  0x42   :  { %p319_p3 = pnand %p318_p2, %p312_p13 }
  0x44   :  { %322 = shalt.err (!%p319_p3)
}
  0x45   :  { %54 = dma.hbm_to_vmem [thread:$0]  %s450_s3, 16, %s52_s27, [#allocation9]  }
  0x46   :  { %345 = dma.done.wait [#allocation3], 32  }
  0x47   :  { %346 = vsyncadd [#allocation3], 4294967264 }
  0x48   :  { %347 = dma.done.wait [#allocation6], 528  }
  0x49   :  { %348 = vsyncadd [#allocation6], 4294966768 }
  0x4a   :  { %349 = dma.done.wait [#allocation9], 16  }
  0x4b   :  { %350 = vsyncadd [#allocation9], 4294967280  ;;  %vm69_vm0 = vcmask 517120   ;;  %v68_v0 = vld [vmem:[#allocation2] sm:$0x3]  ;;  %v229_v7 = vld [vmem:[#allocation5] sm:$0xff]  }
  0x4c   :  { %v70_v1 = vsel %vm69_vm0, %v68_v0, 0.0  ;;  %v359_v8 = vmov 0.0   ;;  %v230_v9 = vld [vmem:[#allocation5 + $0x8] sm:$0xff]   ;;  %v231_v10 = vld [vmem:[#allocation5 + $0x10] sm:$0xff]   ;;  %v232_v11 = vld [vmem:[#allocation5 + $0x18] sm:$0xff]   ;;  %vm360_vm1 = vmmov 0  }
  0x4d   :  { %71 = vadd.xlane.f32.xlu0 %v70_v1  ;;  %208 = vmatprep.subr.bf16.mxu0 %v359_v8  ;;  %v196_v16 = vld [vmem:[#allocation7] ss:$0 sm:$0xff]  ;;  %v197_v18 = vld [vmem:[#allocation8] ss:$0 sm:$0xff]  ;;  %vm133_vm2 = vcmask 523264   ;;  %s361_s3 = smov [#allocation10]  }
  0x4e   :  { %209 = vmatpush3.bf16.msra.mxu0 %v229_v7  ;;  %216 = vmatprep.mubr.msk.bf16.mxu0 %vm360_vm1, %v359_v8  ;;  %s185_s12 = sshll.u32 %s361_s3, 4  ;;  %vm177_vm3 = vcmask 254976   ;;  %s186_s12 = int_to_ptr.vmem [resolvable:$true] %s185_s12 }
  0x4f   :  { %210 = vmatprep.subr.bf16.mxu0 %v359_v8  ;;  %s323_s13 = scalar_lea.vmem %s186_s12, 32  ;;  %p328_p5 = scmp.lt.s32.totalorder %s186_s12, %s186_s12 }
  0x50   :  { %p324_p4 = scmp.ne.s32.totalorder %s186_s12, %s323_s13  ;;  %p329_p6 = scmp.lt.s32.totalorder %s323_s13, %s323_s13 }
  0x52   :  { %211 = vmatpush3.bf16.msra.mxu0 %v230_v9  ;;  %p330_p7 = por %p329_p6, %p328_p5 }
  0x53   :  { %212 = vmatprep.subr.bf16.mxu0 %v359_v8 }
  0x54   :  { %p331_p8 = pnand %p330_p7, %p324_p4 }
  0x56   :  { %213 = vmatpush3.bf16.msra.mxu0 %v231_v10 }
  0x57   :  { %214 = vmatprep.subr.bf16.mxu0 %v359_v8 }
  0x5a   :  { %215 = vmatpush3.bf16.msra.mxu0 %v232_v11 }
  0xda   :  { %v72_v2 = vpop.xlane.xlu0 %71 }
  0xdb   :  { %v74_v3 = vmul.f32 0.015625, %v72_v2 }
  0xdd   :  { %v75_v4 = vsub.f32 %v68_v0, %v74_v3 }
  0xdf   :  { %v76_v5 = vmul.f32 %v75_v4, %v75_v4 }
  0xe1   :  { %v77_v6 = vsel %vm69_vm0, %v76_v5, 0.0 }
  0xe2   :  { %78 = vadd.xlane.f32.xlu0 %v77_v6 }
 0x16f   :  { %v79_v12 = vpop.xlane.xlu0 %78 }
 0x170   :  { %v80_v13 = vmul.f32 0.015625, %v79_v12 }
 0x172   :  { %v81_v14 = vadd.f32 1e-05, %v80_v13 }
 0x174   :  { %233 = vrsqrt.f32 %v81_v14 }
 0x17e   :  { %v234_v15 = vpop.eup %233 }
 0x17f   :  { %v83_v17 = vmul.f32 %v234_v15, %v75_v4 }
 0x181   :  { %v91_v19 = vmul.f32 %v196_v16, %v83_v17 }
 0x183   :  { %v99_v20 = vadd.f32 %v197_v18, %v91_v19 }
 0x185   :  { %v100_v21 = vpack.c.bf16 %v99_v20, %v99_v20 }
 0x187   :  { %217 = vmatmul.mubr.msk.bf16.vlgmr.msra.gmra.mrb[0].mxu0 %vm133_vm2, %v100_v21 }
 0x25a   :  { %v171_v22 = vpop.f32.mrb[0].mxu0 }
 0x25b   :  { %v218_v23 = vpop.f32.mrb[1].mxu0  ;;  %178 = vst.msk [vmem:[#allocation10] sm:$0x3] %vm177_vm3, %v171_v22 }
 0x25c   :  { %v174_v24 = vpop.f32.mrb[2].mxu0 }
 0x25d   :  { %334 = shalt.err (!%p331_p8)
}
 0x25e   :  { %s335_s15 = scalar_lea.hbm %s451_s4, 32 }
 0x25f   :  { %p336_p9 = scmp.ne.s32.totalorder %s451_s4, %s335_s15  ;;  %p339_p10 = scmp.lt.u32.totalorder %s335_s15, %s451_s4 }
 0x261   :  { %p341_p11 = pnand %p339_p10, %p336_p9 }
 0x263   :  { %344 = shalt.err (!%p341_p11)
}
 0x264   :  { %188 = dma.vmem_to_hbm [thread:$0]  %s186_s12, 32, %s451_s4, [#allocation4]   ;;  %v219_v25 = vpop.f32.mrb[3].mxu0 }
 0x265   :  { %351 = dma.done.wait [#allocation4], 32  }
 0x266   :  { %352 = vsyncadd [#allocation4], 4294967264 }
 0x267   :  { %192 = vsyncpa [#allocation3], 1 }
 0x268   :  { %193 = vsyncpa [#allocation6], 1 }
 0x269   :  { %194 = vsyncpa [#allocation9], 1 }
 0x26a   :  { %195 = vsyncpa [#allocation4], 1 }

// kernel: _lambda_.38
= control target key start
LH: loop header
LB: loop body
LE: loop exit
PB: predicated region body
PF: predicated region fallthrough
CT: control target
= control target key end

     0   :  { %10 = vsyncpa [#allocation3], 0  ;;  %s534_s0 = inlined_call_operand.hbm [shape: f32[16,32], index: 0, kind: input, shape index: {}]   ;;  %s535_s1 = inlined_call_operand.hbm [shape: bf16[32,96], index: 1, kind: input, shape index: {}]   ;;  %s536_s2 = inlined_call_operand.hbm [shape: f32[1,32], index: 2, kind: input, shape index: {}]   ;;  %s537_s3 = inlined_call_operand.hbm [shape: f32[1,32], index: 3, kind: input, shape index: {}]   ;;  %s538_s4 = inlined_call_operand.hbm [shape: f32[1,96], index: 4, kind: input, shape index: {}]   ;;  %s539_s5 = inlined_call_operand.hbm [shape: bf16[16,96], index: 5, kind: output, shape index: {}]  }
   0x1   :  { %11 = vsyncpa [#allocation6], 0 }
   0x2   :  { %12 = vsyncpa [#allocation9], 0 }
   0x3   :  { %13 = vsyncpa [#allocation4], 0  ;;  %s409_s18 = smov [#allocation5]   ;;  %s269_s22 = scalar_lea.hbm %s535_s1, 256 }
   0x4   :  { %s31_s19 = sshll.u32 %s409_s18, 4  ;;  %p270_p0 = scmp.ne.s32.totalorder %s535_s1, %s269_s22  ;;  %s32_s19 = int_to_ptr.vmem [resolvable:$true] %s31_s19 }
   0x5   :  { %p273_p1 = scmp.lt.u32.totalorder %s269_s22, %s535_s1 }
   0x7   :  { %p275_p2 = pnand %p273_p1, %p270_p0 }
   0x9   :  { %278 = shalt.err (!%p275_p2)
}
   0xa   :  { %s279_s27 = scalar_lea.vmem %s32_s19, 256  ;;  %p284_p4 = scmp.lt.s32.totalorder %s32_s19, %s32_s19 }
   0xb   :  { %p280_p3 = scmp.ne.s32.totalorder %s32_s19, %s279_s27  ;;  %p285_p5 = scmp.lt.s32.totalorder %s279_s27, %s279_s27 }
   0xd   :  { %p286_p6 = por %p285_p5, %p284_p4 }
   0xf   :  { %p287_p7 = pnand %p286_p6, %p280_p3 }
  0x11   :  { %290 = shalt.err (!%p287_p7)
}
  0x12   :  { %s410_s28 = smov 64   ;;  %s411_s29 = smov 4  }
  0x13   :  { %37 = dma.hbm_to_vmem [thread:$0]  %s535_s1, 256, %s32_s19, [#allocation6], %s410_s28, %s410_s28, %s411_s29  }
  0x14   :  { %s412_s7 = smov [#allocation8]   ;;  %s413_s9 = smov [#allocation2]  }
  0x15   :  { %s54_s8 = sshll.u32 %s412_s7, 4  ;;  %s19_s10 = sshll.u32 %s413_s9, 4  ;;  %s55_s8 = int_to_ptr.vmem [resolvable:$true] %s54_s8  ;;  %s20_s10 = int_to_ptr.vmem [resolvable:$true] %s19_s10 }
  0x16   :  { %s291_s13 = scalar_lea.hbm %s537_s3, 16 }
  0x17   :  { %p292_p8 = scmp.ne.s32.totalorder %s537_s3, %s291_s13  ;;  %p295_p9 = scmp.lt.u32.totalorder %s291_s13, %s537_s3 }
  0x19   :  { %p297_p10 = pnand %p295_p9, %p292_p8 }
  0x1b   :  { %300 = shalt.err (!%p297_p10)
}
  0x1c   :  { %s301_s1 = scalar_lea.vmem %s55_s8, 16  ;;  %s305_s18 = scalar_lea.vmem %s55_s8, 32 }
  0x1d   :  { %p302_p11 = scmp.ne.s32.totalorder %s55_s8, %s301_s1  ;;  %p306_p12 = scmp.lt.s32.totalorder %s55_s8, %s55_s8 }
  0x1e   :  { %p307_p13 = scmp.lt.s32.totalorder %s305_s18, %s301_s1 }
  0x20   :  { %p308_p0 = por %p307_p13, %p306_p12 }
  0x22   :  { %p309_p1 = pnand %p308_p0, %p302_p11 }
  0x24   :  { %312 = shalt.err (!%p309_p1)
}
  0x25   :  { %57 = dma.hbm_to_vmem [thread:$0]  %s537_s3, 16, %s55_s8, [#allocation9]  }
  0x26   :  { %s313_s23 = scalar_lea.hbm %s534_s0, 256 }
  0x27   :  { %p314_p2 = scmp.ne.s32.totalorder %s534_s0, %s313_s23  ;;  %p317_p3 = scmp.lt.u32.totalorder %s313_s23, %s534_s0 }
  0x29   :  { %p319_p4 = pnand %p317_p3, %p314_p2 }
  0x2b   :  { %322 = shalt.err (!%p319_p4)
}
  0x2c   :  { %s323_s30 = scalar_lea.vmem %s20_s10, 256  ;;  %p328_p6 = scmp.lt.s32.totalorder %s20_s10, %s20_s10 }
  0x2d   :  { %p324_p5 = scmp.ne.s32.totalorder %s20_s10, %s323_s30  ;;  %p329_p7 = scmp.lt.s32.totalorder %s323_s30, %s323_s30 }
  0x2f   :  { %p330_p8 = por %p329_p7, %p328_p6 }
  0x31   :  { %p331_p9 = pnand %p330_p8, %p324_p5 }
  0x33   :  { %334 = shalt.err (!%p331_p9)
}
  0x34   :  { %s414_s3 = smov 128   ;;  %s415_s6 = smov 8  }
  0x35   :  { %25 = dma.hbm_to_vmem [thread:$0]  %s534_s0, 256, %s20_s10, [#allocation3], %s414_s3, %s414_s3, %s415_s6  }
  0x36   :  { %s416_s9 = smov [#allocation7]   ;;  %s417_s12 = smov [#allocation10]  }
  0x37   :  { %s44_s11 = sshll.u32 %s416_s9, 4  ;;  %s64_s13 = sshll.u32 %s417_s12, 4  ;;  %s45_s11 = int_to_ptr.vmem [resolvable:$true] %s44_s11  ;;  %s65_s13 = int_to_ptr.vmem [resolvable:$true] %s64_s13 }
  0x38   :  { %s335_s16 = scalar_lea.hbm %s536_s2, 16 }
  0x39   :  { %p336_p10 = scmp.ne.s32.totalorder %s536_s2, %s335_s16  ;;  %p339_p11 = scmp.lt.u32.totalorder %s335_s16, %s536_s2 }
  0x3b   :  { %p341_p12 = pnand %p339_p11, %p336_p10 }
  0x3d   :  { %344 = shalt.err (!%p341_p12)
}
  0x3e   :  { %s345_s0 = scalar_lea.vmem %s45_s11, 16  ;;  %s349_s10 = scalar_lea.vmem %s45_s11, 32 }
  0x3f   :  { %p346_p13 = scmp.ne.s32.totalorder %s45_s11, %s345_s0  ;;  %p350_p0 = scmp.lt.s32.totalorder %s45_s11, %s45_s11 }
  0x40   :  { %p351_p1 = scmp.lt.s32.totalorder %s349_s10, %s345_s0 }
  0x42   :  { %p352_p2 = por %p351_p1, %p350_p0 }
  0x44   :  { %p353_p3 = pnand %p352_p2, %p346_p13 }
  0x46   :  { %356 = shalt.err (!%p353_p3)
}
  0x47   :  { %47 = dma.hbm_to_vmem [thread:$0]  %s536_s2, 16, %s45_s11, [#allocation6]  }
  0x48   :  { %s357_s24 = scalar_lea.hbm %s538_s4, 16 }
  0x49   :  { %p358_p4 = scmp.ne.s32.totalorder %s538_s4, %s357_s24  ;;  %p361_p5 = scmp.lt.u32.totalorder %s357_s24, %s538_s4 }
  0x4b   :  { %p363_p6 = pnand %p361_p5, %p358_p4 }
  0x4d   :  { %366 = shalt.err (!%p363_p6)
}
  0x4e   :  { %s367_s3 = scalar_lea.vmem %s65_s13, 16  ;;  %s371_s6 = scalar_lea.vmem %s65_s13, 32 }
  0x4f   :  { %p368_p7 = scmp.ne.s32.totalorder %s65_s13, %s367_s3  ;;  %p372_p8 = scmp.lt.s32.totalorder %s65_s13, %s65_s13 }
  0x50   :  { %p373_p9 = scmp.lt.s32.totalorder %s371_s6, %s367_s3 }
  0x52   :  { %p374_p10 = por %p373_p9, %p372_p8 }
  0x54   :  { %p375_p11 = pnand %p374_p10, %p368_p7 }
  0x56   :  { %378 = shalt.err (!%p375_p11)
}
  0x57   :  { %67 = dma.hbm_to_vmem [thread:$0]  %s538_s4, 16, %s65_s13, [#allocation9]  }
  0x58   :  { %401 = dma.done.wait [#allocation3], 256  }
  0x59   :  { %402 = vsyncadd [#allocation3], 4294967040 }
  0x5a   :  { %403 = dma.done.wait [#allocation6], 272  }
  0x5b   :  { %404 = vsyncadd [#allocation6], 4294967024 }
  0x5c   :  { %405 = dma.done.wait [#allocation9], 32  }
  0x5d   :  { %406 = vsyncadd [#allocation9], 4294967264  ;;  %vm86_vm0 = vcmask 261120   ;;  %v84_v0 = vld [vmem:[#allocation2] sm:$0xff]  ;;  %v85_v1 = vld [vmem:[#allocation2 + $0x8] sm:$0xff]  ;;  %v418_v15 = vmov 0.0  }
  0x5e   :  { %v87_v2 = vsel %vm86_vm0, %v84_v0, 0.0  ;;  %v90_v3 = vsel %vm86_vm0, %v85_v1, 0.0  ;;  %v263_v14 = vld [vmem:[#allocation5] sm:$0xff]   ;;  %243 = vmatprep.subr.bf16.mxu0 %v418_v15  ;;  %v264_v16 = vld [vmem:[#allocation5 + $0x8] sm:$0xff]   ;;  %vm419_vm1 = vmmov 0   ;;  %vm208_vm2 = vcmask 781312  }
  0x5f   :  { %88 = vadd.xlane.f32.xlu0 %v87_v2  ;;  %244 = vmatpush3.bf16.msra.mxu0 %v263_v14  ;;  %v230_v25 = vld [vmem:[#allocation7] ss:$0 sm:$0xff]  ;;  %v231_v29 = vld [vmem:[#allocation8] ss:$0 sm:$0xff]  ;;  %v232_v34 = vld [vmem:[#allocation10] ss:$0 sm:$0xff] }
  0x60   :  { %247 = vmatprep.mubr.msk.bf16.mxu0 %vm419_vm1, %v418_v15  ;;  %245 = vmatprep.subr.bf16.mxu0 %v418_v15  ;;  %s420_s4 = smov [#allocation11]  }
  0x61   :  { %s216_s8 = sshll.u32 %s420_s4, 4  ;;  %s217_s8 = int_to_ptr.vmem [resolvable:$true] %s216_s8 }
  0x62   :  { %s379_s9 = scalar_lea.vmem %s217_s8, 128  ;;  %p384_p13 = scmp.lt.s32.totalorder %s217_s8, %s217_s8 }
  0x63   :  { %91 = vadd.xlane.f32.xlu0 %v90_v3  ;;  %246 = vmatpush3.bf16.msra.mxu0 %v264_v16  ;;  %p380_p12 = scmp.ne.s32.totalorder %s217_s8, %s379_s9  ;;  %p385_p0 = scmp.lt.s32.totalorder %s379_s9, %s379_s9 }
  0x65   :  { %p386_p1 = por %p385_p0, %p384_p13 }
  0x67   :  { %p387_p2 = pnand %p386_p1, %p380_p12 }
  0xec   :  { %v89_v4 = vpop.xlane.xlu0 %88 }
  0xed   :  { %v94_v5 = vmul.f32 0.03125, %v89_v4 }
  0xef   :  { %v96_v6 = vsub.f32 %v84_v0, %v94_v5 }
  0xf0   :  { %v92_v7 = vpop.xlane.xlu0 %91 }
  0xf1   :  { %v95_v8 = vmul.f32 0.03125, %v92_v7  ;;  %v98_v9 = vmul.f32 %v96_v6, %v96_v6 }
  0xf3   :  { %v97_v10 = vsub.f32 %v85_v1, %v95_v8  ;;  %v100_v11 = vsel %vm86_vm0, %v98_v9, 0.0 }
  0xf4   :  { %101 = vadd.xlane.f32.xlu1 %v100_v11 }
  0xf5   :  { %v99_v12 = vmul.f32 %v97_v10, %v97_v10 }
  0xf7   :  { %v103_v13 = vsel %vm86_vm0, %v99_v12, 0.0 }
  0xf8   :  { %104 = vadd.xlane.f32.xlu1 %v103_v13 }
 0x181   :  { %v102_v17 = vpop.xlane.xlu1 %101 }
 0x182   :  { %v106_v18 = vmul.f32 0.03125, %v102_v17 }
 0x184   :  { %v108_v19 = vadd.f32 1e-05, %v106_v18 }
 0x185   :  { %v105_v20 = vpop.xlane.xlu1 %104 }
 0x186   :  { %265 = vrsqrt.f32 %v108_v19  ;;  %v107_v21 = vmul.f32 0.03125, %v105_v20 }
 0x188   :  { %v109_v22 = vadd.f32 1e-05, %v107_v21 }
 0x18a   :  { %267 = vrsqrt.f32 %v109_v22 }
 0x190   :  { %v266_v23 = vpop.eup %265 }
 0x191   :  { %v112_v24 = vmul.f32 %v266_v23, %v96_v6 }
 0x193   :  { %v121_v28 = vmul.f32 %v230_v25, %v112_v24 }
 0x194   :  { %v268_v26 = vpop.eup %267 }
 0x195   :  { %v113_v27 = vmul.f32 %v268_v26, %v97_v10  ;;  %v130_v31 = vadd.f32 %v231_v29, %v121_v28 }
 0x197   :  { %v122_v30 = vmul.f32 %v230_v25, %v113_v27 }
 0x199   :  { %v131_v32 = vadd.f32 %v231_v29, %v122_v30 }
 0x19b   :  { %v132_v33 = vpack.c.bf16 %v131_v32, %v130_v31 }
 0x19d   :  { %248 = vmatmul.mubr.msk.bf16.vlgmr.msra.gmra.mrb[0].mxu0 %vm86_vm0, %v132_v33 }
 0x270   :  { %v193_v35 = vpop.f32.mrb[0].mxu0 }
 0x271   :  { %v194_v36 = vadd.f32 %v232_v34, %v193_v35  ;;  %v249_v37 = vpop.f32.mrb[1].mxu0 }
 0x272   :  { %v196_v38 = vpop.f32.mrb[2].mxu0 }
 0x273   :  { %v238_v39 = vpack.c.bf16 %v194_v36, %v194_v36  ;;  %v197_v40 = vadd.f32 %v232_v34, %v196_v38  ;;  %v250_v41 = vpop.f32.mrb[3].mxu0 }
 0x275   :  { %v239_v42 = vpack.c.bf16 %v197_v40, %v197_v40  ;;  %209 = vst.msk [vmem:[#allocation11] sm:$0xf] %vm208_vm2, %v238_v39 }
 0x277   :  { %210 = vst.msk [vmem:[#allocation11 + $0x4] sm:$0xf] %vm208_vm2, %v239_v42 }
 0x278   :  { %390 = shalt.err (!%p387_p2)
}
 0x279   :  { %s391_s13 = scalar_lea.hbm %s539_s5, 128 }
 0x27a   :  { %p392_p3 = scmp.ne.s32.totalorder %s539_s5, %s391_s13  ;;  %p395_p4 = scmp.lt.u32.totalorder %s391_s13, %s539_s5 }
 0x27c   :  { %p397_p5 = pnand %p395_p4, %p392_p3 }
 0x27e   :  { %400 = shalt.err (!%p397_p5)
}
 0x27f   :  { %222 = dma.vmem_to_hbm [thread:$0]  %s217_s8, 128, %s539_s5, [#allocation4], %s410_s28, %s410_s28, %s411_s29  }
 0x280   :  { %407 = dma.done.wait [#allocation4], 128  }
 0x281   :  { %408 = vsyncadd [#allocation4], 4294967168 }
 0x282   :  { %226 = vsyncpa [#allocation3], 1 }
 0x283   :  { %227 = vsyncpa [#allocation6], 1 }
 0x284   :  { %228 = vsyncpa [#allocation9], 1 }
 0x285   :  { %229 = vsyncpa [#allocation4], 1 }

// kernel: _lambda_.39
= control target key start
LH: loop header
LB: loop body
LE: loop exit
PB: predicated region body
PF: predicated region fallthrough
CT: control target
= control target key end

     0   :  { %s1204_s0 = inlined_call_operand.hbm [shape: bf16[8,8,8], index: 0, kind: input, shape index: {}]   ;;  %s1205_s1 = inlined_call_operand.hbm [shape: bf16[8,8,8], index: 1, kind: input, shape index: {}]   ;;  %s1206_s2 = inlined_call_operand.hbm [shape: bf16[8,8,8], index: 2, kind: input, shape index: {}]   ;;  %s1207_s3 = inlined_call_operand.hbm [shape: bf16[8,8,8], index: 3, kind: output, shape index: {}]  }
   0x1   :  { %1213 = sst [smem:[#allocation18_spill]] %s1205_s1 }
   0x2   :  { %8 = vsyncpa [#allocation6], 0 }
   0x3   :  { %10 = vsyncpa [#allocation6 + $0x1], 0 }
   0x4   :  { %11 = vsyncpa [#allocation9], 0 }
   0x5   :  { %13 = vsyncpa [#allocation9 + $0x1], 0 }
   0x6   :  { %14 = vsyncpa [#allocation7], 0 }
   0x7   :  { %16 = vsyncpa [#allocation7 + $0x1], 0  ;;  %s931_s12 = smov 0   ;;  %s933_s13 = smov 0  }
   0x8   :  { %s935_s14 = smov 0   ;;  %s937_s15 = smov 0  }
   0x9   :  { %s939_s16 = smov 0   ;;  %s941_s17 = smov 0  }
   0xa LB: > { %1214 = sst [smem:[#allocation15_spill]] %s897_s16  ;;  %s962_s18 = sadd.s32 4294967295, %s901_s17   ;;  %s901_s17 = sphi %s941_s17, %s22_s17   ;;  %s897_s16 = sphi %s939_s16, %s1234_s16   ;;  %s893_s15 = sphi %s937_s15, %s1233_s15   ;;  %s889_s14 = sphi %s935_s14, %s1237_s14   ;;  %s885_s13 = sphi %s933_s13, %s1236_s13   ;;  %s881_s12 = sphi %s931_s12, %s1235_s12  }
   0xb   : > { %s605_s19 = sadd.s32 4294967294, %s901_s17   ;;  %s41_s20 = sadd.s32 1, %s897_s16 }
   0xc   : > { %s50_s21 = sadd.s32 1, %s889_s14  ;;  %p43_p0 = scmp.ge.s32.totalorder %s41_s20, 8 }
   0xd   : > { %p57_p1 = scmp.ne.s32.totalorder %s889_s14, %s885_s13  ;;  %p58_p2 = scmp.eq.s32.totalorder %s901_s17, 0 }
   0xe   : > { %p63_p3 = scmp.ne.s32.totalorder %s885_s13, %s881_s12  ;;  %s1239_s20 = smov (%p43_p0, %s41_s20), 0 }
   0xf   : > { %1215 = sst [smem:[#allocation16_spill]] %s1239_s20  ;;  %p974_p4 = por %p58_p2, %p57_p1 }
  0x10   : > { %p64_p5 = scmp.eq.s32.totalorder %s962_s18, 0  ;;  %s45_s23 = ssub.s32 %s897_s16, %s1239_s20 }
  0x11   : > { %p145_p6 = scmp.eq.s32.totalorder %s962_s18, 7  ;;  %p48_p7 = scmp.eq.s32.totalorder %s45_s23, 0 }
  0x12   : > { %p982_p8 = por %p64_p5, %p63_p3  ;;  %p151_p10 = scmp.eq.s32.totalorder %s605_s19, 7 }
  0x13   : > { %p986_p9 = por %p145_p6, %p57_p1  ;;  %p663_p12 = scmp.lt.s32.totalorder %s901_s17, 8 }
  0x14   : > { %s1217_s24 = scalar_select %p982_p8, 1, 0 }
  0x15   : > { %s1218_s25 = scalar_select %p986_p9, 1, 0 }
  0x16   : > { %s991_s26 = scalar_select %p48_p7, %s889_s14, %s50_s21  }
  0x17   : > { %p993_p11 = por %p151_p10, %p63_p3  ;;  %s171_s28 = sand.u32 1, %s889_s14  }
  0x18   : > { %1219 = sst [smem:[#allocation17_spill]] %s991_s26  ;;  %s1001_s29 = sshll.u32 %s171_s28, 2 }
  0x19   : > { %s1220_s27 = scalar_select %p993_p11, 1, 0 }
  0x1a   : > { %s1004_s30 = sshll.u32 %s897_s16, 6  ;;  %p1008_p13 = pnand %p663_p12, %p974_p4 }
  0x1b   : > { %s190_s5 = sand.u32 1, %s901_s17   ;;  %s1222_s1 = sld [smem:[#allocation18_spill]] }
  0x1c   : > { %s1221_s4 = scalar_select %p1008_p13, 1, 0 }
  0x1d   : > { %s194_s9 = scalar_lea.vmem [#allocation8], %s1001_s29  ;;  %s1024_s11 = scalar_lea.sflag [#allocation9], %s190_s5 }
  0x1e   : > { %s202_s10 = sshll.u32 %s194_s9, 4  ;;  %p1030_p3 = pneg %p1008_p13  ;;  %s1021_s10 = int_to_ptr.vmem [resolvable:$true] %s202_s10 }
  0x21   : > { %s1017_s8 = scalar_lea.hbm %s1222_s1, %s1004_s30  ;;  %s730_s6 = scalar_lea.hbm %s1222_s1, 512 }
  0x22   : > { %s725_s19 = scalar_lea.hbm %s1017_s8, 64  ;;  %p731_p6 = scmp.lt.u32.totalorder %s1017_s8, %s1222_s1 }
  0x23   : > { %p726_p2 = scmp.ne.s32.totalorder %s1017_s8, %s725_s19  ;;  %p732_p7 = scmp.lt.u32.totalorder %s730_s6, %s725_s19 }
  0x24   : > { %p734_p12 = scmp.lt.u32.totalorder %s725_s19, %s1017_s8 }
  0x25   : > { %p728_p4 = pnand %p1030_p3, %p726_p2  ;;  %p733_p10 = por %p732_p7, %p731_p6 }
  0x27   : > { %p729_p5 = pneg %p728_p4  ;;  %p735_p0 = por %p734_p12, %p733_p10 }
  0x29   : > { %p736_p1 = pnand %p735_p0, %p729_p5 }
  0x2b   : > { %739 = shalt.err (!%p736_p1)
}
  0x2c   : > { %s740_s5 = scalar_lea.vmem %s1021_s10, 64  ;;  %s903_s22 = smov [#allocation8]  }
  0x2d   : > { %p741_p2 = scmp.ne.s32.totalorder %s1021_s10, %s740_s5  ;;  %s745_s23 = sshll.u32 %s903_s22, 4  ;;  %s746_s23 = int_to_ptr.vmem [resolvable:$false] %s745_s23 }
  0x2e   : > { %s747_s7 = scalar_lea.vmem %s746_s23, 128  ;;  %p748_p9 = scmp.lt.s32.totalorder %s1021_s10, %s746_s23 }
  0x2f   : > { %p743_p4 = pnand %p741_p2, %p1030_p3  ;;  %p749_p8 = scmp.lt.s32.totalorder %s747_s7, %s740_s5 }
  0x31   : > { %p744_p11 = pneg %p743_p4  ;;  %p750_p6 = por %p749_p8, %p748_p9 }
  0x33   : > { %p751_p7 = pnand %p750_p6, %p744_p11 }
  0x35   : > { %754 = shalt.err (!%p751_p7)
}
  0x36   : > { %655 = dma.hbm_to_vmem [thread:$0]  (!%p1008_p13), %s1017_s8, 64, %s1021_s10, %s1024_s11  }
  0x37   : > { %p1224_p0 = scmp.lt.s32.totalorder %s901_s17, 9  ;;  %p1225_p1 = scmp.ge.s32.totalorder %s901_s17, 1 }
  0x38   : > { %s1066_s5 = scalar_lea.hbm %s1204_s0, %s1004_s30  ;;  %s175_s22 = scalar_lea.vmem [#allocation5], %s1001_s29 }
  0x39   : > { %p1058_p5 = pnand %p1225_p1, %p1224_p0  ;;  %s183_s23 = sshll.u32 %s175_s22, 4  ;;  %s1069_s23 = int_to_ptr.vmem [resolvable:$true] %s183_s23 }
  0x3a   : > { %s1075_s7 = scalar_lea.hbm %s1206_s2, %s1004_s30  ;;  %s172_s1 = scalar_lea.sflag [#allocation6], %s171_s28 }
  0x3b   : > { %s1226_s19 = scalar_select %p1058_p5, 1, 0 }
  0x3c   : > { %s755_s20 = scalar_lea.hbm %s1066_s5, 64  ;;  %s760_s16 = scalar_lea.hbm %s1204_s0, 512 }
  0x3d   : > { %p756_p8 = scmp.ne.s32.totalorder %s1066_s5, %s755_s20  ;;  %p761_p10 = scmp.lt.u32.totalorder %s1066_s5, %s1204_s0 }
  0x3e   : > { %p762_p12 = scmp.lt.u32.totalorder %s760_s16, %s755_s20  ;;  %p764_p4 = scmp.lt.u32.totalorder %s755_s20, %s1066_s5 }
  0x3f   : > { %p758_p9 = pnand %p756_p8, %p1030_p3 }
  0x40   : > { %p763_p2 = por %p762_p12, %p761_p10 }
  0x41   : > { %p759_p11 = pneg %p758_p9 }
  0x42   : > { %p765_p6 = por %p764_p4, %p763_p2 }
  0x44   : > { %p766_p7 = pnand %p765_p6, %p759_p11 }
  0x46   : > { %769 = shalt.err (!%p766_p7)
}
  0x47   : > { %s770_s28 = scalar_lea.vmem %s1069_s23, 64  ;;  %s904_s30 = smov [#allocation5]  }
  0x48   : > { %p771_p0 = scmp.ne.s32.totalorder %s1069_s23, %s770_s28  ;;  %s775_s8 = sshll.u32 %s904_s30, 4  ;;  %s776_s8 = int_to_ptr.vmem [resolvable:$false] %s775_s8 }
  0x49   : > { %s777_s26 = scalar_lea.vmem %s776_s8, 128  ;;  %p778_p9 = scmp.lt.s32.totalorder %s1069_s23, %s776_s8 }
  0x4a   : > { %p773_p1 = pnand %p771_p0, %p1030_p3  ;;  %p779_p5 = scmp.lt.s32.totalorder %s777_s26, %s770_s28 }
  0x4c   : > { %p774_p8 = pneg %p773_p1  ;;  %p780_p10 = por %p779_p5, %p778_p9 }
  0x4e   : > { %p781_p12 = pnand %p780_p10, %p774_p8 }
  0x50   : > { %784 = shalt.err (!%p781_p12)
}
  0x51   : > { %652 = dma.hbm_to_vmem [thread:$0]  (!%p1008_p13), %s1066_s5, 64, %s1069_s23, %s172_s1  }
  0x52   : > { %s213_s16 = scalar_lea.vmem [#allocation10], %s1001_s29  ;;  %s785_s10 = scalar_lea.hbm %s1075_s7, 64 }
  0x53   : > { %s221_s20 = sshll.u32 %s213_s16, 4  ;;  %p786_p11 = scmp.ne.s32.totalorder %s1075_s7, %s785_s10  ;;  %s222_s20 = int_to_ptr.vmem [resolvable:$true] %s221_s20 }
  0x54   : > { %s790_s22 = scalar_lea.hbm %s1206_s2, 512  ;;  %p791_p4 = scmp.lt.u32.totalorder %s1075_s7, %s1206_s2 }
  0x55   : > { %p788_p5 = pnand %p786_p11, %p1030_p3  ;;  %p792_p6 = scmp.lt.u32.totalorder %s790_s22, %s785_s10 }
  0x56   : > { %p794_p0 = scmp.lt.u32.totalorder %s785_s10, %s1075_s7 }
  0x57   : > { %p789_p2 = pneg %p788_p5  ;;  %p793_p7 = por %p792_p6, %p791_p4 }
  0x59   : > { %p795_p1 = por %p794_p0, %p793_p7 }
  0x5b   : > { %p796_p8 = pnand %p795_p1, %p789_p2 }
  0x5d   : > { %799 = shalt.err (!%p796_p8)
}
  0x5e   : > { %s800_s1 = scalar_lea.vmem %s222_s20, 64  ;;  %s905_s29 = smov [#allocation10]  }
  0x5f   : > { %p801_p9 = scmp.ne.s32.totalorder %s222_s20, %s800_s1  ;;  %s805_s5 = sshll.u32 %s905_s29, 4  ;;  %s806_s5 = int_to_ptr.vmem [resolvable:$false] %s805_s5 }
  0x60   : > { %s807_s23 = scalar_lea.vmem %s806_s5, 128  ;;  %p808_p11 = scmp.lt.s32.totalorder %s222_s20, %s806_s5 }
  0x61   : > { %p803_p10 = pnand %p801_p9, %p1030_p3  ;;  %p809_p5 = scmp.lt.s32.totalorder %s807_s23, %s800_s1 }
  0x63   : > { %p804_p12 = pneg %p803_p10  ;;  %p810_p13 = por %p809_p5, %p808_p11 }
  0x65   : > { %p811_p4 = pnand %p810_p13, %p804_p12 }
  0x67   : > { %814 = shalt.err (!%p811_p4)
}
  0x68   : > { %p1227_p6 = scmp.ne.s32.totalorder %s1221_s4, 0  ;;  %p1228_p2 = scmp.ne.s32.totalorder %s1226_s19, 0 }
  0x69   : > { %s1122_s21 = sand.u32 (!%p1228_p2), 1, %s885_s13   ;;  %p1229_p13 = scmp.ne.s32.totalorder (!%p1228_p2), %s1217_s24, 0 }
  0x6a   : > { %658 = dma.hbm_to_vmem [thread:$0]  (!%p1227_p6), %s1075_s7, 64, %s222_s20, %s1024_s11  }
  0x6b   : > { %230 = sbr.rel (%p1228_p2) target bundleno = 939 (0x3ab), region = 32  ;;  %s1125_s8 = sshll.u32 (!%p1228_p2), %s1122_s21, 2 }
  0x6c   : > { %s233_s26 = scalar_lea.sflag (!%p1228_p2), [#allocation6], %s1122_s21  ;;  %s236_s16 = scalar_lea.vmem (!%p1228_p2), [#allocation5], %s1125_s8 }
  0x72   : > { %868 = dma.done.wait (%p1229_p13), %s233_s26, 64  }
  0x73   : > { %870 = vsyncadd (%p1229_p13), %s233_s26, 4294967232  ;;  %s241_s4 = sand.u32 1, %s962_s18   ;;  %s245_s19 = scalar_lea.vmem [#allocation8], %s1125_s8 }
  0x74   : > { %s242_s11 = scalar_lea.sflag [#allocation9], %s241_s4 }
  0x75   : > { %872 = dma.done.wait (%p1229_p13), %s242_s11, 128  }
  0x76   : > { %874 = vsyncadd (%p1229_p13), %s242_s11, 4294967168  ;;  %vm295_vm0 = vcmask 64512   ;;  %v906_v0 = vmov 0.0   ;;  %vm907_vm1 = vmmov 0   ;;  %v305_v1 = vld [vmem:[%s245_s19] sm:$0xf]  ;;  %v354_v5 = vlaneseq }
  0x77   : > { %629 = vmatprep.subr.bf16.mxu0 %v906_v0  ;;  %296 = vst.msk [vmem:[#allocation4] sm:$0xff] %vm295_vm0, %v906_v0  ;;  %631 = vmatprep.mubr.msk.bf16.mxu0 %vm907_vm1, %v906_v0  ;;  %v312_v2 = vsel %vm295_vm0, %v305_v1, 0  ;;  %v304_v3 = vld [vmem:[%s236_s16] sm:$0xf]  ;;  %vm292_vm2 = vcmask 7168   ;;  %v908_v4 = vmov -inf  }
  0x78   : > { %635 = vmatprep.subr.bf16.mxu1 %v906_v0  ;;  %637 = vmatprep.mubr.msk.bf16.mxu1 %vm907_vm1, %v906_v0  ;;  %293 = vst.msk [vmem:[#allocation2] sm:$0xff] %vm292_vm2, %v908_v4  ;;  %294 = vst.msk [vmem:[#allocation3] sm:$0xff] %vm292_vm2, %v906_v0  ;;  %v355_v6 = vand.u32 127, %v354_v5  ;;  %v359_v7 = vshrl.u32 %v354_v5, 7  ;;  %v909_v14 = vmov 0   ;;  %vm399_vm4 = vcmask 1043456  }
  0x79   : > { %630 = vmatpush3.bf16.xpose.msra.mxu0 %v312_v2  ;;  %717 = vset.pattern.permute.xlu0 %v909_v14  ;;  %s254_s18 = scalar_lea.vmem [#allocation10], %s1125_s8  ;;  %s622_s24 = sshll.u32 %s893_s15, 6  ;;  %vm459_vm5 = vcmask 60416  }
  0x7a   : > { %vm362_vm3 = vcmp.le.s32.totalorder %v355_v6, %v359_v7  ;;  %718 = vset.pattern.permute.xlu1 %v909_v14  ;;  %v306_v19 = vld [vmem:[%s254_s18] sm:$0xf]  ;;  %s286_s7 = scalar_lea.vmem [#allocation11], %s1125_s8  ;;  %s1156_s9 = scalar_lea.hbm %s1207_s3, %s622_s24 }
  0x7b   : > { %v401_v20 = vsel %vm399_vm4, %v306_v19, 0  ;;  %s476_s20 = sshll.u32 %s286_s7, 4  ;;  %s462_s22 = scalar_lea.sflag [#allocation7], %s1122_s21  ;;  %s1158_s20 = int_to_ptr.vmem [resolvable:$true] %s476_s20 }
  0x7c   : > { %636 = vmatpush3.bf16.msra.mxu1 %v401_v20  ;;  %s815_s28 = scalar_lea.vmem %s1158_s20, 64  ;;  %p1230_p7 = scmp.ne.s32.totalorder %s1218_s25, 0 }
  0x7d   : > { %p816_p3 = scmp.ne.s32.totalorder %s1158_s20, %s815_s28  ;;  %s910_s15 = smov [#allocation11]  }
  0x7e   : > { %v388_v34 = vld [vmem:[#allocation4] sm:$0xff]  ;;  %s819_s30 = sshll.u32 %s910_s15, 4  ;;  %s820_s30 = int_to_ptr.vmem [resolvable:$false] %s819_s30 }
  0x7f   : > { %v364_v15 = vld [vmem:[#allocation2] sm:$0xff]  ;;  %v380_v29 = vld [vmem:[#allocation3] sm:$0xff]  ;;  %p817_p0 = pnand %p816_p3, %p1230_p7  ;;  %s821_s1 = scalar_lea.vmem %s820_s30, 128 }
  0x80   : > { %632 = vmatmul.mubr.msk.bf16.vlgmr.msra.gmra.mrb[0].mxu0 %vm295_vm0, %v304_v3  ;;  %p822_p8 = scmp.lt.s32.totalorder %s1158_s20, %s820_s30  ;;  %p823_p9 = scmp.lt.s32.totalorder %s821_s1, %s815_s28 }
  0x81   : > { %p818_p1 = pneg %p817_p0 }
  0x82   : > { %p824_p10 = por %p823_p9, %p822_p8 }
  0x84   : > { %p825_p12 = pnand %p824_p10, %p818_p1 }
 0x153   : > { %v348_v8 = vpop.f32.mrb[0].mxu0 }
 0x154   : > { %v363_v9 = vsel %vm362_vm3, %v348_v8, -inf  ;;  %v633_v10 = vpop.f32.mrb[1].mxu0 }
 0x155   : > { %v351_v11 = vpop.f32.mrb[2].mxu0  ;;  %v365_v12 = vsel %vm295_vm0, %v363_v9, -inf }
 0x156   : > { %366 = vmax.xlane.f32.xlu0 %v365_v12  ;;  %v634_v13 = vpop.f32.mrb[3].mxu0 }
 0x1e3   : > { %v367_v16 = vpop.xlane.xlu0 %366 }
 0x1e4   : > { %v368_v17 = vmax.f32 %v364_v15, %v367_v16 }
 0x1e6   : > { %v369_v18 = vsub.f32 %v364_v15, %v368_v17  ;;  %445 = vst.msk [vmem:[#allocation2] sm:$0xff] %vm292_vm2, %v368_v17  ;;  %374 = vperm.xlu0 %717, %v368_v17  }
 0x1e8   : > { %v370_v27 = vmul.f32 1.442695, %v369_v18 }
 0x265   : > { %v375_v21 = vpop.permute.xlu0 %374 }
 0x266   : > { %v377_v22 = vsub.f32 %v363_v9, %v375_v21 }
 0x268   : > { %v378_v23 = vmul.f32 1.442695, %v377_v22 }
 0x26a   : > { %719 = vpow2.f32 %v378_v23 }
 0x26b   : > { %721 = vpow2.f32 %v370_v27 }
 0x274   : > { %v720_v24 = vpop.eup %719 }
 0x275   : > { %v382_v25 = vsel %vm295_vm0, %v720_v24, 0.0  ;;  %v395_v26 = vpack.c.bf16 %v720_v24, %v720_v24  ;;  %v722_v28 = vpop.eup %721 }
 0x276   : > { %383 = vadd.xlane.f32.xlu1 %v382_v25  ;;  %v381_v30 = vmul.f32 %v722_v28, %v380_v29 }
 0x277   : > { %638 = vmatmul.mubr.msk.bf16.vlgmr.msra.gmra.mrb[0].mxu1 %vm295_vm0, %v395_v26 }
 0x287   : > { %391 = vperm.xlu1 %718, %v722_v28  }
 0x303   : > { %v384_v31 = vpop.xlane.xlu1 %383 }
 0x304   : > { %v385_v32 = vadd.f32 %v384_v31, %v381_v30 }
 0x306   : > { %387 = vst.msk [vmem:[#allocation3] sm:$0xff] %vm292_vm2, %v385_v32 }
 0x307   : > { %v392_v35 = vpop.permute.xlu1 %391 }
 0x308   : > { %v394_v36 = vmul.f32 %v392_v35, %v388_v34 }
 0x30d   : > { %v450_v33 = vld [vmem:[#allocation3] sm:$0xff] }
 0x30e   : > { %453 = vperm.xlu1 %718, %v450_v33  }
 0x34a   : > { %v437_v37 = vpop.f32.mrb[0].mxu1 }
 0x34b   : > { %v443_v38 = vadd.f32 %v437_v37, %v394_v36  ;;  %v639_v39 = vpop.f32.mrb[1].mxu1 }
 0x34c   : > { %v440_v40 = vpop.f32.mrb[2].mxu1 }
 0x34d   : > { %444 = vst.msk [vmem:[#allocation4] sm:$0xff] %vm295_vm0, %v443_v38  ;;  %v640_v41 = vpop.f32.mrb[3].mxu1 }
 0x354   : > { %v449_v44 = vld [vmem:[#allocation4] sm:$0xff] }
 0x38d   : > { %v454_v42 = vpop.permute.xlu1 %453 }
 0x38e   : > { %723 = vrcp.f32 %v454_v42 }
 0x398   : > { %v724_v43 = vpop.eup %723 }
 0x399   : > { %v457_v45 = vmul.f32 %v724_v43, %v449_v44 }
 0x39b   : > { %v458_v46 = vpack.c.bf16 %v457_v45, %v457_v45 }
 0x39d   : > { %460 = vst.msk [vmem:[%s286_s7] sm:$0xf] %vm459_vm5, %v458_v46 }
 0x39e   : > { %828 = shalt.err (!%p825_p12)
}
 0x39f   : > { %s829_s29 = scalar_lea.hbm %s1156_s9, 64  ;;  %s833_s21 = scalar_lea.hbm %s1207_s3, 512 }
 0x3a0   : > { %p830_p11 = scmp.ne.s32.totalorder %s1156_s9, %s829_s29  ;;  %p834_p6 = scmp.lt.u32.totalorder %s1156_s9, %s1207_s3 }
 0x3a1   : > { %p835_p2 = scmp.lt.u32.totalorder %s833_s21, %s829_s29  ;;  %p837_p3 = scmp.lt.u32.totalorder %s829_s29, %s1156_s9 }
 0x3a2   : > { %p831_p5 = pnand %p830_p11, %p1230_p7 }
 0x3a3   : > { %p836_p13 = por %p835_p2, %p834_p6 }
 0x3a4   : > { %p832_p4 = pneg %p831_p5 }
 0x3a5   : > { %p838_p0 = por %p837_p3, %p836_p13 }
 0x3a7   : > { %p839_p1 = pnand %p838_p0, %p832_p4 }
 0x3a9   : > { %842 = shalt.err (!%p839_p1)
}
 0x3aa   : > { %647 = dma.vmem_to_hbm [thread:$0]  (%p1230_p7), %s1158_s20, 64, %s1156_s9, %s462_s22  }
 0x3ab PF: > { %p664_p8 = scmp.ge.s32.totalorder %s901_s17, 2  ;;  %s488_s16 = sand.u32 1, %s881_s12  }
 0x3ac   : > { %p1231_p9 = scmp.ne.s32.totalorder %s1220_s27, 0  ;;  %s489_s4 = scalar_lea.sflag [#allocation7], %s488_s16 }
 0x3ae   : > { %p660_p10 = pnand %p664_p8, %p1231_p9 }
 0x3b0   : > { %876 = dma.done.wait (!%p660_p10), %s489_s4, 64  }
 0x3b1   : > { %878 = vsyncadd (!%p660_p10), %s489_s4, 4294967232  ;;  %s22_s17 = sadd.s32 1, %s901_s17   ;;  %s1232_s25 = sld [smem:[#allocation17_spill]] }
 0x3b2   : > { %p19_p12 = scmp.ge.s32.totalorder %s22_s17, 10   ;;  %s1233_s15 = sld [smem:[#allocation15_spill]] }
 0x3b3   : > { %s1234_s16 = sld [smem:[#allocation16_spill]]  ;;  %s1235_s12 = smov %s885_s13 }
 0x3b4   : > { %s1236_s13 = smov %s889_s14  ;;  %21 = sbr.rel (!%p19_p12) target bundleno = 10 (0xa), region = 113 }
 0x3b7   : > { %s1237_s14 = smov %s1232_s25 }
 0x3bb   :  { %494 = vsyncpa [#allocation6], 1 }
 0x3bc   :  { %496 = vsyncpa [#allocation6 + $0x1], 1 }
 0x3bd   :  { %497 = vsyncpa [#allocation9], 1 }
 0x3be   :  { %499 = vsyncpa [#allocation9 + $0x1], 1 }
 0x3bf   :  { %500 = vsyncpa [#allocation7], 1 }
 0x3c0   :  { %502 = vsyncpa [#allocation7 + $0x1], 1 }

// kernel: _lambda_.40
= control target key start
LH: loop header
LB: loop body
LE: loop exit
PB: predicated region body
PF: predicated region fallthrough
CT: control target
= control target key end

     0   :  { %9 = vsyncpa [#allocation3], 0  ;;  %s439_s0 = inlined_call_operand.hbm [shape: bf16[16,32], index: 0, kind: input, shape index: {}]   ;;  %s440_s1 = inlined_call_operand.hbm [shape: bf16[32,32], index: 1, kind: input, shape index: {}]   ;;  %s441_s2 = inlined_call_operand.hbm [shape: f32[1,32], index: 2, kind: input, shape index: {}]   ;;  %s442_s3 = inlined_call_operand.hbm [shape: f32[16,32], index: 3, kind: input, shape index: {}]   ;;  %s443_s4 = inlined_call_operand.hbm [shape: f32[16,32], index: 4, kind: output, shape index: {}]  }
   0x1   :  { %10 = vsyncpa [#allocation6], 0 }
   0x2   :  { %11 = vsyncpa [#allocation9], 0 }
   0x3   :  { %12 = vsyncpa [#allocation4], 0  ;;  %s320_s15 = smov [#allocation5]   ;;  %s321_s17 = smov [#allocation2]  }
   0x4   :  { %s30_s16 = sshll.u32 %s320_s15, 4  ;;  %s18_s18 = sshll.u32 %s321_s17, 4  ;;  %s31_s16 = int_to_ptr.vmem [resolvable:$true] %s30_s16  ;;  %s356_s18 = int_to_ptr.vmem [resolvable:$true] %s18_s18 }
   0x5   :  { %s202_s21 = scalar_lea.hbm %s440_s1, 256 }
   0x6   :  { %p203_p0 = scmp.ne.s32.totalorder %s440_s1, %s202_s21  ;;  %p206_p1 = scmp.lt.u32.totalorder %s202_s21, %s440_s1 }
   0x8   :  { %p208_p2 = pnand %p206_p1, %p203_p0 }
   0xa   :  { %211 = shalt.err (!%p208_p2)
}
   0xb   :  { %s212_s26 = scalar_lea.vmem %s31_s16, 256  ;;  %p217_p4 = scmp.lt.s32.totalorder %s31_s16, %s31_s16 }
   0xc   :  { %p213_p3 = scmp.ne.s32.totalorder %s31_s16, %s212_s26  ;;  %p218_p5 = scmp.lt.s32.totalorder %s212_s26, %s212_s26 }
   0xe   :  { %p219_p6 = por %p218_p5, %p217_p4 }
  0x10   :  { %p220_p7 = pnand %p219_p6, %p213_p3 }
  0x12   :  { %223 = shalt.err (!%p220_p7)
}
  0x13   :  { %s322_s27 = smov 64   ;;  %s323_s28 = smov 4  }
  0x14   :  { %36 = dma.hbm_to_vmem [thread:$0]  %s440_s1, 256, %s31_s16, [#allocation6], %s322_s27, %s322_s27, %s323_s28  }
  0x15   :  { %s224_s7 = scalar_lea.hbm %s439_s0, 128 }
  0x16   :  { %p225_p8 = scmp.ne.s32.totalorder %s439_s0, %s224_s7  ;;  %p228_p9 = scmp.lt.u32.totalorder %s224_s7, %s439_s0 }
  0x18   :  { %p230_p10 = pnand %p228_p9, %p225_p8 }
  0x1a   :  { %233 = shalt.err (!%p230_p10)
}
  0x1b   :  { %s234_s12 = scalar_lea.vmem %s356_s18, 128  ;;  %p239_p12 = scmp.lt.s32.totalorder %s356_s18, %s356_s18 }
  0x1c   :  { %p235_p11 = scmp.ne.s32.totalorder %s356_s18, %s234_s12  ;;  %p240_p13 = scmp.lt.s32.totalorder %s234_s12, %s234_s12 }
  0x1e   :  { %p241_p0 = por %p240_p13, %p239_p12 }
  0x20   :  { %p242_p1 = pnand %p241_p0, %p235_p11 }
  0x22   :  { %245 = shalt.err (!%p242_p1)
}
  0x23   :  { %24 = dma.hbm_to_vmem [thread:$0]  %s439_s0, 128, %s356_s18, [#allocation3], %s322_s27, %s322_s27, %s323_s28  }
  0x24   :  { %s324_s14 = smov [#allocation7]   ;;  %s325_s16 = smov [#allocation8]  }
  0x25   :  { %s43_s15 = sshll.u32 %s324_s14, 4  ;;  %s52_s17 = sshll.u32 %s325_s16, 4  ;;  %s44_s15 = int_to_ptr.vmem [resolvable:$true] %s43_s15  ;;  %s387_s17 = int_to_ptr.vmem [resolvable:$true] %s52_s17 }
  0x26   :  { %s246_s21 = scalar_lea.hbm %s441_s2, 16 }
  0x27   :  { %p247_p2 = scmp.ne.s32.totalorder %s441_s2, %s246_s21  ;;  %p250_p3 = scmp.lt.u32.totalorder %s246_s21, %s441_s2 }
  0x29   :  { %p252_p4 = pnand %p250_p3, %p247_p2 }
  0x2b   :  { %255 = shalt.err (!%p252_p4)
}
  0x2c   :  { %s256_s0 = scalar_lea.vmem %s44_s15, 16  ;;  %s260_s18 = scalar_lea.vmem %s44_s15, 32 }
  0x2d   :  { %p257_p5 = scmp.ne.s32.totalorder %s44_s15, %s256_s0  ;;  %p261_p6 = scmp.lt.s32.totalorder %s44_s15, %s44_s15 }
  0x2e   :  { %p262_p7 = scmp.lt.s32.totalorder %s260_s18, %s256_s0 }
  0x30   :  { %p263_p8 = por %p262_p7, %p261_p6 }
  0x32   :  { %p264_p9 = pnand %p263_p8, %p257_p5 }
  0x34   :  { %267 = shalt.err (!%p264_p9)
}
  0x35   :  { %46 = dma.hbm_to_vmem [thread:$0]  %s441_s2, 16, %s44_s15, [#allocation6]  }
  0x36   :  { %s268_s30 = scalar_lea.hbm %s442_s3, 256 }
  0x37   :  { %p269_p10 = scmp.ne.s32.totalorder %s442_s3, %s268_s30  ;;  %p272_p11 = scmp.lt.u32.totalorder %s268_s30, %s442_s3 }
  0x39   :  { %p274_p12 = pnand %p272_p11, %p269_p10 }
  0x3b   :  { %277 = shalt.err (!%p274_p12)
}
  0x3c   :  { %s278_s9 = scalar_lea.vmem %s387_s17, 256  ;;  %p283_p0 = scmp.lt.s32.totalorder %s387_s17, %s387_s17 }
  0x3d   :  { %p279_p13 = scmp.ne.s32.totalorder %s387_s17, %s278_s9  ;;  %p284_p1 = scmp.lt.s32.totalorder %s278_s9, %s278_s9 }
  0x3f   :  { %p285_p2 = por %p284_p1, %p283_p0 }
  0x41   :  { %p286_p3 = pnand %p285_p2, %p279_p13 }
  0x43   :  { %289 = shalt.err (!%p286_p3)
}
  0x44   :  { %s326_s2 = smov 128   ;;  %s327_s10 = smov 8  }
  0x45   :  { %58 = dma.hbm_to_vmem [thread:$0]  %s442_s3, 256, %s387_s17, [#allocation9], %s326_s2, %s326_s2, %s327_s10  }
  0x46   :  { %312 = dma.done.wait [#allocation3], 128  }
  0x47   :  { %313 = vsyncadd [#allocation3], 4294967168 }
  0x48   :  { %314 = dma.done.wait [#allocation6], 272  }
  0x49   :  { %315 = vsyncadd [#allocation6], 4294967024 }
  0x4a   :  { %316 = dma.done.wait [#allocation9], 256  }
  0x4b   :  { %317 = vsyncadd [#allocation9], 4294967040  ;;  %v328_v0 = vmov 0.0   ;;  %vm329_vm0 = vmmov 0   ;;  %v199_v1 = vld [vmem:[#allocation5] sm:$0xff]   ;;  %v200_v2 = vld [vmem:[#allocation5 + $0x8] sm:$0xff]  }
  0x4c   :  { %180 = vmatprep.subr.bf16.mxu0 %v328_v0  ;;  %184 = vmatprep.mubr.msk.bf16.mxu0 %vm329_vm0, %v328_v0  ;;  %v201_v3 = vld [vmem:[#allocation2] sm:$0xff]   ;;  %vm102_vm1 = vcmask 261120   ;;  %v172_v4 = vld [vmem:[#allocation7] ss:$0 sm:$0xff]  ;;  %s330_s3 = smov [#allocation10]  }
  0x4d   :  { %181 = vmatpush3.bf16.msra.mxu0 %v199_v1  ;;  %v147_v6 = vld [vmem:[#allocation8] sm:$0xff]  ;;  %v148_v10 = vld [vmem:[#allocation8 + $0x8] sm:$0xff]  ;;  %s158_s1 = sshll.u32 %s330_s3, 4  ;;  %s159_s1 = int_to_ptr.vmem [resolvable:$true] %s158_s1 }
  0x4e   :  { %182 = vmatprep.subr.bf16.mxu0 %v328_v0  ;;  %s290_s13 = scalar_lea.vmem %s159_s1, 256  ;;  %p295_p5 = scmp.lt.s32.totalorder %s159_s1, %s159_s1 }
  0x4f   :  { %p291_p4 = scmp.ne.s32.totalorder %s159_s1, %s290_s13  ;;  %p296_p6 = scmp.lt.s32.totalorder %s290_s13, %s290_s13 }
  0x51   :  { %183 = vmatpush3.bf16.msra.mxu0 %v200_v2  ;;  %p297_p7 = por %p296_p6, %p295_p5 }
  0x53   :  { %p298_p8 = pnand %p297_p7, %p291_p4 }
  0x54   :  { %185 = vmatmul.mubr.msk.bf16.vlgmr.msra.gmra.mrb[0].mxu0 %vm102_vm1, %v201_v3 }
 0x127   :  { %v140_v5 = vpop.f32.mrb[0].mxu0 }
 0x128   :  { %v141_v7 = vadd.f32 %v172_v4, %v140_v5  ;;  %v186_v8 = vpop.f32.mrb[1].mxu0 }
 0x129   :  { %v143_v9 = vpop.f32.mrb[2].mxu0 }
 0x12a   :  { %v149_v11 = vadd.f32 %v147_v6, %v141_v7  ;;  %v144_v12 = vadd.f32 %v172_v4, %v143_v9  ;;  %v187_v13 = vpop.f32.mrb[3].mxu0 }
 0x12c   :  { %151 = vst.msk [vmem:[#allocation10] sm:$0xff] %vm102_vm1, %v149_v11  ;;  %v150_v14 = vadd.f32 %v148_v10, %v144_v12 }
 0x12e   :  { %152 = vst.msk [vmem:[#allocation10 + $0x8] sm:$0xff] %vm102_vm1, %v150_v14 }
 0x12f   :  { %301 = shalt.err (!%p298_p8)
}
 0x130   :  { %s302_s16 = scalar_lea.hbm %s443_s4, 256 }
 0x131   :  { %p303_p9 = scmp.ne.s32.totalorder %s443_s4, %s302_s16  ;;  %p306_p10 = scmp.lt.u32.totalorder %s302_s16, %s443_s4 }
 0x133   :  { %p308_p11 = pnand %p306_p10, %p303_p9 }
 0x135   :  { %311 = shalt.err (!%p308_p11)
}
 0x136   :  { %164 = dma.vmem_to_hbm [thread:$0]  %s159_s1, 256, %s443_s4, [#allocation4], %s326_s2, %s326_s2, %s327_s10  }
 0x137   :  { %318 = dma.done.wait [#allocation4], 256  }
 0x138   :  { %319 = vsyncadd [#allocation4], 4294967040 }
 0x139   :  { %168 = vsyncpa [#allocation3], 1 }
 0x13a   :  { %169 = vsyncpa [#allocation6], 1 }
 0x13b   :  { %170 = vsyncpa [#allocation9], 1 }
 0x13c   :  { %171 = vsyncpa [#allocation4], 1 }

// kernel: _lambda_.41
= control target key start
LH: loop header
LB: loop body
LE: loop exit
PB: predicated region body
PF: predicated region fallthrough
CT: control target
= control target key end

     0   :  { %10 = vsyncpa [#allocation3], 0  ;;  %s558_s0 = inlined_call_operand.hbm [shape: f32[16,32], index: 0, kind: input, shape index: {}]   ;;  %s559_s1 = inlined_call_operand.hbm [shape: bf16[32,128], index: 1, kind: input, shape index: {}]   ;;  %s560_s2 = inlined_call_operand.hbm [shape: f32[1,32], index: 2, kind: input, shape index: {}]   ;;  %s561_s3 = inlined_call_operand.hbm [shape: f32[1,32], index: 3, kind: input, shape index: {}]   ;;  %s562_s4 = inlined_call_operand.hbm [shape: f32[1,128], index: 4, kind: input, shape index: {}]   ;;  %s563_s5 = inlined_call_operand.hbm [shape: bf16[16,128], index: 5, kind: output, shape index: {}]  }
   0x1   :  { %11 = vsyncpa [#allocation6], 0 }
   0x2   :  { %12 = vsyncpa [#allocation9], 0 }
   0x3   :  { %13 = vsyncpa [#allocation4], 0  ;;  %s433_s18 = smov [#allocation5]   ;;  %s293_s22 = scalar_lea.hbm %s559_s1, 256 }
   0x4   :  { %s31_s19 = sshll.u32 %s433_s18, 4  ;;  %p294_p0 = scmp.ne.s32.totalorder %s559_s1, %s293_s22  ;;  %s32_s19 = int_to_ptr.vmem [resolvable:$true] %s31_s19 }
   0x5   :  { %p297_p1 = scmp.lt.u32.totalorder %s293_s22, %s559_s1 }
   0x7   :  { %p299_p2 = pnand %p297_p1, %p294_p0 }
   0x9   :  { %302 = shalt.err (!%p299_p2)
}
   0xa   :  { %s303_s27 = scalar_lea.vmem %s32_s19, 256  ;;  %p308_p4 = scmp.lt.s32.totalorder %s32_s19, %s32_s19 }
   0xb   :  { %p304_p3 = scmp.ne.s32.totalorder %s32_s19, %s303_s27  ;;  %p309_p5 = scmp.lt.s32.totalorder %s303_s27, %s303_s27 }
   0xd   :  { %p310_p6 = por %p309_p5, %p308_p4 }
   0xf   :  { %p311_p7 = pnand %p310_p6, %p304_p3 }
  0x11   :  { %314 = shalt.err (!%p311_p7)
}
  0x12   :  { %s434_s28 = smov 64   ;;  %s435_s29 = smov 4  }
  0x13   :  { %37 = dma.hbm_to_vmem [thread:$0]  %s559_s1, 256, %s32_s19, [#allocation6], %s434_s28, %s434_s28, %s435_s29  }
  0x14   :  { %s436_s7 = smov [#allocation8]   ;;  %s437_s9 = smov [#allocation2]  }
  0x15   :  { %s54_s8 = sshll.u32 %s436_s7, 4  ;;  %s19_s10 = sshll.u32 %s437_s9, 4  ;;  %s55_s8 = int_to_ptr.vmem [resolvable:$true] %s54_s8  ;;  %s20_s10 = int_to_ptr.vmem [resolvable:$true] %s19_s10 }
  0x16   :  { %s315_s13 = scalar_lea.hbm %s561_s3, 16 }
  0x17   :  { %p316_p8 = scmp.ne.s32.totalorder %s561_s3, %s315_s13  ;;  %p319_p9 = scmp.lt.u32.totalorder %s315_s13, %s561_s3 }
  0x19   :  { %p321_p10 = pnand %p319_p9, %p316_p8 }
  0x1b   :  { %324 = shalt.err (!%p321_p10)
}
  0x1c   :  { %s325_s1 = scalar_lea.vmem %s55_s8, 16  ;;  %s329_s18 = scalar_lea.vmem %s55_s8, 32 }
  0x1d   :  { %p326_p11 = scmp.ne.s32.totalorder %s55_s8, %s325_s1  ;;  %p330_p12 = scmp.lt.s32.totalorder %s55_s8, %s55_s8 }
  0x1e   :  { %p331_p13 = scmp.lt.s32.totalorder %s329_s18, %s325_s1 }
  0x20   :  { %p332_p0 = por %p331_p13, %p330_p12 }
  0x22   :  { %p333_p1 = pnand %p332_p0, %p326_p11 }
  0x24   :  { %336 = shalt.err (!%p333_p1)
}
  0x25   :  { %57 = dma.hbm_to_vmem [thread:$0]  %s561_s3, 16, %s55_s8, [#allocation9]  }
  0x26   :  { %s337_s23 = scalar_lea.hbm %s558_s0, 256 }
  0x27   :  { %p338_p2 = scmp.ne.s32.totalorder %s558_s0, %s337_s23  ;;  %p341_p3 = scmp.lt.u32.totalorder %s337_s23, %s558_s0 }
  0x29   :  { %p343_p4 = pnand %p341_p3, %p338_p2 }
  0x2b   :  { %346 = shalt.err (!%p343_p4)
}
  0x2c   :  { %s347_s30 = scalar_lea.vmem %s20_s10, 256  ;;  %p352_p6 = scmp.lt.s32.totalorder %s20_s10, %s20_s10 }
  0x2d   :  { %p348_p5 = scmp.ne.s32.totalorder %s20_s10, %s347_s30  ;;  %p353_p7 = scmp.lt.s32.totalorder %s347_s30, %s347_s30 }
  0x2f   :  { %p354_p8 = por %p353_p7, %p352_p6 }
  0x31   :  { %p355_p9 = pnand %p354_p8, %p348_p5 }
  0x33   :  { %358 = shalt.err (!%p355_p9)
}
  0x34   :  { %s438_s3 = smov 128   ;;  %s439_s6 = smov 8  }
  0x35   :  { %25 = dma.hbm_to_vmem [thread:$0]  %s558_s0, 256, %s20_s10, [#allocation3], %s438_s3, %s438_s3, %s439_s6  }
  0x36   :  { %s440_s9 = smov [#allocation7]   ;;  %s441_s12 = smov [#allocation10]  }
  0x37   :  { %s44_s11 = sshll.u32 %s440_s9, 4  ;;  %s64_s13 = sshll.u32 %s441_s12, 4  ;;  %s45_s11 = int_to_ptr.vmem [resolvable:$true] %s44_s11  ;;  %s65_s13 = int_to_ptr.vmem [resolvable:$true] %s64_s13 }
  0x38   :  { %s359_s16 = scalar_lea.hbm %s560_s2, 16 }
  0x39   :  { %p360_p10 = scmp.ne.s32.totalorder %s560_s2, %s359_s16  ;;  %p363_p11 = scmp.lt.u32.totalorder %s359_s16, %s560_s2 }
  0x3b   :  { %p365_p12 = pnand %p363_p11, %p360_p10 }
  0x3d   :  { %368 = shalt.err (!%p365_p12)
}
  0x3e   :  { %s369_s0 = scalar_lea.vmem %s45_s11, 16  ;;  %s373_s10 = scalar_lea.vmem %s45_s11, 32 }
  0x3f   :  { %p370_p13 = scmp.ne.s32.totalorder %s45_s11, %s369_s0  ;;  %p374_p0 = scmp.lt.s32.totalorder %s45_s11, %s45_s11 }
  0x40   :  { %p375_p1 = scmp.lt.s32.totalorder %s373_s10, %s369_s0 }
  0x42   :  { %p376_p2 = por %p375_p1, %p374_p0 }
  0x44   :  { %p377_p3 = pnand %p376_p2, %p370_p13 }
  0x46   :  { %380 = shalt.err (!%p377_p3)
}
  0x47   :  { %47 = dma.hbm_to_vmem [thread:$0]  %s560_s2, 16, %s45_s11, [#allocation6]  }
  0x48   :  { %s381_s24 = scalar_lea.hbm %s562_s4, 16 }
  0x49   :  { %p382_p4 = scmp.ne.s32.totalorder %s562_s4, %s381_s24  ;;  %p385_p5 = scmp.lt.u32.totalorder %s381_s24, %s562_s4 }
  0x4b   :  { %p387_p6 = pnand %p385_p5, %p382_p4 }
  0x4d   :  { %390 = shalt.err (!%p387_p6)
}
  0x4e   :  { %s391_s3 = scalar_lea.vmem %s65_s13, 16  ;;  %s395_s6 = scalar_lea.vmem %s65_s13, 32 }
  0x4f   :  { %p392_p7 = scmp.ne.s32.totalorder %s65_s13, %s391_s3  ;;  %p396_p8 = scmp.lt.s32.totalorder %s65_s13, %s65_s13 }
  0x50   :  { %p397_p9 = scmp.lt.s32.totalorder %s395_s6, %s391_s3 }
  0x52   :  { %p398_p10 = por %p397_p9, %p396_p8 }
  0x54   :  { %p399_p11 = pnand %p398_p10, %p392_p7 }
  0x56   :  { %402 = shalt.err (!%p399_p11)
}
  0x57   :  { %67 = dma.hbm_to_vmem [thread:$0]  %s562_s4, 16, %s65_s13, [#allocation9]  }
  0x58   :  { %425 = dma.done.wait [#allocation3], 256  }
  0x59   :  { %426 = vsyncadd [#allocation3], 4294967040 }
  0x5a   :  { %427 = dma.done.wait [#allocation6], 272  }
  0x5b   :  { %428 = vsyncadd [#allocation6], 4294967024 }
  0x5c   :  { %429 = dma.done.wait [#allocation9], 32  }
  0x5d   :  { %430 = vsyncadd [#allocation9], 4294967264  ;;  %vm86_vm0 = vcmask 261120   ;;  %v84_v0 = vld [vmem:[#allocation2] sm:$0xff]  ;;  %v85_v1 = vld [vmem:[#allocation2 + $0x8] sm:$0xff]  ;;  %v442_v15 = vmov 0.0  }
  0x5e   :  { %v87_v2 = vsel %vm86_vm0, %v84_v0, 0.0  ;;  %v90_v3 = vsel %vm86_vm0, %v85_v1, 0.0  ;;  %v279_v14 = vld [vmem:[#allocation5] sm:$0xff]   ;;  %259 = vmatprep.subr.bf16.mxu0 %v442_v15  ;;  %v280_v16 = vld [vmem:[#allocation5 + $0x8] sm:$0xff]   ;;  %vm443_vm1 = vmmov 0   ;;  %s444_s4 = smov [#allocation11]  }
  0x5f   :  { %88 = vadd.xlane.f32.xlu0 %v87_v2  ;;  %260 = vmatpush3.bf16.msra.mxu0 %v279_v14  ;;  %v241_v25 = vld [vmem:[#allocation7] ss:$0 sm:$0xff]  ;;  %v242_v29 = vld [vmem:[#allocation8] ss:$0 sm:$0xff]  ;;  %v243_v34 = vld [vmem:[#allocation10] ss:$0 sm:$0xff] }
  0x60   :  { %263 = vmatprep.mubr.msk.bf16.mxu0 %vm443_vm1, %v442_v15  ;;  %261 = vmatprep.subr.bf16.mxu0 %v442_v15  ;;  %s227_s8 = sshll.u32 %s444_s4, 4  ;;  %s228_s8 = int_to_ptr.vmem [resolvable:$true] %s227_s8 }
  0x61   :  { %s403_s9 = scalar_lea.vmem %s228_s8, 128  ;;  %p408_p13 = scmp.lt.s32.totalorder %s228_s8, %s228_s8 }
  0x62   :  { %p404_p12 = scmp.ne.s32.totalorder %s228_s8, %s403_s9  ;;  %p409_p0 = scmp.lt.s32.totalorder %s403_s9, %s403_s9 }
  0x63   :  { %91 = vadd.xlane.f32.xlu0 %v90_v3  ;;  %262 = vmatpush3.bf16.msra.mxu0 %v280_v16 }
  0x64   :  { %p410_p1 = por %p409_p0, %p408_p13 }
  0x66   :  { %p411_p2 = pnand %p410_p1, %p404_p12 }
  0xec   :  { %v89_v4 = vpop.xlane.xlu0 %88 }
  0xed   :  { %v94_v5 = vmul.f32 0.03125, %v89_v4 }
  0xef   :  { %v96_v6 = vsub.f32 %v84_v0, %v94_v5 }
  0xf0   :  { %v92_v7 = vpop.xlane.xlu0 %91 }
  0xf1   :  { %v95_v8 = vmul.f32 0.03125, %v92_v7  ;;  %v98_v9 = vmul.f32 %v96_v6, %v96_v6 }
  0xf3   :  { %v97_v10 = vsub.f32 %v85_v1, %v95_v8  ;;  %v100_v11 = vsel %vm86_vm0, %v98_v9, 0.0 }
  0xf4   :  { %101 = vadd.xlane.f32.xlu1 %v100_v11 }
  0xf5   :  { %v99_v12 = vmul.f32 %v97_v10, %v97_v10 }
  0xf7   :  { %v103_v13 = vsel %vm86_vm0, %v99_v12, 0.0 }
  0xf8   :  { %104 = vadd.xlane.f32.xlu1 %v103_v13 }
 0x181   :  { %v102_v17 = vpop.xlane.xlu1 %101 }
 0x182   :  { %v106_v18 = vmul.f32 0.03125, %v102_v17 }
 0x184   :  { %v108_v19 = vadd.f32 1e-05, %v106_v18 }
 0x185   :  { %v105_v20 = vpop.xlane.xlu1 %104 }
 0x186   :  { %281 = vrsqrt.f32 %v108_v19  ;;  %v107_v21 = vmul.f32 0.03125, %v105_v20 }
 0x188   :  { %v109_v22 = vadd.f32 1e-05, %v107_v21 }
 0x18a   :  { %283 = vrsqrt.f32 %v109_v22 }
 0x190   :  { %v282_v23 = vpop.eup %281 }
 0x191   :  { %v112_v24 = vmul.f32 %v282_v23, %v96_v6 }
 0x193   :  { %v121_v28 = vmul.f32 %v241_v25, %v112_v24 }
 0x194   :  { %v284_v26 = vpop.eup %283 }
 0x195   :  { %v113_v27 = vmul.f32 %v284_v26, %v97_v10  ;;  %v130_v31 = vadd.f32 %v242_v29, %v121_v28 }
 0x197   :  { %v122_v30 = vmul.f32 %v241_v25, %v113_v27 }
 0x199   :  { %v131_v32 = vadd.f32 %v242_v29, %v122_v30 }
 0x19b   :  { %v132_v33 = vpack.c.bf16 %v131_v32, %v130_v31 }
 0x19d   :  { %264 = vmatmul.mubr.msk.bf16.vlgmr.msra.gmra.mrb[0].mxu0 %vm86_vm0, %v132_v33 }
 0x270   :  { %v193_v35 = vpop.f32.mrb[0].mxu0 }
 0x271   :  { %v194_v36 = vadd.f32 %v243_v34, %v193_v35  ;;  %v265_v37 = vpop.f32.mrb[1].mxu0 }
 0x272   :  { %v196_v38 = vpop.f32.mrb[2].mxu0 }
 0x273   :  { %v200_v39 = vmul.f32 -1.702, %v194_v36  ;;  %v197_v40 = vadd.f32 %v243_v34, %v196_v38  ;;  %v266_v41 = vpop.f32.mrb[3].mxu0 }
 0x275   :  { %v202_v42 = vmul.f32 1.442695, %v200_v39  ;;  %v201_v43 = vmul.f32 -1.702, %v197_v40 }
 0x277   :  { %285 = vpow2.f32 %v202_v42  ;;  %v204_v44 = vmul.f32 1.442695, %v201_v43 }
 0x279   :  { %287 = vpow2.f32 %v204_v44 }
 0x281   :  { %v286_v45 = vpop.eup %285 }
 0x282   :  { %v206_v46 = vadd.f32 1.0, %v286_v45 }
 0x283   :  { %v288_v47 = vpop.eup %287 }
 0x284   :  { %289 = vrcp.f32 %v206_v46  ;;  %v207_v48 = vadd.f32 1.0, %v288_v47 }
 0x286   :  { %291 = vrcp.f32 %v207_v48 }
 0x28e   :  { %v290_v49 = vpop.eup %289 }
 0x28f   :  { %v210_v51 = vmul.f32 %v290_v49, %v194_v36 }
 0x290   :  { %v292_v50 = vpop.eup %291 }
 0x291   :  { %v211_v52 = vmul.f32 %v292_v50, %v197_v40 }
 0x293   :  { %v254_v53 = vpack.c.bf16 %v211_v52, %v210_v51 }
 0x295   :  { %255 = vst [vmem:[#allocation11] sm:$0xff] %v254_v53  }
 0x296   :  { %414 = shalt.err (!%p411_p2)
}
 0x297   :  { %s415_s13 = scalar_lea.hbm %s563_s5, 128 }
 0x298   :  { %p416_p3 = scmp.ne.s32.totalorder %s563_s5, %s415_s13  ;;  %p419_p4 = scmp.lt.u32.totalorder %s415_s13, %s563_s5 }
 0x29a   :  { %p421_p5 = pnand %p419_p4, %p416_p3 }
 0x29c   :  { %424 = shalt.err (!%p421_p5)
}
 0x29d   :  { %233 = dma.vmem_to_hbm [thread:$0]  %s228_s8, 128, %s563_s5, [#allocation4], %s434_s28, %s434_s28, %s435_s29  }
 0x29e   :  { %431 = dma.done.wait [#allocation4], 128  }
 0x29f   :  { %432 = vsyncadd [#allocation4], 4294967168 }
 0x2a0   :  { %237 = vsyncpa [#allocation3], 1 }
 0x2a1   :  { %238 = vsyncpa [#allocation6], 1 }
 0x2a2   :  { %239 = vsyncpa [#allocation9], 1 }
 0x2a3   :  { %240 = vsyncpa [#allocation4], 1 }

// kernel: _lambda_.42
= control target key start
LH: loop header
LB: loop body
LE: loop exit
PB: predicated region body
PF: predicated region fallthrough
CT: control target
= control target key end

     0   :  { %9 = vsyncpa [#allocation3], 0  ;;  %s511_s0 = inlined_call_operand.hbm [shape: bf16[16,128], index: 0, kind: input, shape index: {}]   ;;  %s512_s1 = inlined_call_operand.hbm [shape: bf16[128,32], index: 1, kind: input, shape index: {}]   ;;  %s513_s2 = inlined_call_operand.hbm [shape: f32[1,32], index: 2, kind: input, shape index: {}]   ;;  %s514_s3 = inlined_call_operand.hbm [shape: f32[16,32], index: 3, kind: input, shape index: {}]   ;;  %s515_s4 = inlined_call_operand.hbm [shape: f32[16,32], index: 4, kind: output, shape index: {}]  }
   0x1   :  { %10 = vsyncpa [#allocation6], 0 }
   0x2   :  { %11 = vsyncpa [#allocation9], 0 }
   0x3   :  { %12 = vsyncpa [#allocation4], 0  ;;  %s395_s15 = smov [#allocation5]   ;;  %s396_s17 = smov [#allocation2]  }
   0x4   :  { %s30_s16 = sshll.u32 %s395_s15, 4  ;;  %s18_s18 = sshll.u32 %s396_s17, 4  ;;  %s31_s16 = int_to_ptr.vmem [resolvable:$true] %s30_s16  ;;  %s431_s18 = int_to_ptr.vmem [resolvable:$true] %s18_s18 }
   0x5   :  { %s277_s21 = scalar_lea.hbm %s512_s1, 1024 }
   0x6   :  { %p278_p0 = scmp.ne.s32.totalorder %s512_s1, %s277_s21  ;;  %p281_p1 = scmp.lt.u32.totalorder %s277_s21, %s512_s1 }
   0x8   :  { %p283_p2 = pnand %p281_p1, %p278_p0 }
   0xa   :  { %286 = shalt.err (!%p283_p2)
}
   0xb   :  { %s287_s26 = scalar_lea.vmem %s31_s16, 1024  ;;  %p292_p4 = scmp.lt.s32.totalorder %s31_s16, %s31_s16 }
   0xc   :  { %p288_p3 = scmp.ne.s32.totalorder %s31_s16, %s287_s26  ;;  %p293_p5 = scmp.lt.s32.totalorder %s287_s26, %s287_s26 }
   0xe   :  { %p294_p6 = por %p293_p5, %p292_p4 }
  0x10   :  { %p295_p7 = pnand %p294_p6, %p288_p3 }
  0x12   :  { %298 = shalt.err (!%p295_p7)
}
  0x13   :  { %s397_s27 = smov 64   ;;  %s398_s28 = smov 4  }
  0x14   :  { %36 = dma.hbm_to_vmem [thread:$0]  %s512_s1, 1024, %s31_s16, [#allocation6], %s397_s27, %s397_s27, %s398_s28  }
  0x15   :  { %s299_s7 = scalar_lea.hbm %s511_s0, 128 }
  0x16   :  { %p300_p8 = scmp.ne.s32.totalorder %s511_s0, %s299_s7  ;;  %p303_p9 = scmp.lt.u32.totalorder %s299_s7, %s511_s0 }
  0x18   :  { %p305_p10 = pnand %p303_p9, %p300_p8 }
  0x1a   :  { %308 = shalt.err (!%p305_p10)
}
  0x1b   :  { %s309_s12 = scalar_lea.vmem %s431_s18, 128  ;;  %p314_p12 = scmp.lt.s32.totalorder %s431_s18, %s431_s18 }
  0x1c   :  { %p310_p11 = scmp.ne.s32.totalorder %s431_s18, %s309_s12  ;;  %p315_p13 = scmp.lt.s32.totalorder %s309_s12, %s309_s12 }
  0x1e   :  { %p316_p0 = por %p315_p13, %p314_p12 }
  0x20   :  { %p317_p1 = pnand %p316_p0, %p310_p11 }
  0x22   :  { %320 = shalt.err (!%p317_p1)
}
  0x23   :  { %24 = dma.hbm_to_vmem [thread:$0]  %s511_s0, 128, %s431_s18, [#allocation3], %s397_s27, %s397_s27, %s398_s28  }
  0x24   :  { %s399_s14 = smov [#allocation7]   ;;  %s400_s16 = smov [#allocation8]  }
  0x25   :  { %s43_s15 = sshll.u32 %s399_s14, 4  ;;  %s52_s17 = sshll.u32 %s400_s16, 4  ;;  %s44_s15 = int_to_ptr.vmem [resolvable:$true] %s43_s15  ;;  %s462_s17 = int_to_ptr.vmem [resolvable:$true] %s52_s17 }
  0x26   :  { %s321_s21 = scalar_lea.hbm %s513_s2, 16 }
  0x27   :  { %p322_p2 = scmp.ne.s32.totalorder %s513_s2, %s321_s21  ;;  %p325_p3 = scmp.lt.u32.totalorder %s321_s21, %s513_s2 }
  0x29   :  { %p327_p4 = pnand %p325_p3, %p322_p2 }
  0x2b   :  { %330 = shalt.err (!%p327_p4)
}
  0x2c   :  { %s331_s0 = scalar_lea.vmem %s44_s15, 16  ;;  %s335_s18 = scalar_lea.vmem %s44_s15, 32 }
  0x2d   :  { %p332_p5 = scmp.ne.s32.totalorder %s44_s15, %s331_s0  ;;  %p336_p6 = scmp.lt.s32.totalorder %s44_s15, %s44_s15 }
  0x2e   :  { %p337_p7 = scmp.lt.s32.totalorder %s335_s18, %s331_s0 }
  0x30   :  { %p338_p8 = por %p337_p7, %p336_p6 }
  0x32   :  { %p339_p9 = pnand %p338_p8, %p332_p5 }
  0x34   :  { %342 = shalt.err (!%p339_p9)
}
  0x35   :  { %46 = dma.hbm_to_vmem [thread:$0]  %s513_s2, 16, %s44_s15, [#allocation6]  }
  0x36   :  { %s343_s30 = scalar_lea.hbm %s514_s3, 256 }
  0x37   :  { %p344_p10 = scmp.ne.s32.totalorder %s514_s3, %s343_s30  ;;  %p347_p11 = scmp.lt.u32.totalorder %s343_s30, %s514_s3 }
  0x39   :  { %p349_p12 = pnand %p347_p11, %p344_p10 }
  0x3b   :  { %352 = shalt.err (!%p349_p12)
}
  0x3c   :  { %s353_s9 = scalar_lea.vmem %s462_s17, 256  ;;  %p358_p0 = scmp.lt.s32.totalorder %s462_s17, %s462_s17 }
  0x3d   :  { %p354_p13 = scmp.ne.s32.totalorder %s462_s17, %s353_s9  ;;  %p359_p1 = scmp.lt.s32.totalorder %s353_s9, %s353_s9 }
  0x3f   :  { %p360_p2 = por %p359_p1, %p358_p0 }
  0x41   :  { %p361_p3 = pnand %p360_p2, %p354_p13 }
  0x43   :  { %364 = shalt.err (!%p361_p3)
}
  0x44   :  { %s401_s2 = smov 128   ;;  %s402_s10 = smov 8  }
  0x45   :  { %58 = dma.hbm_to_vmem [thread:$0]  %s514_s3, 256, %s462_s17, [#allocation9], %s401_s2, %s401_s2, %s402_s10  }
  0x46   :  { %387 = dma.done.wait [#allocation3], 128  }
  0x47   :  { %388 = vsyncadd [#allocation3], 4294967168 }
  0x48   :  { %389 = dma.done.wait [#allocation6], 1040  }
  0x49   :  { %390 = vsyncadd [#allocation6], 4294966256 }
  0x4a   :  { %391 = dma.done.wait [#allocation9], 256  }
  0x4b   :  { %392 = vsyncadd [#allocation9], 4294967040  ;;  %v403_v0 = vmov 0.0   ;;  %vm404_vm0 = vmmov 0   ;;  %v268_v1 = vld [vmem:[#allocation5] sm:$0xff]   ;;  %v269_v2 = vld [vmem:[#allocation5 + $0x8] sm:$0xff]  }
  0x4c   :  { %237 = vmatprep.subr.bf16.mxu0 %v403_v0  ;;  %253 = vmatprep.mubr.msk.bf16.mxu0 %vm404_vm0, %v403_v0  ;;  %v270_v3 = vld [vmem:[#allocation5 + $0x10] sm:$0xff]   ;;  %v271_v4 = vld [vmem:[#allocation5 + $0x18] sm:$0xff]   ;;  %v272_v5 = vld [vmem:[#allocation5 + $0x20] sm:$0xff]   ;;  %vm196_vm1 = vcmask 261120   ;;  %s405_s3 = smov [#allocation10]  }
  0x4d   :  { %238 = vmatpush3.bf16.msra.mxu0 %v268_v1  ;;  %v273_v6 = vld [vmem:[#allocation5 + $0x28] sm:$0xff]   ;;  %v274_v7 = vld [vmem:[#allocation5 + $0x30] sm:$0xff]   ;;  %v275_v8 = vld [vmem:[#allocation5 + $0x38] sm:$0xff]   ;;  %s204_s1 = sshll.u32 %s405_s3, 4  ;;  %s205_s1 = int_to_ptr.vmem [resolvable:$true] %s204_s1 }
  0x4e   :  { %239 = vmatprep.subr.bf16.mxu0 %v403_v0  ;;  %v276_v9 = vld [vmem:[#allocation2] sm:$0xff]   ;;  %v218_v10 = vld [vmem:[#allocation7] ss:$0 sm:$0xff]  ;;  %v192_v12 = vld [vmem:[#allocation8] sm:$0xff]  ;;  %s365_s13 = scalar_lea.vmem %s205_s1, 256  ;;  %p370_p5 = scmp.lt.s32.totalorder %s205_s1, %s205_s1 }
  0x4f   :  { %v193_v16 = vld [vmem:[#allocation8 + $0x8] sm:$0xff]  ;;  %p366_p4 = scmp.ne.s32.totalorder %s205_s1, %s365_s13  ;;  %p371_p6 = scmp.lt.s32.totalorder %s365_s13, %s365_s13 }
  0x51   :  { %240 = vmatpush3.bf16.msra.mxu0 %v269_v2  ;;  %p372_p7 = por %p371_p6, %p370_p5 }
  0x52   :  { %241 = vmatprep.subr.bf16.mxu0 %v403_v0 }
  0x53   :  { %p373_p8 = pnand %p372_p7, %p366_p4 }
  0x55   :  { %242 = vmatpush3.bf16.msra.mxu0 %v270_v3 }
  0x56   :  { %243 = vmatprep.subr.bf16.mxu0 %v403_v0 }
  0x59   :  { %244 = vmatpush3.bf16.msra.mxu0 %v271_v4 }
  0x5a   :  { %245 = vmatprep.subr.bf16.mxu0 %v403_v0 }
  0x5d   :  { %246 = vmatpush3.bf16.msra.mxu0 %v272_v5 }
  0x5e   :  { %247 = vmatprep.subr.bf16.mxu0 %v403_v0 }
  0x61   :  { %248 = vmatpush3.bf16.msra.mxu0 %v273_v6 }
  0x62   :  { %249 = vmatprep.subr.bf16.mxu0 %v403_v0 }
  0x65   :  { %250 = vmatpush3.bf16.msra.mxu0 %v274_v7 }
  0x66   :  { %251 = vmatprep.subr.bf16.mxu0 %v403_v0 }
  0x69   :  { %252 = vmatpush3.bf16.msra.mxu0 %v275_v8 }
  0x6c   :  { %254 = vmatmul.mubr.bf16.vlgmr.msra.gmra.mrb[0].mxu0 %v276_v9 }
 0x13f   :  { %v185_v11 = vpop.f32.mrb[0].mxu0 }
 0x140   :  { %v186_v13 = vadd.f32 %v218_v10, %v185_v11  ;;  %v255_v14 = vpop.f32.mrb[1].mxu0 }
 0x141   :  { %v188_v15 = vpop.f32.mrb[2].mxu0 }
 0x142   :  { %v194_v17 = vadd.f32 %v192_v12, %v186_v13  ;;  %v189_v18 = vadd.f32 %v218_v10, %v188_v15  ;;  %v256_v19 = vpop.f32.mrb[3].mxu0 }
 0x144   :  { %v195_v20 = vadd.f32 %v193_v16, %v189_v18  ;;  %197 = vst.msk [vmem:[#allocation10] sm:$0xff] %vm196_vm1, %v194_v17 }
 0x146   :  { %198 = vst.msk [vmem:[#allocation10 + $0x8] sm:$0xff] %vm196_vm1, %v195_v20 }
 0x147   :  { %376 = shalt.err (!%p373_p8)
}
 0x148   :  { %s377_s16 = scalar_lea.hbm %s515_s4, 256 }
 0x149   :  { %p378_p9 = scmp.ne.s32.totalorder %s515_s4, %s377_s16  ;;  %p381_p10 = scmp.lt.u32.totalorder %s377_s16, %s515_s4 }
 0x14b   :  { %p383_p11 = pnand %p381_p10, %p378_p9 }
 0x14d   :  { %386 = shalt.err (!%p383_p11)
}
 0x14e   :  { %210 = dma.vmem_to_hbm [thread:$0]  %s205_s1, 256, %s515_s4, [#allocation4], %s401_s2, %s401_s2, %s402_s10  }
 0x14f   :  { %393 = dma.done.wait [#allocation4], 256  }
 0x150   :  { %394 = vsyncadd [#allocation4], 4294967040 }
 0x151   :  { %214 = vsyncpa [#allocation3], 1 }
 0x152   :  { %215 = vsyncpa [#allocation6], 1 }
 0x153   :  { %216 = vsyncpa [#allocation9], 1 }
 0x154   :  { %217 = vsyncpa [#allocation4], 1 }

// kernel: _lambda_.49
= control target key start
LH: loop header
LB: loop body
LE: loop exit
PB: predicated region body
PF: predicated region fallthrough
CT: control target
= control target key end

     0   :  { %s297_s0 = inlined_call_operand.hbm [shape: f32[2,32], index: 0, kind: input, shape index: {}]   ;;  %s298_s1 = inlined_call_operand.hbm [shape: f32[2,32], index: 1, kind: input, shape index: {}]   ;;  %s299_s2 = inlined_call_operand.<no memory space> [shape: f32[1,1], index: 2, kind: input, shape index: {}]   ;;  %s300_s3 = inlined_call_operand.hbm [shape: f32[2,2], index: 3, kind: output, shape index: {}]  }
   0x1   :  { %v8_v0 = vstv %s299_s2 }
   0x2   :  { %9 = vst [vmem:[#allocation2] sm:$0x1] %v8_v0 }
   0x3   :  { %10 = vsyncpa [#allocation4], 0 }
   0x4   :  { %11 = vsyncpa [#allocation7], 0 }
   0x5   :  { %12 = vsyncpa [#allocation5], 0  ;;  %s232_s14 = smov [#allocation3]   ;;  %s233_s16 = smov [#allocation6]  }
   0x6   :  { %s19_s15 = sshll.u32 %s232_s14, 4  ;;  %s29_s17 = sshll.u32 %s233_s16, 4  ;;  %s20_s15 = int_to_ptr.vmem [resolvable:$true] %s19_s15  ;;  %s30_s17 = int_to_ptr.vmem [resolvable:$true] %s29_s17 }
   0x7   :  { %s160_s20 = scalar_lea.hbm %s297_s0, 32 }
   0x8   :  { %p161_p0 = scmp.ne.s32.totalorder %s297_s0, %s160_s20  ;;  %p164_p1 = scmp.lt.u32.totalorder %s160_s20, %s297_s0 }
   0xa   :  { %p166_p2 = pnand %p164_p1, %p161_p0 }
   0xc   :  { %169 = shalt.err (!%p166_p2)
}
   0xd   :  { %s170_s24 = scalar_lea.vmem %s20_s15, 32  ;;  %p175_p4 = scmp.lt.s32.totalorder %s20_s15, %s20_s15 }
   0xe   :  { %p171_p3 = scmp.ne.s32.totalorder %s20_s15, %s170_s24  ;;  %p176_p5 = scmp.lt.s32.totalorder %s170_s24, %s170_s24 }
  0x10   :  { %p177_p6 = por %p176_p5, %p175_p4 }
  0x12   :  { %p178_p7 = pnand %p177_p6, %p171_p3 }
  0x14   :  { %181 = shalt.err (!%p178_p7)
}
  0x15   :  { %22 = dma.hbm_to_vmem [thread:$0]  %s297_s0, 32, %s20_s15, [#allocation4]  }
  0x16   :  { %s182_s29 = scalar_lea.hbm %s298_s1, 32 }
  0x17   :  { %p183_p8 = scmp.ne.s32.totalorder %s298_s1, %s182_s29  ;;  %p186_p9 = scmp.lt.u32.totalorder %s182_s29, %s298_s1 }
  0x19   :  { %p188_p10 = pnand %p186_p9, %p183_p8 }
  0x1b   :  { %191 = shalt.err (!%p188_p10)
}
  0x1c   :  { %s192_s7 = scalar_lea.vmem %s30_s17, 32  ;;  %p197_p12 = scmp.lt.s32.totalorder %s30_s17, %s30_s17 }
  0x1d   :  { %p193_p11 = scmp.ne.s32.totalorder %s30_s17, %s192_s7  ;;  %p198_p13 = scmp.lt.s32.totalorder %s192_s7, %s192_s7 }
  0x1f   :  { %p199_p0 = por %p198_p13, %p197_p12 }
  0x21   :  { %p200_p1 = pnand %p199_p0, %p193_p11 }
  0x23   :  { %203 = shalt.err (!%p200_p1)
}
  0x24   :  { %32 = dma.hbm_to_vmem [thread:$0]  %s298_s1, 32, %s30_s17, [#allocation7]  }
  0x25   :  { %226 = dma.done.wait [#allocation4], 32  }
  0x26   :  { %227 = vsyncadd [#allocation4], 4294967264 }
  0x27   :  { %228 = dma.done.wait [#allocation7], 32  }
  0x28   :  { %229 = vsyncadd [#allocation7], 4294967264  ;;  %v43_v1 = vld [vmem:[#allocation6] sm:$0x3]  ;;  %vm45_vm0 = vcmask 254976   ;;  %v234_v7 = vmov 0.0   ;;  %v110_v11 = vlaneseq }
  0x29   :  { %v42_v2 = vld [vmem:[#allocation3] sm:$0x3]  ;;  %v51_v3 = vmul.f32 %v43_v1, %v43_v1  ;;  %140 = vmatprep.subr.bf16.mxu0 %v234_v7  ;;  %vm235_vm1 = vmmov 0   ;;  %v57_v8 = vld [vmem:[#allocation2] sm:$0x1]  ;;  %v236_v9 = vmov 0  }
  0x2a   :  { %v44_v4 = vmul.f32 %v42_v2, %v42_v2  ;;  %142 = vmatprep.mubr.msk.bf16.mxu0 %vm235_vm1, %v234_v7  ;;  %152 = vset.pattern.permute.xlu1 %v236_v9  ;;  %v58_v10 = vmul.f32 1.442695, %v57_v8  ;;  %v111_v12 = vshrl.u32 %v110_v11, 7  ;;  %vm62_vm2 = vcmask 261120   ;;  %s237_s1 = smov [#allocation8]  }
  0x2b   :  { %v52_v5 = vsel %vm45_vm0, %v51_v3, 0.0  ;;  %153 = vset.pattern.permute.xlu0 %v236_v9  ;;  %s127_s9 = sshll.u32 %s237_s1, 4  ;;  %vm119_vm3 = vcmask 9216   ;;  %s128_s9 = int_to_ptr.vmem [resolvable:$true] %s127_s9 }
  0x2c   :  { %53 = vadd.xlane.f32.xlu0 %v52_v5  ;;  %v46_v6 = vsel %vm45_vm0, %v44_v4, 0.0  ;;  %154 = vpow2.f32 %v58_v10  ;;  %v112_v13 = vsub.s32 0, %v111_v12  ;;  %s204_s10 = scalar_lea.vmem %s128_s9, 32  ;;  %p209_p3 = scmp.lt.s32.totalorder %s128_s9, %s128_s9 }
  0x2d   :  { %p205_p2 = scmp.ne.s32.totalorder %s128_s9, %s204_s10  ;;  %p210_p4 = scmp.lt.s32.totalorder %s204_s10, %s204_s10 }
  0x2f   :  { %p211_p5 = por %p210_p4, %p209_p3 }
  0x30   :  { %47 = vadd.xlane.f32.xlu0 %v46_v6 }
  0x31   :  { %p212_p6 = pnand %p211_p5, %p205_p2 }
  0x36   :  { %v155_v14 = vpop.eup %154 }
  0x37   :  { %v113_v15 = vrot.slane %v155_v14, %v112_v13 }
  0x39   :  { %115 = vperm.xlu1 %152, %v113_v15  }
  0xb8   :  { %v116_v25 = vpop.permute.xlu1 %115 }
  0xb9   :  { %v54_v16 = vpop.xlane.xlu0 %53 }
  0xba   :  { %156 = vrsqrt.f32 %v54_v16 }
  0xbd   :  { %v48_v17 = vpop.xlane.xlu0 %47 }
  0xbe   :  { %158 = vrsqrt.f32 %v48_v17 }
  0xc4   :  { %v157_v18 = vpop.eup %156 }
  0xc5   :  { %v56_v19 = vmul.f32 %v157_v18, %v43_v1 }
  0xc7   :  { %v61_v20 = vpack.c.bf16 %v56_v19, %v56_v19 }
  0xc8   :  { %v159_v21 = vpop.eup %158 }
  0xc9   :  { %v67_v22 = vsel %vm62_vm2, %v61_v20, 0  ;;  %v50_v23 = vmul.f32 %v159_v21, %v42_v2 }
  0xca   :  { %141 = vmatpush3.bf16.xpose.msra.mxu0 %v67_v22 }
  0xcb   :  { %v60_v24 = vpack.c.bf16 %v50_v23, %v50_v23 }
  0xd1   :  { %143 = vmatmul.mubr.msk.bf16.vlgmr.msra.gmra.mrb[0].mxu0 %vm62_vm2, %v60_v24 }
 0x1a4   :  { %v103_v26 = vpop.f32.mrb[0].mxu0 }
 0x1a5   :  { %v118_v27 = vmul.f32 %v116_v25, %v103_v26  ;;  %v144_v28 = vpop.f32.mrb[1].mxu0 }
 0x1a6   :  { %v106_v29 = vpop.f32.mrb[2].mxu0 }
 0x1a7   :  { %v145_v30 = vpop.f32.mrb[3].mxu0  ;;  %120 = vst.msk [vmem:[#allocation8] sm:$0x3] %vm119_vm3, %v118_v27 }
 0x1a8   :  { %215 = shalt.err (!%p212_p6)
}
 0x1a9   :  { %s216_s13 = scalar_lea.hbm %s300_s3, 32 }
 0x1aa   :  { %p217_p7 = scmp.ne.s32.totalorder %s300_s3, %s216_s13  ;;  %p220_p8 = scmp.lt.u32.totalorder %s216_s13, %s300_s3 }
 0x1ac   :  { %p222_p9 = pnand %p220_p8, %p217_p7 }
 0x1ae   :  { %225 = shalt.err (!%p222_p9)
}
 0x1af   :  { %130 = dma.vmem_to_hbm [thread:$0]  %s128_s9, 32, %s300_s3, [#allocation5]  }
 0x1b0   :  { %230 = dma.done.wait [#allocation5], 32  }
 0x1b1   :  { %231 = vsyncadd [#allocation5], 4294967264 }
 0x1b2   :  { %134 = vsyncpa [#allocation4], 1 }
 0x1b3   :  { %135 = vsyncpa [#allocation7], 1 }
 0x1b4   :  { %136 = vsyncpa [#allocation5], 1 }

// kernel: _lambda_.48
= control target key start
LH: loop header
LB: loop body
LE: loop exit
PB: predicated region body
PF: predicated region fallthrough
CT: control target
= control target key end

     0   :  { %9 = vsyncpa [#allocation3], 0  ;;  %s423_s0 = inlined_call_operand.hbm [shape: f32[2,32], index: 0, kind: input, shape index: {}]   ;;  %s424_s1 = inlined_call_operand.hbm [shape: bf16[32,32], index: 1, kind: input, shape index: {}]   ;;  %s425_s2 = inlined_call_operand.hbm [shape: f32[1,32], index: 2, kind: input, shape index: {}]   ;;  %s426_s3 = inlined_call_operand.hbm [shape: f32[1,32], index: 3, kind: input, shape index: {}]   ;;  %s427_s4 = inlined_call_operand.hbm [shape: f32[2,32], index: 4, kind: output, shape index: {}]  }
   0x1   :  { %10 = vsyncpa [#allocation6], 0 }
   0x2   :  { %11 = vsyncpa [#allocation9], 0 }
   0x3   :  { %12 = vsyncpa [#allocation4], 0  ;;  %s326_s15 = smov [#allocation5]   ;;  %s208_s19 = scalar_lea.hbm %s424_s1, 256 }
   0x4   :  { %s28_s16 = sshll.u32 %s326_s15, 4  ;;  %p209_p0 = scmp.ne.s32.totalorder %s424_s1, %s208_s19  ;;  %s29_s16 = int_to_ptr.vmem [resolvable:$true] %s28_s16 }
   0x5   :  { %p212_p1 = scmp.lt.u32.totalorder %s208_s19, %s424_s1 }
   0x7   :  { %p214_p2 = pnand %p212_p1, %p209_p0 }
   0x9   :  { %217 = shalt.err (!%p214_p2)
}
   0xa   :  { %s218_s24 = scalar_lea.vmem %s29_s16, 256  ;;  %p223_p4 = scmp.lt.s32.totalorder %s29_s16, %s29_s16 }
   0xb   :  { %p219_p3 = scmp.ne.s32.totalorder %s29_s16, %s218_s24  ;;  %p224_p5 = scmp.lt.s32.totalorder %s218_s24, %s218_s24 }
   0xd   :  { %p225_p6 = por %p224_p5, %p223_p4 }
   0xf   :  { %p226_p7 = pnand %p225_p6, %p219_p3 }
  0x11   :  { %229 = shalt.err (!%p226_p7)
}
  0x12   :  { %s327_s25 = smov 64   ;;  %s328_s26 = smov 4  }
  0x13   :  { %34 = dma.hbm_to_vmem [thread:$0]  %s424_s1, 256, %s29_s16, [#allocation6], %s327_s25, %s327_s25, %s328_s26  }
  0x14   :  { %s329_s29 = smov [#allocation2]   ;;  %s330_s5 = smov [#allocation7]  }
  0x15   :  { %s19_s30 = sshll.u32 %s329_s29, 4  ;;  %s41_s6 = sshll.u32 %s330_s5, 4  ;;  %s20_s30 = int_to_ptr.vmem [resolvable:$true] %s19_s30  ;;  %s42_s6 = int_to_ptr.vmem [resolvable:$true] %s41_s6 }
  0x16   :  { %s230_s9 = scalar_lea.hbm %s423_s0, 32 }
  0x17   :  { %p231_p8 = scmp.ne.s32.totalorder %s423_s0, %s230_s9  ;;  %p234_p9 = scmp.lt.u32.totalorder %s230_s9, %s423_s0 }
  0x19   :  { %p236_p10 = pnand %p234_p9, %p231_p8 }
  0x1b   :  { %239 = shalt.err (!%p236_p10)
}
  0x1c   :  { %s240_s1 = scalar_lea.vmem %s20_s30, 32  ;;  %p245_p12 = scmp.lt.s32.totalorder %s20_s30, %s20_s30 }
  0x1d   :  { %p241_p11 = scmp.ne.s32.totalorder %s20_s30, %s240_s1  ;;  %p246_p13 = scmp.lt.s32.totalorder %s240_s1, %s240_s1 }
  0x1f   :  { %p247_p0 = por %p246_p13, %p245_p12 }
  0x21   :  { %p248_p1 = pnand %p247_p0, %p241_p11 }
  0x23   :  { %251 = shalt.err (!%p248_p1)
}
  0x24   :  { %22 = dma.hbm_to_vmem [thread:$0]  %s423_s0, 32, %s20_s30, [#allocation3]  }
  0x25   :  { %s252_s18 = scalar_lea.hbm %s425_s2, 16 }
  0x26   :  { %p253_p2 = scmp.ne.s32.totalorder %s425_s2, %s252_s18  ;;  %p256_p3 = scmp.lt.u32.totalorder %s252_s18, %s425_s2 }
  0x28   :  { %p258_p4 = pnand %p256_p3, %p253_p2 }
  0x2a   :  { %261 = shalt.err (!%p258_p4)
}
  0x2b   :  { %s262_s23 = scalar_lea.vmem %s42_s6, 16  ;;  %s266_s24 = scalar_lea.vmem %s42_s6, 32 }
  0x2c   :  { %p263_p5 = scmp.ne.s32.totalorder %s42_s6, %s262_s23  ;;  %p267_p6 = scmp.lt.s32.totalorder %s42_s6, %s42_s6 }
  0x2d   :  { %p268_p7 = scmp.lt.s32.totalorder %s266_s24, %s262_s23 }
  0x2f   :  { %p269_p8 = por %p268_p7, %p267_p6 }
  0x31   :  { %p270_p9 = pnand %p269_p8, %p263_p5 }
  0x33   :  { %273 = shalt.err (!%p270_p9)
}
  0x34   :  { %44 = dma.hbm_to_vmem [thread:$0]  %s425_s2, 16, %s42_s6, [#allocation6]  }
  0x35   :  { %s331_s26 = smov [#allocation8]   ;;  %s274_s30 = scalar_lea.hbm %s426_s3, 16 }
  0x36   :  { %s51_s27 = sshll.u32 %s331_s26, 4  ;;  %p275_p10 = scmp.ne.s32.totalorder %s426_s3, %s274_s30  ;;  %s52_s27 = int_to_ptr.vmem [resolvable:$true] %s51_s27 }
  0x37   :  { %p278_p11 = scmp.lt.u32.totalorder %s274_s30, %s426_s3 }
  0x39   :  { %p280_p12 = pnand %p278_p11, %p275_p10 }
  0x3b   :  { %283 = shalt.err (!%p280_p12)
}
  0x3c   :  { %s284_s10 = scalar_lea.vmem %s52_s27, 16  ;;  %s288_s2 = scalar_lea.vmem %s52_s27, 32 }
  0x3d   :  { %p285_p13 = scmp.ne.s32.totalorder %s52_s27, %s284_s10  ;;  %p289_p0 = scmp.lt.s32.totalorder %s52_s27, %s52_s27 }
  0x3e   :  { %p290_p1 = scmp.lt.s32.totalorder %s288_s2, %s284_s10 }
  0x40   :  { %p291_p2 = por %p290_p1, %p289_p0 }
  0x42   :  { %p292_p3 = pnand %p291_p2, %p285_p13 }
  0x44   :  { %295 = shalt.err (!%p292_p3)
}
  0x45   :  { %54 = dma.hbm_to_vmem [thread:$0]  %s426_s3, 16, %s52_s27, [#allocation9]  }
  0x46   :  { %318 = dma.done.wait [#allocation3], 32  }
  0x47   :  { %319 = vsyncadd [#allocation3], 4294967264 }
  0x48   :  { %320 = dma.done.wait [#allocation6], 272  }
  0x49   :  { %321 = vsyncadd [#allocation6], 4294967024 }
  0x4a   :  { %322 = dma.done.wait [#allocation9], 16  }
  0x4b   :  { %323 = vsyncadd [#allocation9], 4294967280  ;;  %vm69_vm0 = vcmask 254976   ;;  %v68_v0 = vld [vmem:[#allocation2] sm:$0x3]  ;;  %v204_v7 = vld [vmem:[#allocation5] sm:$0xff]  }
  0x4c   :  { %v70_v1 = vsel %vm69_vm0, %v68_v0, 0.0  ;;  %v332_v8 = vmov 0.0   ;;  %v205_v9 = vld [vmem:[#allocation5 + $0x8] sm:$0xff]   ;;  %vm333_vm1 = vmmov 0   ;;  %v179_v14 = vld [vmem:[#allocation7] ss:$0 sm:$0xff] }
  0x4d   :  { %71 = vadd.xlane.f32.xlu0 %v70_v1  ;;  %187 = vmatprep.subr.bf16.mxu0 %v332_v8  ;;  %v180_v16 = vld [vmem:[#allocation8] ss:$0 sm:$0xff]  ;;  %vm117_vm2 = vcmask 261120   ;;  %s334_s3 = smov [#allocation10]  }
  0x4e   :  { %188 = vmatpush3.bf16.msra.mxu0 %v204_v7  ;;  %191 = vmatprep.mubr.msk.bf16.mxu0 %vm333_vm1, %v332_v8  ;;  %s168_s12 = sshll.u32 %s334_s3, 4  ;;  %s169_s12 = int_to_ptr.vmem [resolvable:$true] %s168_s12 }
  0x4f   :  { %189 = vmatprep.subr.bf16.mxu0 %v332_v8  ;;  %s296_s13 = scalar_lea.vmem %s169_s12, 32  ;;  %p301_p5 = scmp.lt.s32.totalorder %s169_s12, %s169_s12 }
  0x50   :  { %p297_p4 = scmp.ne.s32.totalorder %s169_s12, %s296_s13  ;;  %p302_p6 = scmp.lt.s32.totalorder %s296_s13, %s296_s13 }
  0x52   :  { %190 = vmatpush3.bf16.msra.mxu0 %v205_v9  ;;  %p303_p7 = por %p302_p6, %p301_p5 }
  0x54   :  { %p304_p8 = pnand %p303_p7, %p297_p4 }
  0xda   :  { %v72_v2 = vpop.xlane.xlu0 %71 }
  0xdb   :  { %v74_v3 = vmul.f32 0.03125, %v72_v2 }
  0xdd   :  { %v75_v4 = vsub.f32 %v68_v0, %v74_v3 }
  0xdf   :  { %v76_v5 = vmul.f32 %v75_v4, %v75_v4 }
  0xe1   :  { %v77_v6 = vsel %vm69_vm0, %v76_v5, 0.0 }
  0xe2   :  { %78 = vadd.xlane.f32.xlu0 %v77_v6 }
 0x16f   :  { %v79_v10 = vpop.xlane.xlu0 %78 }
 0x170   :  { %v80_v11 = vmul.f32 0.03125, %v79_v10 }
 0x172   :  { %v81_v12 = vadd.f32 1e-05, %v80_v11 }
 0x174   :  { %206 = vrsqrt.f32 %v81_v12 }
 0x17e   :  { %v207_v13 = vpop.eup %206 }
 0x17f   :  { %v83_v15 = vmul.f32 %v207_v13, %v75_v4 }
 0x181   :  { %v91_v17 = vmul.f32 %v179_v14, %v83_v15 }
 0x183   :  { %v99_v18 = vadd.f32 %v180_v16, %v91_v17 }
 0x185   :  { %v100_v19 = vpack.c.bf16 %v99_v18, %v99_v18 }
 0x187   :  { %192 = vmatmul.mubr.msk.bf16.vlgmr.msra.gmra.mrb[0].mxu0 %vm117_vm2, %v100_v19 }
 0x25a   :  { %v155_v20 = vpop.f32.mrb[0].mxu0 }
 0x25b   :  { %161 = vst.msk [vmem:[#allocation10] sm:$0x3] %vm69_vm0, %v155_v20  ;;  %v193_v21 = vpop.f32.mrb[1].mxu0 }
 0x25c   :  { %v158_v22 = vpop.f32.mrb[2].mxu0 }
 0x25d   :  { %307 = shalt.err (!%p304_p8)
}
 0x25e   :  { %s308_s15 = scalar_lea.hbm %s427_s4, 32 }
 0x25f   :  { %p309_p9 = scmp.ne.s32.totalorder %s427_s4, %s308_s15  ;;  %p312_p10 = scmp.lt.u32.totalorder %s308_s15, %s427_s4 }
 0x261   :  { %p314_p11 = pnand %p312_p10, %p309_p9 }
 0x263   :  { %317 = shalt.err (!%p314_p11)
}
 0x264   :  { %171 = dma.vmem_to_hbm [thread:$0]  %s169_s12, 32, %s427_s4, [#allocation4]   ;;  %v194_v23 = vpop.f32.mrb[3].mxu0 }
 0x265   :  { %324 = dma.done.wait [#allocation4], 32  }
 0x266   :  { %325 = vsyncadd [#allocation4], 4294967264 }
 0x267   :  { %175 = vsyncpa [#allocation3], 1 }
 0x268   :  { %176 = vsyncpa [#allocation6], 1 }
 0x269   :  { %177 = vsyncpa [#allocation9], 1 }
 0x26a   :  { %178 = vsyncpa [#allocation4], 1 }

</bundles_post_ra>
